<compile_context>
chip_gen: v7x
topology: tpu7x:2x2x1
jax: 0.10.0
libtpu: 0.0.40
codegen_flags: <defaults>
</compile_context>

<pallas_src>
import jax
import jax.numpy as jnp
from jax import lax
from jax.experimental import pallas as pl
from jax.experimental.pallas import tpu as pltpu

# ----------------- synthetic configuration (mirrors cfg.* usage) -----------------
B = 2             # batch
N = 8             # residues
K = 20            # cfg.interpolant.seqs.num_classes
SIMPLEX_K = 5.0   # cfg.interpolant.seqs.simplex_value
NUM_ANGLES = 5    # torsion angles per residue
MAX_ATOMS = 15    # max_num_heavyatoms
NODE_DIM = 32     # cfg.encoder.node_embed_size
EDGE_DIM = 16     # cfg.encoder.edge_embed_size
T_CLIP = 0.9      # cfg.interpolant.t_normalization_clip
SIGMA_DATA = 0.5
P_MEAN, P_STD = -1.0, 1.4
ATOM_N, ATOM_CA, ATOM_C = 0, 1, 2   # BBHeavyAtom convention

# lane-dense padded dims
NODE_IN = 30                 # 22 (aa onehot) + 3 (trans) + 5 (angles)
NODE_IN_PAD = 128
HIDDEN = 256                 # fills the 256-wide MXU on v6e/v7x
NODE_DIM_PAD = 128
EDGE_PAD = 128
GA_OUT = 9 + 3 + NUM_ANGLES + K            # 37
GA_OUT_PAD = 128
XT_PAD = 128                               # interp output lane width
XT_FEAT = 3 + 14 + K                       # 37
# xt lane layout: [0:3 trans_t_c | 3:12 rotmats_t | 12:17 angles_t | 17:37 onehot(seqs_t)]
ROW_TILE = 8                               # B*N row tile for the encoder grid

VMEM = pltpu.MemorySpace.VMEM


def _vspecs(n):
    return [pl.BlockSpec(memory_space=VMEM) for _ in range(n)]


def _mish(h):
    # Mish = h * tanh(softplus(h)); single transcendental: s = 1 + exp(h),
    # tanh(log s) = (s^2 - 1) / (s^2 + 1).  Overflow-safe bypass for large h.
    e = jnp.exp(jnp.minimum(h, 20.0))
    s = 1.0 + e
    s2 = s * s
    t = (s2 - 1.0) * pl.reciprocal(s2 + 1.0, approx=True)
    return jnp.where(h > 20.0, h, h * t)


# =============================== Pallas kernels ===================================

def _edge_pool_kernel(trans_ref, cent_ref, out_ref):
    # EdgeEmbedder stand-in: RBF of pairwise CA distances, mean-pooled over neighbours.
    # Pairwise D^2 in one MXU pass (augmented-feature trick, no transposes), RBF on EUP.
    # Output is a single unmasked (N, 128) store (lanes >= EDGE_DIM are zero).
    tr = trans_ref[...]                                        # (N, 3)
    cent = cent_ref[...]                                       # (1, EDGE_DIM)
    sq = jnp.sum(tr * tr, axis=-1, keepdims=True)              # (N, 1)
    ones = jnp.ones_like(sq)
    aug_a = jnp.concatenate([tr, sq, ones], axis=-1)           # (N, 5)
    aug_b = jnp.concatenate([-2.0 * tr, ones, sq], axis=-1)    # (N, 5)
    d2 = lax.dot_general(aug_a, aug_b, (((1,), (1,)), ((), ())),
                         preferred_element_type=jnp.float32)   # (N, N) = |i|^2+|j|^2-2 i.j
    d = jnp.sqrt(jnp.maximum(d2, 0.0))
    rbf = jnp.exp(-0.25 * (d[:, :, None] - cent[None, :, :]) ** 2)   # (N, N, E)
    acc = jnp.sum(rbf, axis=1) * (1.0 / float(N))              # (N, E) mean over neighbours
    out_ref[...] = jnp.concatenate(
        [acc, jnp.zeros((N, EDGE_PAD - EDGE_DIM), jnp.float32)], axis=-1)


def edge_pool(trans, centers):
    # TODO(synk): at production N, tile the neighbour axis (fori_loop / grid) instead of
    #             holding the (N,N,E) block in VMEM, and set vmem_limit_bytes.
    return pl.pallas_call(
        _edge_pool_kernel,
        out_shape=jax.ShapeDtypeStruct((B, N, EDGE_PAD), jnp.float32),
        grid=(B,),
        in_specs=[pl.BlockSpec((None, N, 3), lambda b: (b, 0, 0)),
                  pl.BlockSpec((1, EDGE_DIM), lambda b: (0, 0))],
        out_specs=pl.BlockSpec((None, N, EDGE_PAD), lambda b: (b, 0, 0)),
        compiler_params=pltpu.CompilerParams(dimension_semantics=("parallel",)),
    )(trans, centers)


def _fused_interp_kernel(cos_ref, sin_ref, gen_ref, res_ref, seq1_ref,
                         trans1_ref, geo1_ref, trans0_ref, geo0_ref, seq0x_ref,
                         out_ref):
    # One fused kernel for:
    #   zero_center_part(trans_0)  ->  trans_0_c
    #   seq_to_simplex(seqs_1)     ->  seqs_1_simplex
    #   x_t = where(gen, cos(t)*x_1 + sin(t)*x_0, x_1)   for trans / rot / angles / simplex
    #   seqs_t = where(gen, argmax(softmax(seqs_t_simplex)), seqs_1) -> one-hot
    # Output row is assembled in registers and stored once, lane-dense (128 lanes).
    c = cos_ref[...][:, :, None]                   # (B,1,1)
    s = sin_ref[...][:, :, None]
    gen = gen_ref[...]                             # (B,N)
    genb = gen[..., None] > 0.5                    # (B,N,1)
    res = res_ref[...][..., None]                  # (B,N,1)

    # zero-center the raw trans_0 noise over generated residues
    t0 = trans0_ref[...]                                                  # (B,N,3)
    gsum = jnp.sum(gen, axis=1, keepdims=True)[..., None]                 # (B,1,1)
    center = jnp.sum(t0 * gen[..., None], axis=1, keepdims=True) / (gsum + 1e-8)
    t0c = (t0 - center) * res

    tr1 = trans1_ref[...]
    trans_t = jnp.where(genb, c * tr1 + s * t0c, tr1)                     # (B,N,3)

    g1 = geo1_ref[...]                                                    # (B,N,14): rot|angles
    g0 = geo0_ref[...]
    geo_t = jnp.where(genb, c * g1 + s * g0, g1)                          # (B,N,14)

    # seqs: simplex from seqs_1 (clampped one-hot), interpolate, argmax(softmax) == argmax
    kiota = lax.broadcasted_iota(jnp.int32, (B, N, K), 2)
    sq1 = seq1_ref[...][..., None]                                        # (B,N,1) int32
    oh1 = jnp.where((kiota == sq1) & (sq1 >= 0) & (sq1 < K), 1.0, 0.0)
    s1x = oh1 * (2.0 * SIMPLEX_K) - SIMPLEX_K                             # seqs_1_simplex
    st_simplex = jnp.where(genb, c * s1x + s * seq0x_ref[...], s1x)
    mx = jnp.max(st_simplex, axis=-1, keepdims=True)
    first_max = jnp.min(jnp.where(st_simplex >= mx, kiota, K), axis=-1, keepdims=True)
    st_idx = jnp.where(genb, first_max, sq1)                              # (B,N,1)
    seq_t_oh = jnp.where(kiota == st_idx, 1.0, 0.0)                       # (B,N,K)

    out_ref[...] = jnp.concatenate(
        [trans_t, geo_t, seq_t_oh,
         jnp.zeros((B, N, XT_PAD - XT_FEAT), jnp.float32)], axis=-1)


def fused_interp(cos_t, sin_t, gen_mask, res_mask, seqs_1, trans_1, geo_1,
                 trans_0, geo_0, seqs_0_simplex):
    return pl.pallas_call(
        _fused_interp_kernel,
        out_shape=jax.ShapeDtypeStruct((B, N, XT_PAD), jnp.float32),
        in_specs=_vspecs(10),
        out_specs=pl.BlockSpec(memory_space=VMEM),
    )(cos_t, sin_t, gen_mask, res_mask, seqs_1, trans_1, geo_1,
      trans_0, geo_0, seqs_0_simplex)


def _encoder_kernel(nodein_ref, edge_ref, xt_ref, t_ref,
                    nw1_ref, nb1_ref, nw2_ref, nb2_ref,
                    gw1a_ref, gw1b_ref, gw1c_ref, gw1d_ref, gb1_ref,
                    gw2_ref, gb2_ref, out_ref):
    # NodeEmbedder + GAEncoder stand-ins fused: bf16 operands on the MXU, f32 accumulate.
    # GA W1 is split per input block, so [node_embed | edge | x_t | t] is never
    # concatenated/padded in HBM.
    h = jnp.dot(nodein_ref[...].astype(jnp.bfloat16), nw1_ref[...],
                preferred_element_type=jnp.float32) + nb1_ref[...]
    h = _mish(h)
    node_embed = jnp.dot(h.astype(jnp.bfloat16), nw2_ref[...],
                         preferred_element_type=jnp.float32) + nb2_ref[...]

    g = (jnp.dot(node_embed.astype(jnp.bfloat16), gw1a_ref[...],
                 preferred_element_type=jnp.float32)
         + jnp.dot(edge_ref[...].astype(jnp.bfloat16), gw1b_ref[...],
                   preferred_element_type=jnp.float32)
         + jnp.dot(xt_ref[...].astype(jnp.bfloat16), gw1c_ref[...],
                   preferred_element_type=jnp.float32)
         + t_ref[...] * gw1d_ref[...]
         + gb1_ref[...])
    g = _mish(g)
    out_ref[...] = jnp.dot(g.astype(jnp.bfloat16), gw2_ref[...],
                           preferred_element_type=jnp.float32) + gb2_ref[...]


def encoder(node_in, edge_flat, xt_flat, t_flat, p):
    rows = node_in.shape[0]

    def full(a):
        return pl.BlockSpec(a.shape, lambda r: (0,) * a.ndim)

    return pl.pallas_call(
        _encoder_kernel,
        out_shape=jax.ShapeDtypeStruct((rows, GA_OUT_PAD), jnp.float32),
        grid=(rows // ROW_TILE,),
        in_specs=[pl.BlockSpec((ROW_TILE, NODE_IN_PAD), lambda r: (r, 0)),
                  pl.BlockSpec((ROW_TILE, EDGE_PAD), lambda r: (r, 0)),
                  pl.BlockSpec((ROW_TILE, XT_PAD), lambda r: (r, 0)),
                  pl.BlockSpec((ROW_TILE, 1), lambda r: (r, 0)),
                  full(p['node_w1']), full(p['node_b1']),
                  full(p['node_w2']), full(p['node_b2']),
                  full(p['ga_w1a']), full(p['ga_w1b']), full(p['ga_w1c']),
                  full(p['ga_w1d']), full(p['ga_b1']),
                  full(p['ga_w2']), full(p['ga_b2'])],
        out_specs=pl.BlockSpec((ROW_TILE, GA_OUT_PAD), lambda r: (r, 0)),
        compiler_params=pltpu.CompilerParams(dimension_semantics=("parallel",)),
    )(node_in, edge_flat, xt_flat, t_flat,
      p['node_w1'], p['node_b1'], p['node_w2'], p['node_b2'],
      p['ga_w1a'], p['ga_w1b'], p['ga_w1c'], p['ga_w1d'], p['ga_b1'],
      p['ga_w2'], p['ga_b2'])


def _fused_loss_kernel(pt_ref, prv_ref, pbb_ref, pang_ref, logits_ref,
                       gt_ref, grv_ref, gbb_ref, a1_ref, at_ref,
                       labels_ref, tor_ref, gen_ref, scale_ref, out_ref):
    # All six masked loss reductions in one launch; single (B, 8) store.
    gen = gen_ref[...]                                 # (B,N)
    gm3 = gen[..., None]
    gden = jnp.sum(gen, axis=1, keepdims=True) + 1e-8  # (B,1), exact division
    ns = scale_ref[...][:, :, None]                    # (B,1,1)

    def msum(x):                                       # (B,N,D) -> (B,1)
        return jnp.sum(jnp.sum(x, axis=2), axis=1, keepdims=True)

    dtr = pt_ref[...] - gt_ref[...]
    trans_l = msum(dtr * dtr * gm3) / gden
    drv = (grv_ref[...] - prv_ref[...]) * ns
    rot_l = msum(drv * drv * gm3) / gden
    dbb = gbb_ref[...] - pbb_ref[...]
    bb_l = msum(dbb * dbb * gm3) / gden

    # seqs_loss: cross entropy on pred logits against clamped seqs_1
    lg = logits_ref[...]                               # (B,N,K)
    mxl = jnp.max(lg, axis=-1, keepdims=True)
    lse = jnp.log(jnp.sum(jnp.exp(lg - mxl), axis=-1, keepdims=True)) + mxl
    kiota = lax.broadcasted_iota(jnp.int32, (B, N, K), 2)
    gold = jnp.sum(jnp.where(kiota == labels_ref[...][..., None], lg, 0.0),
                   axis=-1, keepdims=True)
    seqs_l = msum((lse - gold) * gm3) / gden

    # angle_loss / torsion_loss (torus logmap + sin/cos embedding; doubled mask -> 2x denom)
    angles_1 = a1_ref[...]
    angles_t = at_ref[...]
    pred_ang = pang_ref[...]
    am = tor_ref[...] * gm3                            # (B,N,5)
    amden = 2.0 * msum(am) + 1e-8
    twopi = 2.0 * jnp.pi

    def wrap(x):                                       # wrap to [-pi, pi)
        y = x + jnp.pi
        return y - twopi * jnp.floor(y / twopi) - jnp.pi

    gt_vf = wrap(angles_1 - angles_t)
    pr_vf = wrap(pred_ang - angles_t)
    dsin = (jnp.sin(gt_vf) - jnp.sin(pr_vf)) * ns
    dcos = (jnp.cos(gt_vf) - jnp.cos(pr_vf)) * ns
    angle_l = msum((dsin * dsin + dcos * dcos) * am) / amden
    ds1 = jnp.sin(pred_ang) - jnp.sin(angles_1)
    dc1 = jnp.cos(pred_ang) - jnp.cos(angles_1)
    torsion_l = msum((ds1 * ds1 + dc1 * dc1) * am) / amden

    out_ref[...] = jnp.concatenate(
        [trans_l, rot_l, bb_l, seqs_l, angle_l, torsion_l,
         jnp.zeros((B, 2), jnp.float32)], axis=-1)


def fused_losses(pred_trans, pred_rot_vf, pred_bb, pred_angles, pred_logits,
                 gt_trans, gt_rot_vf, gt_bb, angles_1, angles_t,
                 labels, tor_mask5, gen_mask, norm_scale):
    return pl.pallas_call(
        _fused_loss_kernel,
        out_shape=jax.ShapeDtypeStruct((B, 8), jnp.float32),
        in_specs=_vspecs(14),
        out_specs=pl.BlockSpec(memory_space=VMEM),
    )(pred_trans, pred_rot_vf, pred_bb, pred_angles, pred_logits,
      gt_trans, gt_rot_vf, gt_bb, angles_1, angles_t,
      labels, tor_mask5, gen_mask, norm_scale)


# ================================ JAX glue =======================================

def construct_3d_basis(center, p1, p2):
    v1 = p1 - center
    e1 = v1 / (jnp.linalg.norm(v1, axis=-1, keepdims=True) + 1e-8)
    v2 = p2 - center
    u2 = v2 - jnp.sum(e1 * v2, axis=-1, keepdims=True) * e1
    e2 = u2 / (jnp.linalg.norm(u2, axis=-1, keepdims=True) + 1e-8)
    e3 = jnp.cross(e1, e2)
    return jnp.stack([e1, e2, e3], axis=-1)            # (...,3,3), columns


def gram_schmidt(M):
    c0, c1 = M[..., :, 0], M[..., :, 1]
    e1 = c0 / (jnp.linalg.norm(c0, axis=-1, keepdims=True) + 1e-8)
    u2 = c1 - jnp.sum(e1 * c1, axis=-1, keepdims=True) * e1
    e2 = u2 / (jnp.linalg.norm(u2, axis=-1, keepdims=True) + 1e-8)
    e3 = jnp.cross(e1, e2)
    return jnp.stack([e1, e2, e3], axis=-1)


def uniform_so3(key, b, n):
    q = jax.random.normal(key, (b, n, 4))
    q = q / (jnp.linalg.norm(q, axis=-1, keepdims=True) + 1e-8)
    w, x, y, z = q[..., 0], q[..., 1], q[..., 2], q[..., 3]
    r0 = jnp.stack([1 - 2 * (y * y + z * z), 2 * (x * y - z * w), 2 * (x * z + y * w)], -1)
    r1 = jnp.stack([2 * (x * y + z * w), 1 - 2 * (x * x + z * z), 2 * (y * z - x * w)], -1)
    r2 = jnp.stack([2 * (x * z - y * w), 2 * (y * z + x * w), 1 - 2 * (x * x + y * y)], -1)
    return jnp.stack([r0, r1, r2], axis=-2)


def calc_rot_vf(R_t, R_1):
    rel = jnp.einsum('...ji,...jk->...ik', R_t, R_1)   # R_t^T R_1
    tr = rel[..., 0, 0] + rel[..., 1, 1] + rel[..., 2, 2]
    cosang = jnp.clip((tr - 1.0) / 2.0, -1.0 + 1e-6, 1.0 - 1e-6)
    ang = jnp.arccos(cosang)
    skew = 0.5 * (rel - jnp.swapaxes(rel, -1, -2))
    vec = jnp.stack([skew[..., 2, 1], skew[..., 0, 2], skew[..., 1, 0]], axis=-1)
    return vec * (ang / (jnp.sin(ang) + 1e-8))[..., None]


IDEAL_BB = jnp.array([[-0.525, 1.363, 0.0],   # N
                      [0.0, 0.0, 0.0],        # CA
                      [1.526, 0.0, 0.0]],     # C
                     dtype=jnp.float32)


def to_atom_bb3(trans, rot):
    # first 3 atoms of all_atom.to_atom37: rigid transform of ideal backbone coords
    return jnp.einsum('bnij,aj->bnai', rot, IDEAL_BB) + trans[:, :, None, :]


def init_params(key):
    ks = jax.random.split(key, 9)
    bf = jnp.bfloat16

    def lin(k, fi, fo):
        return jax.random.normal(k, (fi, fo), jnp.float32) / jnp.sqrt(fi)

    node_w2 = lin(ks[1], HIDDEN, NODE_DIM_PAD)
    node_w2 = node_w2 * (jnp.arange(NODE_DIM_PAD) < NODE_DIM).astype(jnp.float32)[None, :]
    ga_w2 = lin(ks[6], HIDDEN, GA_OUT_PAD)
    ga_w2 = ga_w2 * (jnp.arange(GA_OUT_PAD) < GA_OUT).astype(jnp.float32)[None, :]
    return {
        # NodeEmbedder stand-in (bf16 MXU weights, f32 biases; padded rows see zeros)
        'node_w1': lin(ks[0], NODE_IN_PAD, HIDDEN).astype(bf),
        'node_b1': jnp.zeros((1, HIDDEN), jnp.float32),
        'node_w2': node_w2.astype(bf),
        'node_b2': jnp.zeros((1, NODE_DIM_PAD), jnp.float32),
        # GAEncoder stand-in with W1 split per input block
        'ga_w1a': lin(ks[2], NODE_DIM_PAD, HIDDEN).astype(bf),
        'ga_w1b': lin(ks[3], EDGE_PAD, HIDDEN).astype(bf),
        'ga_w1c': lin(ks[4], XT_PAD, HIDDEN).astype(bf),
        'ga_w1d': lin(ks[5], 1, HIDDEN),                    # f32, VPU broadcast (t feature)
        'ga_b1': jnp.zeros((1, HIDDEN), jnp.float32),
        'ga_w2': ga_w2.astype(bf),
        'ga_b2': jnp.zeros((1, GA_OUT_PAD), jnp.float32),
        # EdgeEmbedder stand-in (RBF centers)
        'edge_centers': jnp.linspace(0.0, 20.0, EDGE_DIM).astype(jnp.float32).reshape(1, EDGE_DIM),
        # synthetic torsions_mask table (K aa types x NUM_ANGLES)
        'torsion_table': ((jnp.arange(K)[:, None] % 6) >= jnp.arange(NUM_ANGLES)[None, :]).astype(jnp.float32),
        # weight_network (declared in __init__ but unused in forward)
        'wn_w1': lin(ks[7], 1, 256), 'wn_b1': jnp.zeros((1, 256), jnp.float32),
        'wn_w2': lin(ks[8], 256, 1), 'wn_b2': jnp.zeros((1, 1), jnp.float32),
    }


def flow_model_forward(params, batch, key):
    aa = batch['aa']                                   # (B,N) int32
    gen_mask_b = batch['generate_mask']                # (B,N) bool
    gen_mask = gen_mask_b.astype(jnp.float32)
    res_mask = batch['res_mask'].astype(jnp.float32)
    pos = batch['pos_heavyatom']                       # (B,N,MAX_ATOMS,3)
    angles_1 = batch['torsion_angle']                  # (B,N,5)

    # ------------------------------- encode -------------------------------
    rotmats_1 = construct_3d_basis(pos[:, :, ATOM_CA], pos[:, :, ATOM_C], pos[:, :, ATOM_N])
    trans_1 = pos[:, :, ATOM_CA]
    trans_1_c = trans_1
    seqs_1 = aa

    aa_onehot = jax.nn.one_hot(aa, 22, dtype=jnp.float32)
    node_in = jnp.concatenate([aa_onehot, trans_1, angles_1], axis=-1).reshape(B * N, NODE_IN)
    node_in = jnp.pad(node_in, ((0, 0), (0, NODE_IN_PAD - NODE_IN)))

    # EdgeEmbedder stand-in: fused RBF + mean-pool, batch-parallel grid
    pooled_edge = edge_pool(trans_1, params['edge_centers'])          # (B,N,128), lanes>=16 zero

    # -------------------------- noise / interpolation ----------------------
    k_sigma, k_trans, k_rot, k_ang, k_seq = jax.random.split(key, 5)
    sigma = jnp.exp(jax.random.normal(k_sigma, (B, 1)) * P_STD + P_MEAN)
    t = jnp.arctan(sigma / SIGMA_DATA)                 # (B,1)
    cos_t, sin_t = jnp.cos(t), jnp.sin(t)

    trans_0 = jax.random.normal(k_trans, (B, N, 3)) * SIGMA_DATA
    # NOTE: matches the reference literally (linear interpolation of rotation matrices
    #       with rotmats_0 scaled by sigma_data), even though rotmats_t is not in SO(3).
    rotmats_0 = uniform_so3(k_rot, B, N) * SIGMA_DATA
    angles_0 = jax.random.uniform(k_ang, (B, N, NUM_ANGLES),
                                  minval=-jnp.pi, maxval=jnp.pi) * SIGMA_DATA
    seqs_0_simplex = SIMPLEX_K * jax.random.normal(k_seq, (B, N, K))

    geo_1 = jnp.concatenate([rotmats_1.reshape(B, N, 9), angles_1], axis=-1)   # (B,N,14)
    geo_0 = jnp.concatenate([rotmats_0.reshape(B, N, 9), angles_0], axis=-1)   # (B,N,14)

    xt_pack = fused_interp(cos_t, sin_t, gen_mask, res_mask, seqs_1,
                           trans_1_c, geo_1, trans_0, geo_0, seqs_0_simplex)   # (B,N,128)
    trans_t_c = xt_pack[:, :, 0:3]
    rotmats_t = xt_pack[:, :, 3:12].reshape(B, N, 3, 3)
    angles_t = xt_pack[:, :, 12:17]

    # ----------------- fused NodeEmbedder + GAEncoder stand-in -------------
    t_flat = jnp.broadcast_to(t[:, None, :], (B, N, 1)).reshape(B * N, 1)
    ga_out = encoder(node_in, pooled_edge.reshape(B * N, EDGE_PAD),
                     xt_pack.reshape(B * N, XT_PAD), t_flat, params).reshape(B, N, GA_OUT_PAD)

    pred_rotmats_1 = gram_schmidt(ga_out[..., 0:9].reshape(B, N, 3, 3))
    pred_trans_1 = ga_out[..., 9:12]
    pred_angles_1 = ga_out[..., 12:12 + NUM_ANGLES]
    pred_logits = ga_out[..., 12 + NUM_ANGLES:GA_OUT]                          # (B,N,K)

    # TODO(synk): sample_from (multinomial) replaced by argmax of the probabilities.
    pred_seqs_1 = jnp.argmax(pred_logits, axis=-1).astype(jnp.int32)
    seqs_1_clamped = jnp.clip(seqs_1, 0, 19)
    pred_seqs_1 = jnp.where(gen_mask_b, pred_seqs_1, seqs_1_clamped)
    pred_trans_1_c = pred_trans_1          # reference discards the centered variant

    norm_scale = 1.0 / (1.0 - jnp.minimum(t, T_CLIP))                          # (B,1)

    # ------------------------------- losses --------------------------------
    gt_rot_vf = calc_rot_vf(rotmats_t, rotmats_1)
    pred_rot_vf = calc_rot_vf(rotmats_t, pred_rotmats_1)
    gt_bb = to_atom_bb3(trans_1_c, rotmats_1).reshape(B, N, 9)
    pred_bb = to_atom_bb3(pred_trans_1_c, pred_rotmats_1).reshape(B, N, 9)
    tor_mask5 = params['torsion_table'][pred_seqs_1]                           # (B,N,5)

    losses_pb = fused_losses(pred_trans_1_c, pred_rot_vf, pred_bb, pred_angles_1, pred_logits,
                             trans_1_c, gt_rot_vf, gt_bb, angles_1, angles_t,
                             seqs_1_clamped, tor_mask5, gen_mask, norm_scale)  # (B,8)
    lm = jnp.mean(losses_pb, axis=0)
    return {'trans_loss': lm[0], 'rot_loss': lm[1], 'bb_atom_loss': lm[2],
            'seqs_loss': lm[3], 'angle_loss': lm[4], 'torsion_loss': lm[5]}


# ================================== main =========================================

if __name__ == "__main__":
    key = jax.random.PRNGKey(0)
    pk, bk, nk = jax.random.split(key, 3)
    params = init_params(pk)

    kb = jax.random.split(bk, 4)
    batch = {
        'aa': jax.random.randint(kb[0], (B, N), 0, K).astype(jnp.int32),
        'pos_heavyatom': (jax.random.normal(kb[1], (B, N, MAX_ATOMS, 3)) * 3.0).astype(jnp.float32),
        'mask_heavyatom': jnp.ones((B, N, MAX_ATOMS), bool),
        'res_nb': jnp.broadcast_to(jnp.arange(N, dtype=jnp.int32), (B, N)),
        'chain_nb': jnp.zeros((B, N), jnp.int32),
        'torsion_angle': jax.random.uniform(kb[2], (B, N, NUM_ANGLES),
                                            minval=-jnp.pi, maxval=jnp.pi).astype(jnp.float32),
        'torsion_angle_mask': jnp.ones((B, N, NUM_ANGLES), jnp.int32),
        'generate_mask': jax.random.bernoulli(kb[3], 0.5, (B, N)),
        'res_mask': jnp.ones((B, N), bool),
    }

    forward = jax.jit(flow_model_forward)
    losses = forward(params, batch, nk)
    losses = jax.tree_util.tree_map(jax.block_until_ready, losses)
    for name, v in sorted(losses.items()):
        assert bool(jnp.isfinite(v)), f"non-finite loss: {name}"
    print("KERNEL_OK")
</pallas_src>

<mosaic_0001>
module attributes {stable_mosaic.version = 11 : i64} {
  func.func @_fused_interp_kernel(%arg0: memref<2x1xf32, #tpu.memory_space<vmem>>, %arg1: memref<2x1xf32, #tpu.memory_space<vmem>>, %arg2: memref<2x8xf32, #tpu.memory_space<vmem>>, %arg3: memref<2x8xf32, #tpu.memory_space<vmem>>, %arg4: memref<2x8xi32, #tpu.memory_space<vmem>>, %arg5: memref<2x8x3xf32, #tpu.memory_space<vmem>>, %arg6: memref<2x8x14xf32, #tpu.memory_space<vmem>>, %arg7: memref<2x8x3xf32, #tpu.memory_space<vmem>>, %arg8: memref<2x8x14xf32, #tpu.memory_space<vmem>>, %arg9: memref<2x8x20xf32, #tpu.memory_space<vmem>>, %arg10: memref<2x8x128xf32, #tpu.memory_space<vmem>>) attributes {dimension_semantics = [], scalar_prefetch = 0 : i64, scratch_operands = 0 : i64, tpu.core_type = #tpu.core_type<tc>} {
    %c0 = arith.constant 0 : index
    %c0_0 = arith.constant 0 : index
    %0 = vector.load %arg0[%c0, %c0_0] : memref<2x1xf32, #tpu.memory_space<vmem>>, vector<2x1xf32>
    %1 = vector.shape_cast %0 : vector<2x1xf32> to vector<2x1x1xf32>
    %c0_1 = arith.constant 0 : index
    %c0_2 = arith.constant 0 : index
    %2 = vector.load %arg1[%c0_1, %c0_2] : memref<2x1xf32, #tpu.memory_space<vmem>>, vector<2x1xf32>
    %3 = vector.shape_cast %2 : vector<2x1xf32> to vector<2x1x1xf32>
    %c0_3 = arith.constant 0 : index
    %c0_4 = arith.constant 0 : index
    %4 = vector.load %arg2[%c0_3, %c0_4] : memref<2x8xf32, #tpu.memory_space<vmem>>, vector<2x8xf32>
    %5 = vector.shape_cast %4 : vector<2x8xf32> to vector<2x8x1xf32>
    %cst = arith.constant 5.000000e-01 : f32
    %6 = vector.broadcast %cst : f32 to vector<2x8x1xf32>
    %7 = arith.cmpf ogt, %5, %6 : vector<2x8x1xf32>
    %c0_5 = arith.constant 0 : index
    %c0_6 = arith.constant 0 : index
    %8 = vector.load %arg3[%c0_5, %c0_6] : memref<2x8xf32, #tpu.memory_space<vmem>>, vector<2x8xf32>
    %9 = vector.shape_cast %8 : vector<2x8xf32> to vector<2x8x1xf32>
    %c0_7 = arith.constant 0 : index
    %c0_8 = arith.constant 0 : index
    %c0_9 = arith.constant 0 : index
    %10 = vector.load %arg7[%c0_7, %c0_8, %c0_9] : memref<2x8x3xf32, #tpu.memory_space<vmem>>, vector<2x8x3xf32>
    %cst_10 = arith.constant dense<0.000000e+00> : vector<2xf32>
    %11 = vector.multi_reduction <add>, %4, %cst_10 [1] : vector<2x8xf32> to vector<2xf32>
    %12 = vector.shape_cast %11 : vector<2xf32> to vector<2x1xf32>
    %13 = vector.shape_cast %12 : vector<2x1xf32> to vector<2x1x1xf32>
    %14 = vector.shape_cast %4 : vector<2x8xf32> to vector<2x8x1xf32>
    %15 = vector.broadcast %14 : vector<2x8x1xf32> to vector<2x8x3xf32>
    %16 = arith.mulf %10, %15 : vector<2x8x3xf32>
    %cst_11 = arith.constant dense<0.000000e+00> : vector<2x3xf32>
    %17 = vector.multi_reduction <add>, %16, %cst_11 [1] : vector<2x8x3xf32> to vector<2x3xf32>
    %18 = vector.shape_cast %17 : vector<2x3xf32> to vector<2x1x3xf32>
    %cst_12 = arith.constant 9.99999993E-9 : f32
    %19 = vector.broadcast %cst_12 : f32 to vector<2x1x1xf32>
    %20 = arith.addf %13, %19 : vector<2x1x1xf32>
    %21 = vector.broadcast %20 : vector<2x1x1xf32> to vector<2x1x3xf32>
    %22 = arith.divf %18, %21 : vector<2x1x3xf32>
    %23 = vector.broadcast %22 : vector<2x1x3xf32> to vector<2x8x3xf32>
    %24 = arith.subf %10, %23 : vector<2x8x3xf32>
    %25 = vector.broadcast %9 : vector<2x8x1xf32> to vector<2x8x3xf32>
    %26 = arith.mulf %24, %25 : vector<2x8x3xf32>
    %c0_13 = arith.constant 0 : index
    %c0_14 = arith.constant 0 : index
    %c0_15 = arith.constant 0 : index
    %27 = vector.load %arg5[%c0_13, %c0_14, %c0_15] : memref<2x8x3xf32, #tpu.memory_space<vmem>>, vector<2x8x3xf32>
    %28 = vector.broadcast %1 : vector<2x1x1xf32> to vector<2x8x3xf32>
    %29 = arith.mulf %28, %27 : vector<2x8x3xf32>
    %30 = vector.broadcast %3 : vector<2x1x1xf32> to vector<2x8x3xf32>
    %31 = arith.mulf %30, %26 : vector<2x8x3xf32>
    %32 = arith.addf %29, %31 : vector<2x8x3xf32>
    %33 = vector.shape_cast %7 : vector<2x8x1xi1> to vector<2x8x1xi1>
    %34 = vector.broadcast %33 : vector<2x8x1xi1> to vector<2x8x3xi1>
    %35 = arith.select %34, %32, %27 : vector<2x8x3xi1>, vector<2x8x3xf32>
    %c0_16 = arith.constant 0 : index
    %c0_17 = arith.constant 0 : index
    %c0_18 = arith.constant 0 : index
    %36 = vector.load %arg6[%c0_16, %c0_17, %c0_18] : memref<2x8x14xf32, #tpu.memory_space<vmem>>, vector<2x8x14xf32>
    %c0_19 = arith.constant 0 : index
    %c0_20 = arith.constant 0 : index
    %c0_21 = arith.constant 0 : index
    %37 = vector.load %arg8[%c0_19, %c0_20, %c0_21] : memref<2x8x14xf32, #tpu.memory_space<vmem>>, vector<2x8x14xf32>
    %38 = vector.broadcast %1 : vector<2x1x1xf32> to vector<2x8x14xf32>
    %39 = arith.mulf %38, %36 : vector<2x8x14xf32>
    %40 = vector.broadcast %3 : vector<2x1x1xf32> to vector<2x8x14xf32>
    %41 = arith.mulf %40, %37 : vector<2x8x14xf32>
    %42 = arith.addf %39, %41 : vector<2x8x14xf32>
    %43 = vector.shape_cast %7 : vector<2x8x1xi1> to vector<2x8x1xi1>
    %44 = vector.broadcast %43 : vector<2x8x1xi1> to vector<2x8x14xi1>
    %45 = arith.select %44, %42, %36 : vector<2x8x14xi1>, vector<2x8x14xf32>
    %46 = tpu.iota {dimensions = array<i32: 2>} : vector<2x8x20xi32>
    %c0_22 = arith.constant 0 : index
    %c0_23 = arith.constant 0 : index
    %47 = vector.load %arg4[%c0_22, %c0_23] : memref<2x8xi32, #tpu.memory_space<vmem>>, vector<2x8xi32>
    %48 = vector.shape_cast %47 : vector<2x8xi32> to vector<2x8x1xi32>
    %49 = vector.broadcast %48 : vector<2x8x1xi32> to vector<2x8x20xi32>
    %50 = arith.cmpi eq, %46, %49 : vector<2x8x20xi32>
    %c0_i32 = arith.constant 0 : i32
    %51 = vector.broadcast %c0_i32 : i32 to vector<2x8x1xi32>
    %52 = arith.cmpi sge, %48, %51 : vector<2x8x1xi32>
    %53 = vector.broadcast %52 : vector<2x8x1xi1> to vector<2x8x20xi1>
    %54 = arith.andi %50, %53 : vector<2x8x20xi1>
    %c20_i32 = arith.constant 20 : i32
    %55 = vector.broadcast %c20_i32 : i32 to vector<2x8x1xi32>
    %56 = arith.cmpi slt, %48, %55 : vector<2x8x1xi32>
    %57 = vector.broadcast %56 : vector<2x8x1xi1> to vector<2x8x20xi1>
    %58 = arith.andi %54, %57 : vector<2x8x20xi1>
    %cst_24 = arith.constant 1.000000e+00 : f32
    %cst_25 = arith.constant 0.000000e+00 : f32
    %59 = vector.broadcast %cst_24 : f32 to vector<2x8x20xf32>
    %60 = vector.broadcast %cst_25 : f32 to vector<2x8x20xf32>
    %61 = arith.select %58, %59, %60 : vector<2x8x20xi1>, vector<2x8x20xf32>
    %cst_26 = arith.constant 1.000000e+01 : f32
    %62 = vector.broadcast %cst_26 : f32 to vector<2x8x20xf32>
    %63 = arith.mulf %61, %62 : vector<2x8x20xf32>
    %cst_27 = arith.constant 5.000000e+00 : f32
    %64 = vector.broadcast %cst_27 : f32 to vector<2x8x20xf32>
    %65 = arith.subf %63, %64 : vector<2x8x20xf32>
    %66 = vector.broadcast %1 : vector<2x1x1xf32> to vector<2x8x20xf32>
    %67 = arith.mulf %66, %65 : vector<2x8x20xf32>
    %c0_28 = arith.constant 0 : index
    %c0_29 = arith.constant 0 : index
    %c0_30 = arith.constant 0 : index
    %68 = vector.load %arg9[%c0_28, %c0_29, %c0_30] : memref<2x8x20xf32, #tpu.memory_space<vmem>>, vector<2x8x20xf32>
    %69 = vector.broadcast %3 : vector<2x1x1xf32> to vector<2x8x20xf32>
    %70 = arith.mulf %69, %68 : vector<2x8x20xf32>
    %71 = arith.addf %67, %70 : vector<2x8x20xf32>
    %72 = vector.shape_cast %7 : vector<2x8x1xi1> to vector<2x8x1xi1>
    %73 = vector.broadcast %72 : vector<2x8x1xi1> to vector<2x8x20xi1>
    %74 = arith.select %73, %71, %65 : vector<2x8x20xi1>, vector<2x8x20xf32>
    %cst_31 = arith.constant dense<0xFF800000> : vector<2x8xf32>
    %75 = vector.multi_reduction <maximumf>, %74, %cst_31 [2] : vector<2x8x20xf32> to vector<2x8xf32>
    %76 = vector.shape_cast %75 : vector<2x8xf32> to vector<2x8x1xf32>
    %77 = vector.broadcast %76 : vector<2x8x1xf32> to vector<2x8x20xf32>
    %78 = arith.cmpf oge, %74, %77 : vector<2x8x20xf32>
    %c20_i32_32 = arith.constant 20 : i32
    %79 = vector.broadcast %c20_i32_32 : i32 to vector<2x8x20xi32>
    %80 = arith.select %78, %46, %79 : vector<2x8x20xi1>, vector<2x8x20xi32>
    %cst_33 = arith.constant dense<2147483647> : vector<2x8xi32>
    %81 = vector.multi_reduction <minsi>, %80, %cst_33 [2] : vector<2x8x20xi32> to vector<2x8xi32>
    %82 = vector.shape_cast %81 : vector<2x8xi32> to vector<2x8x1xi32>
    %83 = arith.select %7, %82, %48 : vector<2x8x1xi1>, vector<2x8x1xi32>
    %84 = vector.broadcast %83 : vector<2x8x1xi32> to vector<2x8x20xi32>
    %85 = arith.cmpi eq, %46, %84 : vector<2x8x20xi32>
    %cst_34 = arith.constant 1.000000e+00 : f32
    %cst_35 = arith.constant 0.000000e+00 : f32
    %86 = vector.broadcast %cst_34 : f32 to vector<2x8x20xf32>
    %87 = vector.broadcast %cst_35 : f32 to vector<2x8x20xf32>
    %88 = arith.select %85, %86, %87 : vector<2x8x20xi1>, vector<2x8x20xf32>
    %cst_36 = arith.constant 0.000000e+00 : f32
    %89 = vector.broadcast %cst_36 : f32 to vector<2x8x91xf32>
    %90 = tpu.concatenate %35, %45, %88, %89 in 2 : vector<2x8x3xf32>, vector<2x8x14xf32>, vector<2x8x20xf32>, vector<2x8x91xf32> -> vector<2x8x128xf32>
    %c0_37 = arith.constant 0 : index
    %c0_38 = arith.constant 0 : index
    %c0_39 = arith.constant 0 : index
    %91 = vector.load %arg10[%c0_37, %c0_38, %c0_39] : memref<2x8x128xf32, #tpu.memory_space<vmem>>, vector<2x8x128xf32>
    tpu.vector_store %arg10[%c0_37, %c0_38, %c0_39], %90 {strides = array<i32>} : memref<2x8x128xf32, #tpu.memory_space<vmem>>, vector<2x8x128xf32>,
    return
  }
}

module attributes {stable_mosaic.version = 11 : i64} {
  func.func @_edge_pool_kernel(%arg0: i32, %arg1: memref<1x8x3xf32, #tpu.memory_space<vmem>>, %arg2: memref<1x16xf32, #tpu.memory_space<vmem>>, %arg3: memref<1x8x128xf32, #tpu.memory_space<vmem>>) attributes {dimension_semantics = [#tpu.dimension_semantics<parallel>], iteration_bounds = array<i64: 2>, scalar_prefetch = 0 : i64, scratch_operands = 0 : i64, tpu.core_type = #tpu.core_type<tc>, window_params = [{transform_indices = @transform_0, window_bounds = array<i64: 1, 8, 3>}, {pipeline_mode = #tpu.pipeline_mode<synchronous>, transform_indices = @transform_1, window_bounds = array<i64: 1, 16>}, {transform_indices = @transform_2, window_bounds = array<i64: 1, 8, 128>}]} {
    %c0 = arith.constant 0 : index
    %c0_0 = arith.constant 0 : index
    %c0_1 = arith.constant 0 : index
    %0 = vector.load %arg1[%c0, %c0_0, %c0_1] : memref<1x8x3xf32, #tpu.memory_space<vmem>>, vector<1x8x3xf32>
    %1 = vector.shape_cast %0 : vector<1x8x3xf32> to vector<8x3xf32>
    %c0_2 = arith.constant 0 : index
    %c0_3 = arith.constant 0 : index
    %2 = vector.load %arg2[%c0_2, %c0_3] : memref<1x16xf32, #tpu.memory_space<vmem>>, vector<1x16xf32>
    %3 = arith.mulf %1, %1 : vector<8x3xf32>
    %cst = arith.constant dense<0.000000e+00> : vector<8xf32>
    %4 = vector.multi_reduction <add>, %3, %cst [1] : vector<8x3xf32> to vector<8xf32>
    %5 = vector.shape_cast %4 : vector<8xf32> to vector<8x1xf32>
    %cst_4 = arith.constant 1.000000e+00 : f32
    %6 = vector.broadcast %cst_4 : f32 to vector<8x1xf32>
    %7 = tpu.concatenate %1, %5, %6 in 1 : vector<8x3xf32>, vector<8x1xf32>, vector<8x1xf32> -> vector<8x5xf32>
    %cst_5 = arith.constant -2.000000e+00 : f32
    %8 = vector.broadcast %cst_5 : f32 to vector<8x3xf32>
    %9 = arith.mulf %8, %1 : vector<8x3xf32>
    %10 = tpu.concatenate %9, %6, %5 in 1 : vector<8x3xf32>, vector<8x1xf32>, vector<8x1xf32> -> vector<8x5xf32>
    %cst_6 = arith.constant dense<0.000000e+00> : vector<8x8xf32>
    %11 = tpu.matmul %7, %10, %cst_6 {dimension_numbers = #tpu.dot_dimension_numbers<[1], [1], [0], [0], [0, 0, 1, 0], [], []>} : vector<8x5xf32>, vector<8x5xf32>, vector<8x8xf32> -> vector<8x8xf32>
    %cst_7 = arith.constant 0.000000e+00 : f32
    %12 = vector.broadcast %cst_7 : f32 to vector<8x8xf32>
    %13 = arith.maximumf %11, %12 : vector<8x8xf32>
    %14 = math.sqrt %13 : vector<8x8xf32>
    %15 = vector.shape_cast %14 : vector<8x8xf32> to vector<8x8x1xf32>
    %16 = vector.shape_cast %2 : vector<1x16xf32> to vector<1x1x16xf32>
    %17 = vector.broadcast %15 : vector<8x8x1xf32> to vector<8x8x16xf32>
    %18 = vector.broadcast %16 : vector<1x1x16xf32> to vector<8x8x16xf32>
    %19 = arith.subf %17, %18 : vector<8x8x16xf32>
    %20 = arith.mulf %19, %19 : vector<8x8x16xf32>
    %cst_8 = arith.constant -2.500000e-01 : f32
    %21 = vector.broadcast %cst_8 : f32 to vector<8x8x16xf32>
    %22 = arith.mulf %21, %20 : vector<8x8x16xf32>
    %23 = math.exp %22 : vector<8x8x16xf32>
    %cst_9 = arith.constant dense<0.000000e+00> : vector<8x16xf32>
    %24 = vector.multi_reduction <add>, %23, %cst_9 [1] : vector<8x8x16xf32> to vector<8x16xf32>
    %cst_10 = arith.constant 1.250000e-01 : f32
    %25 = vector.broadcast %cst_10 : f32 to vector<8x16xf32>
    %26 = arith.mulf %24, %25 : vector<8x16xf32>
    %cst_11 = arith.constant 0.000000e+00 : f32
    %27 = vector.broadcast %cst_11 : f32 to vector<8x112xf32>
    %28 = tpu.concatenate %26, %27 in 1 : vector<8x16xf32>, vector<8x112xf32> -> vector<8x128xf32>
    %c0_12 = arith.constant 0 : index
    %c0_13 = arith.constant 0 : index
    %c0_14 = arith.constant 0 : index
    %29 = vector.load %arg3[%c0_12, %c0_13, %c0_14] : memref<1x8x128xf32, #tpu.memory_space<vmem>>, vector<1x8x128xf32>
    %30 = vector.shape_cast %29 : vector<1x8x128xf32> to vector<8x128xf32>
    %31 = vector.shape_cast %28 : vector<8x128xf32> to vector<1x8x128xf32>
    tpu.vector_store %arg3[%c0_12, %c0_13, %c0_14], %31 {strides = array<i32>} : memref<1x8x128xf32, #tpu.memory_space<vmem>>, vector<1x8x128xf32>,
    return
  }
  func.func @transform_0(%arg0: i32) -> (i32, i32, i32) {
    %c0_i32 = arith.constant 0 : i32
    %c0_i32_0 = arith.constant 0 : i32
    %c0_i32_1 = arith.constant 0 : i32
    return %arg0, %c0_i32, %c0_i32_0 : i32, i32, i32
  }
  func.func @transform_1(%arg0: i32) -> (i32, i32) {
    %c0_i32 = arith.constant 0 : i32
    %c0_i32_0 = arith.constant 0 : i32
    %c0_i32_1 = arith.constant 0 : i32
    return %c0_i32, %c0_i32_0 : i32, i32
  }
  func.func @transform_2(%arg0: i32) -> (i32, i32, i32) {
    %c0_i32 = arith.constant 0 : i32
    %c0_i32_0 = arith.constant 0 : i32
    %c0_i32_1 = arith.constant 0 : i32
    return %arg0, %c0_i32, %c0_i32_0 : i32, i32, i32
  }
}

module attributes {stable_mosaic.version = 11 : i64} {
  func.func @_encoder_kernel(%arg0: i32, %arg1: memref<8x128xf32, #tpu.memory_space<vmem>>, %arg2: memref<8x128xf32, #tpu.memory_space<vmem>>, %arg3: memref<8x128xf32, #tpu.memory_space<vmem>>, %arg4: memref<8x1xf32, #tpu.memory_space<vmem>>, %arg5: memref<128x256xbf16, #tpu.memory_space<vmem>>, %arg6: memref<1x256xf32, #tpu.memory_space<vmem>>, %arg7: memref<256x128xbf16, #tpu.memory_space<vmem>>, %arg8: memref<1x128xf32, #tpu.memory_space<vmem>>, %arg9: memref<128x256xbf16, #tpu.memory_space<vmem>>, %arg10: memref<128x256xbf16, #tpu.memory_space<vmem>>, %arg11: memref<128x256xbf16, #tpu.memory_space<vmem>>, %arg12: memref<1x256xf32, #tpu.memory_space<vmem>>, %arg13: memref<1x256xf32, #tpu.memory_space<vmem>>, %arg14: memref<256x128xbf16, #tpu.memory_space<vmem>>, %arg15: memref<1x128xf32, #tpu.memory_space<vmem>>, %arg16: memref<8x128xf32, #tpu.memory_space<vmem>>) attributes {dimension_semantics = [#tpu.dimension_semantics<parallel>], iteration_bounds = array<i64: 2>, scalar_prefetch = 0 : i64, scratch_operands = 0 : i64, tpu.core_type = #tpu.core_type<tc>, window_params = [{transform_indices = @transform_0, window_bounds = array<i64: 8, 128>}, {transform_indices = @transform_1, window_bounds = array<i64: 8, 128>}, {transform_indices = @transform_2, window_bounds = array<i64: 8, 128>}, {transform_indices = @transform_3, window_bounds = array<i64: 8, 1>}, {pipeline_mode = #tpu.pipeline_mode<synchronous>, transform_indices = @transform_4, window_bounds = array<i64: 128, 256>}, {pipeline_mode = #tpu.pipeline_mode<synchronous>, transform_indices = @transform_5, window_bounds = array<i64: 1, 256>}, {pipeline_mode = #tpu.pipeline_mode<synchronous>, transform_indices = @transform_6, window_bounds = array<i64: 256, 128>}, {pipeline_mode = #tpu.pipeline_mode<synchronous>, transform_indices = @transform_7, window_bounds = array<i64: 1, 128>}, {pipeline_mode = #tpu.pipeline_mode<synchronous>, transform_indices = @transform_8, window_bounds = array<i64: 128, 256>}, {pipeline_mode = #tpu.pipeline_mode<synchronous>, transform_indices = @transform_9, window_bounds = array<i64: 128, 256>}, {pipeline_mode = #tpu.pipeline_mode<synchronous>, transform_indices = @transform_10, window_bounds = array<i64: 128, 256>}, {pipeline_mode = #tpu.pipeline_mode<synchronous>, transform_indices = @transform_11, window_bounds = array<i64: 1, 256>}, {pipeline_mode = #tpu.pipeline_mode<synchronous>, transform_indices = @transform_12, window_bounds = array<i64: 1, 256>}, {pipeline_mode = #tpu.pipeline_mode<synchronous>, transform_indices = @transform_13, window_bounds = array<i64: 256, 128>}, {pipeline_mode = #tpu.pipeline_mode<synchronous>, transform_indices = @transform_14, window_bounds = array<i64: 1, 128>}, {transform_indices = @transform_15, window_bounds = array<i64: 8, 128>}]} {
    %c0 = arith.constant 0 : index
    %c0_0 = arith.constant 0 : index
    %0 = vector.load %arg1[%c0, %c0_0] : memref<8x128xf32, #tpu.memory_space<vmem>>, vector<8x128xf32>
    %1 = arith.truncf %0 : vector<8x128xf32> to vector<8x128xbf16>
    %c0_1 = arith.constant 0 : index
    %c0_2 = arith.constant 0 : index
    %2 = vector.load %arg5[%c0_1, %c0_2] : memref<128x256xbf16, #tpu.memory_space<vmem>>, vector<128x256xbf16>
    %cst = arith.constant dense<0.000000e+00> : vector<8x256xf32>
    %3 = tpu.matmul %1, %2, %cst {dimension_numbers = #tpu.dot_dimension_numbers<[1], [0], [0], [1], [0, 0, 1, 1], [], []>} : vector<8x128xbf16>, vector<128x256xbf16>, vector<8x256xf32> -> vector<8x256xf32>
    %c0_3 = arith.constant 0 : index
    %c0_4 = arith.constant 0 : index
    %4 = vector.load %arg6[%c0_3, %c0_4] : memref<1x256xf32, #tpu.memory_space<vmem>>, vector<1x256xf32>
    %5 = vector.broadcast %4 : vector<1x256xf32> to vector<8x256xf32>
    %6 = arith.addf %3, %5 : vector<8x256xf32>
    %cst_5 = arith.constant 2.000000e+01 : f32
    %7 = vector.broadcast %cst_5 : f32 to vector<8x256xf32>
    %8 = arith.minimumf %6, %7 : vector<8x256xf32>
    %9 = math.exp %8 : vector<8x256xf32>
    %cst_6 = arith.constant 1.000000e+00 : f32
    %10 = vector.broadcast %cst_6 : f32 to vector<8x256xf32>
    %11 = arith.addf %10, %9 : vector<8x256xf32>
    %12 = arith.mulf %11, %11 : vector<8x256xf32>
    %cst_7 = arith.constant 1.000000e+00 : f32
    %13 = vector.broadcast %cst_7 : f32 to vector<8x256xf32>
    %14 = arith.subf %12, %13 : vector<8x256xf32>
    %cst_8 = arith.constant 1.000000e+00 : f32
    %15 = vector.broadcast %cst_8 : f32 to vector<8x256xf32>
    %16 = arith.addf %12, %15 : vector<8x256xf32>
    %17 = tpu.reciprocal %16 {approx = true} : vector<8x256xf32> -> vector<8x256xf32>
    %18 = arith.mulf %14, %17 : vector<8x256xf32>
    %cst_9 = arith.constant 2.000000e+01 : f32
    %19 = vector.broadcast %cst_9 : f32 to vector<8x256xf32>
    %20 = arith.cmpf ogt, %6, %19 : vector<8x256xf32>
    %21 = arith.mulf %6, %18 : vector<8x256xf32>
    %22 = arith.select %20, %6, %21 : vector<8x256xi1>, vector<8x256xf32>
    %23 = arith.truncf %22 : vector<8x256xf32> to vector<8x256xbf16>
    %c0_10 = arith.constant 0 : index
    %c0_11 = arith.constant 0 : index
    %24 = vector.load %arg7[%c0_10, %c0_11] : memref<256x128xbf16, #tpu.memory_space<vmem>>, vector<256x128xbf16>
    %cst_12 = arith.constant dense<0.000000e+00> : vector<8x128xf32>
    %25 = tpu.matmul %23, %24, %cst_12 {dimension_numbers = #tpu.dot_dimension_numbers<[1], [0], [0], [1], [0, 0, 1, 1], [], []>} : vector<8x256xbf16>, vector<256x128xbf16>, vector<8x128xf32> -> vector<8x128xf32>
    %c0_13 = arith.constant 0 : index
    %c0_14 = arith.constant 0 : index
    %26 = vector.load %arg8[%c0_13, %c0_14] : memref<1x128xf32, #tpu.memory_space<vmem>>, vector<1x128xf32>
    %27 = vector.broadcast %26 : vector<1x128xf32> to vector<8x128xf32>
    %28 = arith.addf %25, %27 : vector<8x128xf32>
    %29 = arith.truncf %28 : vector<8x128xf32> to vector<8x128xbf16>
    %c0_15 = arith.constant 0 : index
    %c0_16 = arith.constant 0 : index
    %30 = vector.load %arg9[%c0_15, %c0_16] : memref<128x256xbf16, #tpu.memory_space<vmem>>, vector<128x256xbf16>
    %cst_17 = arith.constant dense<0.000000e+00> : vector<8x256xf32>
    %31 = tpu.matmul %29, %30, %cst_17 {dimension_numbers = #tpu.dot_dimension_numbers<[1], [0], [0], [1], [0, 0, 1, 1], [], []>} : vector<8x128xbf16>, vector<128x256xbf16>, vector<8x256xf32> -> vector<8x256xf32>
    %c0_18 = arith.constant 0 : index
    %c0_19 = arith.constant 0 : index
    %32 = vector.load %arg2[%c0_18, %c0_19] : memref<8x128xf32, #tpu.memory_space<vmem>>, vector<8x128xf32>
    %33 = arith.truncf %32 : vector<8x128xf32> to vector<8x128xbf16>
    %c0_20 = arith.constant 0 : index
    %c0_21 = arith.constant 0 : index
    %34 = vector.load %arg10[%c0_20, %c0_21] : memref<128x256xbf16, #tpu.memory_space<vmem>>, vector<128x256xbf16>
    %cst_22 = arith.constant dense<0.000000e+00> : vector<8x256xf32>
    %35 = tpu.matmul %33, %34, %cst_22 {dimension_numbers = #tpu.dot_dimension_numbers<[1], [0], [0], [1], [0, 0, 1, 1], [], []>} : vector<8x128xbf16>, vector<128x256xbf16>, vector<8x256xf32> -> vector<8x256xf32>
    %36 = arith.addf %31, %35 : vector<8x256xf32>
    %c0_23 = arith.constant 0 : index
    %c0_24 = arith.constant 0 : index
    %37 = vector.load %arg3[%c0_23, %c0_24] : memref<8x128xf32, #tpu.memory_space<vmem>>, vector<8x128xf32>
    %38 = arith.truncf %37 : vector<8x128xf32> to vector<8x128xbf16>
    %c0_25 = arith.constant 0 : index
    %c0_26 = arith.constant 0 : index
    %39 = vector.load %arg11[%c0_25, %c0_26] : memref<128x256xbf16, #tpu.memory_space<vmem>>, vector<128x256xbf16>
    %cst_27 = arith.constant dense<0.000000e+00> : vector<8x256xf32>
    %40 = tpu.matmul %38, %39, %cst_27 {dimension_numbers = #tpu.dot_dimension_numbers<[1], [0], [0], [1], [0, 0, 1, 1], [], []>} : vector<8x128xbf16>, vector<128x256xbf16>, vector<8x256xf32> -> vector<8x256xf32>
    %41 = arith.addf %36, %40 : vector<8x256xf32>
    %c0_28 = arith.constant 0 : index
    %c0_29 = arith.constant 0 : index
    %42 = vector.load %arg4[%c0_28, %c0_29] : memref<8x1xf32, #tpu.memory_space<vmem>>, vector<8x1xf32>
    %c0_30 = arith.constant 0 : index
    %c0_31 = arith.constant 0 : index
    %43 = vector.load %arg12[%c0_30, %c0_31] : memref<1x256xf32, #tpu.memory_space<vmem>>, vector<1x256xf32>
    %44 = vector.broadcast %42 : vector<8x1xf32> to vector<8x256xf32>
    %45 = vector.broadcast %43 : vector<1x256xf32> to vector<8x256xf32>
    %46 = arith.mulf %44, %45 : vector<8x256xf32>
    %47 = arith.addf %41, %46 : vector<8x256xf32>
    %c0_32 = arith.constant 0 : index
    %c0_33 = arith.constant 0 : index
    %48 = vector.load %arg13[%c0_32, %c0_33] : memref<1x256xf32, #tpu.memory_space<vmem>>, vector<1x256xf32>
    %49 = vector.broadcast %48 : vector<1x256xf32> to vector<8x256xf32>
    %50 = arith.addf %47, %49 : vector<8x256xf32>
    %cst_34 = arith.constant 2.000000e+01 : f32
    %51 = vector.broadcast %cst_34 : f32 to vector<8x256xf32>
    %52 = arith.minimumf %50, %51 : vector<8x256xf32>
    %53 = math.exp %52 : vector<8x256xf32>
    %cst_35 = arith.constant 1.000000e+00 : f32
    %54 = vector.broadcast %cst_35 : f32 to vector<8x256xf32>
    %55 = arith.addf %54, %53 : vector<8x256xf32>
    %56 = arith.mulf %55, %55 : vector<8x256xf32>
    %cst_36 = arith.constant 1.000000e+00 : f32
    %57 = vector.broadcast %cst_36 : f32 to vector<8x256xf32>
    %58 = arith.subf %56, %57 : vector<8x256xf32>
    %cst_37 = arith.constant 1.000000e+00 : f32
    %59 = vector.broadcast %cst_37 : f32 to vector<8x256xf32>
    %60 = arith.addf %56, %59 : vector<8x256xf32>
    %61 = tpu.reciprocal %60 {approx = true} : vector<8x256xf32> -> vector<8x256xf32>
    %62 = arith.mulf %58, %61 : vector<8x256xf32>
    %cst_38 = arith.constant 2.000000e+01 : f32
    %63 = vector.broadcast %cst_38 : f32 to vector<8x256xf32>
    %64 = arith.cmpf ogt, %50, %63 : vector<8x256xf32>
    %65 = arith.mulf %50, %62 : vector<8x256xf32>
    %66 = arith.select %64, %50, %65 : vector<8x256xi1>, vector<8x256xf32>
    %67 = arith.truncf %66 : vector<8x256xf32> to vector<8x256xbf16>
    %c0_39 = arith.constant 0 : index
    %c0_40 = arith.constant 0 : index
    %68 = vector.load %arg14[%c0_39, %c0_40] : memref<256x128xbf16, #tpu.memory_space<vmem>>, vector<256x128xbf16>
    %cst_41 = arith.constant dense<0.000000e+00> : vector<8x128xf32>
    %69 = tpu.matmul %67, %68, %cst_41 {dimension_numbers = #tpu.dot_dimension_numbers<[1], [0], [0], [1], [0, 0, 1, 1], [], []>} : vector<8x256xbf16>, vector<256x128xbf16>, vector<8x128xf32> -> vector<8x128xf32>
    %c0_42 = arith.constant 0 : index
    %c0_43 = arith.constant 0 : index
    %70 = vector.load %arg15[%c0_42, %c0_43] : memref<1x128xf32, #tpu.memory_space<vmem>>, vector<1x128xf32>
    %71 = vector.broadcast %70 : vector<1x128xf32> to vector<8x128xf32>
    %72 = arith.addf %69, %71 : vector<8x128xf32>
    %c0_44 = arith.constant 0 : index
    %c0_45 = arith.constant 0 : index
    %73 = vector.load %arg16[%c0_44, %c0_45] : memref<8x128xf32, #tpu.memory_space<vmem>>, vector<8x128xf32>
    tpu.vector_store %arg16[%c0_44, %c0_45], %72 {strides = array<i32>} : memref<8x128xf32, #tpu.memory_space<vmem>>, vector<8x128xf32>,
    return
  }
  func.func @transform_0(%arg0: i32) -> (i32, i32) {
    %c0_i32 = arith.constant 0 : i32
    %c0_i32_0 = arith.constant 0 : i32
    return %arg0, %c0_i32 : i32, i32
  }
  func.func @transform_1(%arg0: i32) -> (i32, i32) {
    %c0_i32 = arith.constant 0 : i32
    %c0_i32_0 = arith.constant 0 : i32
    return %arg0, %c0_i32 : i32, i32
  }
  func.func @transform_2(%arg0: i32) -> (i32, i32) {
    %c0_i32 = arith.constant 0 : i32
    %c0_i32_0 = arith.constant 0 : i32
    return %arg0, %c0_i32 : i32, i32
  }
  func.func @transform_3(%arg0: i32) -> (i32, i32) {
    %c0_i32 = arith.constant 0 : i32
    %c0_i32_0 = arith.constant 0 : i32
    return %arg0, %c0_i32 : i32, i32
  }
  func.func @transform_4(%arg0: i32) -> (i32, i32) {
    %c0_i32 = arith.constant 0 : i32
    %c0_i32_0 = arith.constant 0 : i32
    %c0_i32_1 = arith.constant 0 : i32
    return %c0_i32, %c0_i32_0 : i32, i32
  }
  func.func @transform_5(%arg0: i32) -> (i32, i32) {
    %c0_i32 = arith.constant 0 : i32
    %c0_i32_0 = arith.constant 0 : i32
    %c0_i32_1 = arith.constant 0 : i32
    return %c0_i32, %c0_i32_0 : i32, i32
  }
  func.func @transform_6(%arg0: i32) -> (i32, i32) {
    %c0_i32 = arith.constant 0 : i32
    %c0_i32_0 = arith.constant 0 : i32
    %c0_i32_1 = arith.constant 0 : i32
    return %c0_i32, %c0_i32_0 : i32, i32
  }
  func.func @transform_7(%arg0: i32) -> (i32, i32) {
    %c0_i32 = arith.constant 0 : i32
    %c0_i32_0 = arith.constant 0 : i32
    %c0_i32_1 = arith.constant 0 : i32
    return %c0_i32, %c0_i32_0 : i32, i32
  }
  func.func @transform_8(%arg0: i32) -> (i32, i32) {
    %c0_i32 = arith.constant 0 : i32
    %c0_i32_0 = arith.constant 0 : i32
    %c0_i32_1 = arith.constant 0 : i32
    return %c0_i32, %c0_i32_0 : i32, i32
  }
  func.func @transform_9(%arg0: i32) -> (i32, i32) {
    %c0_i32 = arith.constant 0 : i32
    %c0_i32_0 = arith.constant 0 : i32
    %c0_i32_1 = arith.constant 0 : i32
    return %c0_i32, %c0_i32_0 : i32, i32
  }
  func.func @transform_10(%arg0: i32) -> (i32, i32) {
    %c0_i32 = arith.constant 0 : i32
    %c0_i32_0 = arith.constant 0 : i32
    %c0_i32_1 = arith.constant 0 : i32
    return %c0_i32, %c0_i32_0 : i32, i32
  }
  func.func @transform_11(%arg0: i32) -> (i32, i32) {
    %c0_i32 = arith.constant 0 : i32
    %c0_i32_0 = arith.constant 0 : i32
    %c0_i32_1 = arith.constant 0 : i32
    return %c0_i32, %c0_i32_0 : i32, i32
  }
  func.func @transform_12(%arg0: i32) -> (i32, i32) {
    %c0_i32 = arith.constant 0 : i32
    %c0_i32_0 = arith.constant 0 : i32
    %c0_i32_1 = arith.constant 0 : i32
    return %c0_i32, %c0_i32_0 : i32, i32
  }
  func.func @transform_13(%arg0: i32) -> (i32, i32) {
    %c0_i32 = arith.constant 0 : i32
    %c0_i32_0 = arith.constant 0 : i32
    %c0_i32_1 = arith.constant 0 : i32
    return %c0_i32, %c0_i32_0 : i32, i32
  }
  func.func @transform_14(%arg0: i32) -> (i32, i32) {
    %c0_i32 = arith.constant 0 : i32
    %c0_i32_0 = arith.constant 0 : i32
    %c0_i32_1 = arith.constant 0 : i32
    return %c0_i32, %c0_i32_0 : i32, i32
  }
  func.func @transform_15(%arg0: i32) -> (i32, i32) {
    %c0_i32 = arith.constant 0 : i32
    %c0_i32_0 = arith.constant 0 : i32
    return %arg0, %c0_i32 : i32, i32
  }
}

module attributes {stable_mosaic.version = 11 : i64} {
  func.func @_fused_loss_kernel(%arg0: memref<2x8x3xf32, #tpu.memory_space<vmem>>, %arg1: memref<2x8x3xf32, #tpu.memory_space<vmem>>, %arg2: memref<2x8x9xf32, #tpu.memory_space<vmem>>, %arg3: memref<2x8x5xf32, #tpu.memory_space<vmem>>, %arg4: memref<2x8x20xf32, #tpu.memory_space<vmem>>, %arg5: memref<2x8x3xf32, #tpu.memory_space<vmem>>, %arg6: memref<2x8x3xf32, #tpu.memory_space<vmem>>, %arg7: memref<2x8x9xf32, #tpu.memory_space<vmem>>, %arg8: memref<2x8x5xf32, #tpu.memory_space<vmem>>, %arg9: memref<2x8x5xf32, #tpu.memory_space<vmem>>, %arg10: memref<2x8xi32, #tpu.memory_space<vmem>>, %arg11: memref<2x8x5xf32, #tpu.memory_space<vmem>>, %arg12: memref<2x8xf32, #tpu.memory_space<vmem>>, %arg13: memref<2x1xf32, #tpu.memory_space<vmem>>, %arg14: memref<2x8xf32, #tpu.memory_space<vmem>>) attributes {dimension_semantics = [], scalar_prefetch = 0 : i64, scratch_operands = 0 : i64, tpu.core_type = #tpu.core_type<tc>} {
    %c0 = arith.constant 0 : index
    %c0_0 = arith.constant 0 : index
    %0 = vector.load %arg12[%c0, %c0_0] : memref<2x8xf32, #tpu.memory_space<vmem>>, vector<2x8xf32>
    %1 = vector.shape_cast %0 : vector<2x8xf32> to vector<2x8x1xf32>
    %cst = arith.constant dense<0.000000e+00> : vector<2xf32>
    %2 = vector.multi_reduction <add>, %0, %cst [1] : vector<2x8xf32> to vector<2xf32>
    %3 = vector.shape_cast %2 : vector<2xf32> to vector<2x1xf32>
    %cst_1 = arith.constant 9.99999993E-9 : f32
    %4 = vector.broadcast %cst_1 : f32 to vector<2x1xf32>
    %5 = arith.addf %3, %4 : vector<2x1xf32>
    %c0_2 = arith.constant 0 : index
    %c0_3 = arith.constant 0 : index
    %6 = vector.load %arg13[%c0_2, %c0_3] : memref<2x1xf32, #tpu.memory_space<vmem>>, vector<2x1xf32>
    %7 = vector.shape_cast %6 : vector<2x1xf32> to vector<2x1x1xf32>
    %c0_4 = arith.constant 0 : index
    %c0_5 = arith.constant 0 : index
    %c0_6 = arith.constant 0 : index
    %8 = vector.load %arg0[%c0_4, %c0_5, %c0_6] : memref<2x8x3xf32, #tpu.memory_space<vmem>>, vector<2x8x3xf32>
    %c0_7 = arith.constant 0 : index
    %c0_8 = arith.constant 0 : index
    %c0_9 = arith.constant 0 : index
    %9 = vector.load %arg5[%c0_7, %c0_8, %c0_9] : memref<2x8x3xf32, #tpu.memory_space<vmem>>, vector<2x8x3xf32>
    %10 = arith.subf %8, %9 : vector<2x8x3xf32>
    %11 = arith.mulf %10, %10 : vector<2x8x3xf32>
    %12 = vector.broadcast %1 : vector<2x8x1xf32> to vector<2x8x3xf32>
    %13 = arith.mulf %11, %12 : vector<2x8x3xf32>
    %cst_10 = arith.constant dense<0.000000e+00> : vector<2x8xf32>
    %14 = vector.multi_reduction <add>, %13, %cst_10 [2] : vector<2x8x3xf32> to vector<2x8xf32>
    %cst_11 = arith.constant dense<0.000000e+00> : vector<2xf32>
    %15 = vector.multi_reduction <add>, %14, %cst_11 [1] : vector<2x8xf32> to vector<2xf32>
    %16 = vector.shape_cast %15 : vector<2xf32> to vector<2x1xf32>
    %17 = arith.divf %16, %5 : vector<2x1xf32>
    %c0_12 = arith.constant 0 : index
    %c0_13 = arith.constant 0 : index
    %c0_14 = arith.constant 0 : index
    %18 = vector.load %arg6[%c0_12, %c0_13, %c0_14] : memref<2x8x3xf32, #tpu.memory_space<vmem>>, vector<2x8x3xf32>
    %c0_15 = arith.constant 0 : index
    %c0_16 = arith.constant 0 : index
    %c0_17 = arith.constant 0 : index
    %19 = vector.load %arg1[%c0_15, %c0_16, %c0_17] : memref<2x8x3xf32, #tpu.memory_space<vmem>>, vector<2x8x3xf32>
    %20 = arith.subf %18, %19 : vector<2x8x3xf32>
    %21 = vector.broadcast %7 : vector<2x1x1xf32> to vector<2x8x3xf32>
    %22 = arith.mulf %20, %21 : vector<2x8x3xf32>
    %23 = arith.mulf %22, %22 : vector<2x8x3xf32>
    %24 = vector.broadcast %1 : vector<2x8x1xf32> to vector<2x8x3xf32>
    %25 = arith.mulf %23, %24 : vector<2x8x3xf32>
    %cst_18 = arith.constant dense<0.000000e+00> : vector<2x8xf32>
    %26 = vector.multi_reduction <add>, %25, %cst_18 [2] : vector<2x8x3xf32> to vector<2x8xf32>
    %cst_19 = arith.constant dense<0.000000e+00> : vector<2xf32>
    %27 = vector.multi_reduction <add>, %26, %cst_19 [1] : vector<2x8xf32> to vector<2xf32>
    %28 = vector.shape_cast %27 : vector<2xf32> to vector<2x1xf32>
    %29 = arith.divf %28, %5 : vector<2x1xf32>
    %c0_20 = arith.constant 0 : index
    %c0_21 = arith.constant 0 : index
    %c0_22 = arith.constant 0 : index
    %30 = vector.load %arg7[%c0_20, %c0_21, %c0_22] : memref<2x8x9xf32, #tpu.memory_space<vmem>>, vector<2x8x9xf32>
    %c0_23 = arith.constant 0 : index
    %c0_24 = arith.constant 0 : index
    %c0_25 = arith.constant 0 : index
    %31 = vector.load %arg2[%c0_23, %c0_24, %c0_25] : memref<2x8x9xf32, #tpu.memory_space<vmem>>, vector<2x8x9xf32>
    %32 = arith.subf %30, %31 : vector<2x8x9xf32>
    %33 = arith.mulf %32, %32 : vector<2x8x9xf32>
    %34 = vector.broadcast %1 : vector<2x8x1xf32> to vector<2x8x9xf32>
    %35 = arith.mulf %33, %34 : vector<2x8x9xf32>
    %cst_26 = arith.constant dense<0.000000e+00> : vector<2x8xf32>
    %36 = vector.multi_reduction <add>, %35, %cst_26 [2] : vector<2x8x9xf32> to vector<2x8xf32>
    %cst_27 = arith.constant dense<0.000000e+00> : vector<2xf32>
    %37 = vector.multi_reduction <add>, %36, %cst_27 [1] : vector<2x8xf32> to vector<2xf32>
    %38 = vector.shape_cast %37 : vector<2xf32> to vector<2x1xf32>
    %39 = arith.divf %38, %5 : vector<2x1xf32>
    %c0_28 = arith.constant 0 : index
    %c0_29 = arith.constant 0 : index
    %c0_30 = arith.constant 0 : index
    %40 = vector.load %arg4[%c0_28, %c0_29, %c0_30] : memref<2x8x20xf32, #tpu.memory_space<vmem>>, vector<2x8x20xf32>
    %cst_31 = arith.constant dense<0xFF800000> : vector<2x8xf32>
    %41 = vector.multi_reduction <maximumf>, %40, %cst_31 [2] : vector<2x8x20xf32> to vector<2x8xf32>
    %42 = vector.shape_cast %41 : vector<2x8xf32> to vector<2x8x1xf32>
    %43 = vector.broadcast %42 : vector<2x8x1xf32> to vector<2x8x20xf32>
    %44 = arith.subf %40, %43 : vector<2x8x20xf32>
    %45 = math.exp %44 : vector<2x8x20xf32>
    %cst_32 = arith.constant dense<0.000000e+00> : vector<2x8xf32>
    %46 = vector.multi_reduction <add>, %45, %cst_32 [2] : vector<2x8x20xf32> to vector<2x8xf32>
    %47 = vector.shape_cast %46 : vector<2x8xf32> to vector<2x8x1xf32>
    %48 = math.log %47 : vector<2x8x1xf32>
    %49 = arith.addf %48, %42 : vector<2x8x1xf32>
    %50 = tpu.iota {dimensions = array<i32: 2>} : vector<2x8x20xi32>
    %c0_33 = arith.constant 0 : index
    %c0_34 = arith.constant 0 : index
    %51 = vector.load %arg10[%c0_33, %c0_34] : memref<2x8xi32, #tpu.memory_space<vmem>>, vector<2x8xi32>
    %52 = vector.shape_cast %51 : vector<2x8xi32> to vector<2x8x1xi32>
    %53 = vector.broadcast %52 : vector<2x8x1xi32> to vector<2x8x20xi32>
    %54 = arith.cmpi eq, %50, %53 : vector<2x8x20xi32>
    %cst_35 = arith.constant 0.000000e+00 : f32
    %55 = vector.broadcast %cst_35 : f32 to vector<2x8x20xf32>
    %56 = arith.select %54, %40, %55 : vector<2x8x20xi1>, vector<2x8x20xf32>
    %cst_36 = arith.constant dense<0.000000e+00> : vector<2x8xf32>
    %57 = vector.multi_reduction <add>, %56, %cst_36 [2] : vector<2x8x20xf32> to vector<2x8xf32>
    %58 = vector.shape_cast %57 : vector<2x8xf32> to vector<2x8x1xf32>
    %59 = arith.subf %49, %58 : vector<2x8x1xf32>
    %60 = arith.mulf %59, %1 : vector<2x8x1xf32>
    %cst_37 = arith.constant dense<0.000000e+00> : vector<2x8xf32>
    %61 = vector.multi_reduction <add>, %60, %cst_37 [2] : vector<2x8x1xf32> to vector<2x8xf32>
    %cst_38 = arith.constant dense<0.000000e+00> : vector<2xf32>
    %62 = vector.multi_reduction <add>, %61, %cst_38 [1] : vector<2x8xf32> to vector<2xf32>
    %63 = vector.shape_cast %62 : vector<2xf32> to vector<2x1xf32>
    %64 = arith.divf %63, %5 : vector<2x1xf32>
    %c0_39 = arith.constant 0 : index
    %c0_40 = arith.constant 0 : index
    %c0_41 = arith.constant 0 : index
    %65 = vector.load %arg8[%c0_39, %c0_40, %c0_41] : memref<2x8x5xf32, #tpu.memory_space<vmem>>, vector<2x8x5xf32>
    %c0_42 = arith.constant 0 : index
    %c0_43 = arith.constant 0 : index
    %c0_44 = arith.constant 0 : index
    %66 = vector.load %arg9[%c0_42, %c0_43, %c0_44] : memref<2x8x5xf32, #tpu.memory_space<vmem>>, vector<2x8x5xf32>
    %c0_45 = arith.constant 0 : index
    %c0_46 = arith.constant 0 : index
    %c0_47 = arith.constant 0 : index
    %67 = vector.load %arg3[%c0_45, %c0_46, %c0_47] : memref<2x8x5xf32, #tpu.memory_space<vmem>>, vector<2x8x5xf32>
    %c0_48 = arith.constant 0 : index
    %c0_49 = arith.constant 0 : index
    %c0_50 = arith.constant 0 : index
    %68 = vector.load %arg11[%c0_48, %c0_49, %c0_50] : memref<2x8x5xf32, #tpu.memory_space<vmem>>, vector<2x8x5xf32>
    %69 = vector.broadcast %1 : vector<2x8x1xf32> to vector<2x8x5xf32>
    %70 = arith.mulf %68, %69 : vector<2x8x5xf32>
    %cst_51 = arith.constant dense<0.000000e+00> : vector<2x8xf32>
    %71 = vector.multi_reduction <add>, %70, %cst_51 [2] : vector<2x8x5xf32> to vector<2x8xf32>
    %cst_52 = arith.constant dense<0.000000e+00> : vector<2xf32>
    %72 = vector.multi_reduction <add>, %71, %cst_52 [1] : vector<2x8xf32> to vector<2xf32>
    %73 = vector.shape_cast %72 : vector<2xf32> to vector<2x1xf32>
    %cst_53 = arith.constant 2.000000e+00 : f32
    %74 = vector.broadcast %cst_53 : f32 to vector<2x1xf32>
    %75 = arith.mulf %74, %73 : vector<2x1xf32>
    %cst_54 = arith.constant 9.99999993E-9 : f32
    %76 = vector.broadcast %cst_54 : f32 to vector<2x1xf32>
    %77 = arith.addf %75, %76 : vector<2x1xf32>
    %78 = arith.subf %65, %66 : vector<2x8x5xf32>
    %cst_55 = arith.constant 3.14159274 : f32
    %79 = vector.broadcast %cst_55 : f32 to vector<2x8x5xf32>
    %80 = arith.addf %78, %79 : vector<2x8x5xf32>
    %cst_56 = arith.constant 6.28318548 : f32
    %81 = vector.broadcast %cst_56 : f32 to vector<2x8x5xf32>
    %82 = arith.divf %80, %81 : vector<2x8x5xf32>
    %83 = math.floor %82 : vector<2x8x5xf32>
    %cst_57 = arith.constant 6.28318548 : f32
    %84 = vector.broadcast %cst_57 : f32 to vector<2x8x5xf32>
    %85 = arith.mulf %84, %83 : vector<2x8x5xf32>
    %86 = arith.subf %80, %85 : vector<2x8x5xf32>
    %cst_58 = arith.constant 3.14159274 : f32
    %87 = vector.broadcast %cst_58 : f32 to vector<2x8x5xf32>
    %88 = arith.subf %86, %87 : vector<2x8x5xf32>
    %89 = arith.subf %67, %66 : vector<2x8x5xf32>
    %cst_59 = arith.constant 3.14159274 : f32
    %90 = vector.broadcast %cst_59 : f32 to vector<2x8x5xf32>
    %91 = arith.addf %89, %90 : vector<2x8x5xf32>
    %cst_60 = arith.constant 6.28318548 : f32
    %92 = vector.broadcast %cst_60 : f32 to vector<2x8x5xf32>
    %93 = arith.divf %91, %92 : vector<2x8x5xf32>
    %94 = math.floor %93 : vector<2x8x5xf32>
    %cst_61 = arith.constant 6.28318548 : f32
    %95 = vector.broadcast %cst_61 : f32 to vector<2x8x5xf32>
    %96 = arith.mulf %95, %94 : vector<2x8x5xf32>
    %97 = arith.subf %91, %96 : vector<2x8x5xf32>
    %cst_62 = arith.constant 3.14159274 : f32
    %98 = vector.broadcast %cst_62 : f32 to vector<2x8x5xf32>
    %99 = arith.subf %97, %98 : vector<2x8x5xf32>
    %100 = math.sin %88 : vector<2x8x5xf32>
    %101 = math.sin %99 : vector<2x8x5xf32>
    %102 = arith.subf %100, %101 : vector<2x8x5xf32>
    %103 = vector.broadcast %7 : vector<2x1x1xf32> to vector<2x8x5xf32>
    %104 = arith.mulf %102, %103 : vector<2x8x5xf32>
    %105 = math.cos %88 : vector<2x8x5xf32>
    %106 = math.cos %99 : vector<2x8x5xf32>
    %107 = arith.subf %105, %106 : vector<2x8x5xf32>
    %108 = vector.broadcast %7 : vector<2x1x1xf32> to vector<2x8x5xf32>
    %109 = arith.mulf %107, %108 : vector<2x8x5xf32>
    %110 = arith.mulf %104, %104 : vector<2x8x5xf32>
    %111 = arith.mulf %109, %109 : vector<2x8x5xf32>
    %112 = arith.addf %110, %111 : vector<2x8x5xf32>
    %113 = arith.mulf %112, %70 : vector<2x8x5xf32>
    %cst_63 = arith.constant dense<0.000000e+00> : vector<2x8xf32>
    %114 = vector.multi_reduction <add>, %113, %cst_63 [2] : vector<2x8x5xf32> to vector<2x8xf32>
    %cst_64 = arith.constant dense<0.000000e+00> : vector<2xf32>
    %115 = vector.multi_reduction <add>, %114, %cst_64 [1] : vector<2x8xf32> to vector<2xf32>
    %116 = vector.shape_cast %115 : vector<2xf32> to vector<2x1xf32>
    %117 = arith.divf %116, %77 : vector<2x1xf32>
    %118 = math.sin %67 : vector<2x8x5xf32>
    %119 = math.sin %65 : vector<2x8x5xf32>
    %120 = arith.subf %118, %119 : vector<2x8x5xf32>
    %121 = math.cos %67 : vector<2x8x5xf32>
    %122 = math.cos %65 : vector<2x8x5xf32>
    %123 = arith.subf %121, %122 : vector<2x8x5xf32>
    %124 = arith.mulf %120, %120 : vector<2x8x5xf32>
    %125 = arith.mulf %123, %123 : vector<2x8x5xf32>
    %126 = arith.addf %124, %125 : vector<2x8x5xf32>
    %127 = arith.mulf %126, %70 : vector<2x8x5xf32>
    %cst_65 = arith.constant dense<0.000000e+00> : vector<2x8xf32>
    %128 = vector.multi_reduction <add>, %127, %cst_65 [2] : vector<2x8x5xf32> to vector<2x8xf32>
    %cst_66 = arith.constant dense<0.000000e+00> : vector<2xf32>
    %129 = vector.multi_reduction <add>, %128, %cst_66 [1] : vector<2x8xf32> to vector<2xf32>
    %130 = vector.shape_cast %129 : vector<2xf32> to vector<2x1xf32>
    %131 = arith.divf %130, %77 : vector<2x1xf32>
    %cst_67 = arith.constant 0.000000e+00 : f32
    %132 = vector.broadcast %cst_67 : f32 to vector<2x2xf32>
    %133 = tpu.concatenate %17, %29, %39, %64, %117, %131, %132 in 1 : vector<2x1xf32>, vector<2x1xf32>, vector<2x1xf32>, vector<2x1xf32>, vector<2x1xf32>, vector<2x1xf32>, vector<2x2xf32> -> vector<2x8xf32>
    %c0_68 = arith.constant 0 : index
    %c0_69 = arith.constant 0 : index
    %134 = vector.load %arg14[%c0_68, %c0_69] : memref<2x8xf32, #tpu.memory_space<vmem>>, vector<2x8xf32>
    tpu.vector_store %arg14[%c0_68, %c0_69], %133 {strides = array<i32>} : memref<2x8xf32, #tpu.memory_space<vmem>>, vector<2x8xf32>,
    return
  }
}

</mosaic_0001>

<bundles_post_ra>
// kernel: flow_model_forward.7
= control target key start
LH: loop header
LB: loop body
LE: loop exit
PB: predicated region body
PF: predicated region fallthrough
CT: control target
= control target key end

     0   :  { %v48_v0 = vlaneseq  ;;  %v365_v1 = vmov 0   ;;  %v366_v2 = vmov 1966171168   ;;  %v367_v31 = vmov 0.0   ;;  %s573_s4 = inlined_call_operand.vmem [shape: s32[2,8], index: 4, kind: input, shape index: {}]   ;;  %s574_s0 = inlined_call_operand.vmem [shape: f32[2,1], index: 0, kind: input, shape index: {}]   ;;  %s575_s1 = inlined_call_operand.vmem [shape: f32[2,1], index: 1, kind: input, shape index: {}]   ;;  %s576_s2 = inlined_call_operand.vmem [shape: f32[2,8], index: 2, kind: input, shape index: {}]   ;;  %s577_s9 = inlined_call_operand.vmem [shape: f32[2,8,20], index: 9, kind: input, shape index: {}]   ;;  %s578_s3 = inlined_call_operand.vmem [shape: f32[2,8], index: 3, kind: input, shape index: {}]   ;;  %s579_s8 = inlined_call_operand.vmem [shape: f32[2,8,14], index: 8, kind: input, shape index: {}]   ;;  %s580_s6 = inlined_call_operand.vmem [shape: f32[2,8,14], index: 6, kind: input, shape index: {}]   ;;  %s581_s7 = inlined_call_operand.vmem [shape: f32[2,8,3], index: 7, kind: input, shape index: {}]   ;;  %s582_s5 = inlined_call_operand.vmem [shape: f32[2,8,3], index: 5, kind: input, shape index: {}]   ;;  %s583_s10 = inlined_call_operand.vmem [shape: f32[2,8,128], index: 10, kind: output, shape index: {}]  }
   0x1   :  { %354 = vset.pattern.permute.xlu1 %v365_v1  ;;  %v46_v3 = vunpack.c.l.s4 %v366_v2  ;;  %355 = vset.pattern.permute.xlu0 %v365_v1  ;;  %v345_v5 = vld.sshfl [vmem:[%s574_s0] sm:$0x11 pattern:$0x75316420]  ;;  %v261_v39 = vld [vmem:[%s577_s9 + $0x8] sm:$0xff]  ;;  %vm268_vm11 = vcmask 162816  }
   0x2   :  { %v49_v4 = vshrl.u32 %v48_v0, 7  ;;  %v219_v6 = vld [vmem:[%s573_s4] sm:$0x3]  ;;  %v44_v8 = vcombine.high %v345_v5, %v345_v5  ;;  %v455_v28 = vand.u32 127, %v48_v0 }
   0x3   :  { %v47_v7 = vunpack.c.0.s8 %v46_v3  ;;  %v346_v11 = vld.sshfl [vmem:[%s575_s1] sm:$0x11 pattern:$0x75316420] }
   0x4   :  { %v431_v9 = vsub.s32 0, %v49_v4  ;;  %v433_v10 = vsub.s32 1, %v49_v4  ;;  %v68_v16 = vcombine.high %v346_v11, %v346_v11  ;;  %v446_v23 = vld [vmem:[%s576_s2] sm:$0x3] }
   0x5   :  { %v50_v12 = vsub.s32 %v47_v7, %v49_v4  ;;  %v260_v37 = vld [vmem:[%s577_s9] sm:$0xff] }
   0x6   :  { %v223_v13 = vrot.slane %v219_v6, %v431_v9  ;;  %v230_v17 = vrot.slane %v219_v6, %v433_v10  ;;  %v94_v25 = vrot.slane %v446_v23, %v433_v10  ;;  %v87_v26 = vrot.slane %v446_v23, %v431_v9 }
   0x7   :  { %v51_v14 = vrot.slane %v345_v5, %v50_v12  ;;  %v58_v15 = vrot.slane %v44_v8, %v50_v12  ;;  %v75_v18 = vrot.slane %v346_v11, %v50_v12  ;;  %v82_v21 = vrot.slane %v68_v16, %v50_v12  ;;  %v100_v12 = vld [vmem:[%s578_s3] sm:$0x3]  ;;  %s368_s3 = smov 3  }
   0x8   :  { %225 = vbcast.lane.b32.xlu0 %v223_v13, 256  ;;  %v207_v13 = vld [vmem:[%s579_s8] sm:$0xff]  ;;  %v104_v16 = vrot.slane %v100_v12, %v431_v9 }
   0x9   :  { %v164_v19 = vrot.slane %v51_v14, %v431_v9  ;;  %v168_v20 = vrot.slane %v58_v15, %v431_v9  ;;  %v182_v22 = vrot.slane %v75_v18, %v431_v9  ;;  %v186_v24 = vrot.slane %v82_v21, %v431_v9  ;;  %v205_v14 = vld [vmem:[%s580_s6] sm:$0xff]  ;;  %v208_v15 = vld [vmem:[%s579_s8 + $0x8] sm:$0xff] }
   0xa   :  { %v206_v18 = vld [vmem:[%s580_s6 + $0x8] sm:$0xff]  ;;  %s369_s6 = smov 17  }
   0xb   :  { %170 = vperm.xlu1 %354, %v164_v19  }
   0xc   :  { %232 = vbcast.lane.b32.xlu0 %v230_v17, 256 }
   0xf   :  { %174 = vperm.xlu1 %354, %v168_v20  }
  0x10   :  { %188 = vperm.xlu0 %355, %v182_v22  }
  0x13   :  { %192 = vperm.xlu1 %354, %v186_v24  }
  0x14   :  { %96 = vbcast.lane.b32.xlu0 %v94_v25, 256  ;;  %v111_v25 = vrot.slane %v100_v12, %v433_v10 }
  0x17   :  { %89 = vbcast.lane.b32.xlu1 %v87_v26, 256 }
  0x7a   :  { %v453_v27 = vpop.permute.xlu0 %225 }
  0x7b   :  { %vm234_vm2 = vcmp.eq.s32.totalorder %v455_v28, %v453_v27  ;;  %vm236_vm3 = vcmp.ge.s32.totalorder %v453_v27, 0  ;;  %vm244_vm7 = vcmp.lt.s32.totalorder %v453_v27, 20 }
  0x7c   :  { %vm242_vm6 = vmand %vm234_vm2, %vm236_vm3 }
  0x7d   :  { %vm250_vm9 = vmand %vm242_vm6, %vm244_vm7  ;;  %vm336_vm6 = vcmask 302080  }
  0x7e   :  { %v457_v29 = vpop.permute.xlu0 %232  ;;  %v252_v33 = vsel %vm250_vm9, 1.0, %v367_v31 }
  0x7f   :  { %vm235_vm0 = vcmp.eq.s32.totalorder %v455_v28, %v457_v29  ;;  %vm237_vm1 = vcmp.ge.s32.totalorder %v457_v29, 0  ;;  %vm245_vm5 = vcmp.lt.s32.totalorder %v457_v29, 20  ;;  %v254_v35 = vmul.f32 10.0, %v252_v33 }
  0x80   :  { %vm243_vm4 = vmand %vm235_vm0, %vm237_vm1  ;;  %vm117_vm1 = vcmask 58368  }
  0x81   :  { %vm251_vm8 = vmand %vm243_vm4, %vm245_vm5  ;;  %v347_v41 = vadd.f32 -5.0, %v254_v35  ;;  %v118_v11 = vsel %vm117_vm1, %v446_v23, 0.0  ;;  %vm134_vm4 = vcmask 23552   ;;  %vm333_vm5 = vcmask 138240  }
  0x82   :  { %v253_v32 = vsel %vm251_vm8, 1.0, %v367_v31 }
  0x83   :  { %v255_v34 = vmul.f32 10.0, %v253_v32 }
  0x85   :  { %v348_v40 = vadd.f32 -5.0, %v255_v34 }
  0x8a   :  { %v467_v30 = vpop.permute.xlu1 %170 }
  0x8b   :  { %v258_v47 = vmul.f32 %v347_v41, %v467_v30  ;;  %v209_v19 = vmul.f32 %v205_v14, %v467_v30 }
  0x8e   :  { %v471_v36 = vpop.permute.xlu1 %174 }
  0x8f   :  { %v476_v38 = vpop.permute.xlu0 %188  ;;  %v259_v44 = vmul.f32 %v348_v40, %v471_v36  ;;  %v210_v21 = vmul.f32 %v206_v18, %v471_v36 }
  0x90   :  { %v262_v42 = vmul.f32 %v260_v37, %v476_v38  ;;  %v211_v17 = vmul.f32 %v207_v13, %v476_v38 }
  0x92   :  { %v482_v43 = vpop.permute.xlu1 %192  ;;  %v264_v49 = vadd.f32 %v262_v42, %v258_v47  ;;  %v213_v22 = vadd.f32 %v211_v17, %v209_v19  ;;  %v159_v17 = vld [vmem:[%s582_s5] sm:$0xff] }
  0x93   :  { %v263_v45 = vmul.f32 %v261_v39, %v482_v43  ;;  %v486_v46 = vpop.permute.xlu0 %96  ;;  %v212_v20 = vmul.f32 %v208_v15, %v482_v43 }
  0x94   :  { %vm99_vm10 = vcmp.gt.f32.partialorder %v486_v46, 0.5 }
  0x95   :  { %v265_v48 = vadd.f32 %v263_v45, %v259_v44  ;;  %v214_v23 = vadd.f32 %v212_v20, %v210_v21  ;;  %v177_v21 = vmul.f32 %v467_v30, %v159_v17 }
  0x96   :  { %v490_v50 = vpop.permute.xlu1 %89 }
  0x97   :  { %vm98_vm12 = vcmp.gt.f32.partialorder %v490_v50, 0.5  ;;  %v267_v51 = vsel %vm99_vm10, %v265_v48, %v348_v40  ;;  %v216_v26 = vsel %vm99_vm10, %v214_v23, %v206_v18  ;;  %v160_v18 = vld [vmem:[%s582_s5 + $0x8] sm:$0xff] }
  0x98   :  { %v272_v52 = vsel %vm268_vm11, %v267_v51, -inf  ;;  %v266_v53 = vsel %vm98_vm12, %v264_v49, %v347_v41  ;;  %v215_v24 = vsel %vm98_vm12, %v213_v22, %v205_v14  ;;  %v178_v22 = vmul.f32 %v471_v36, %v160_v18 }
  0x99   :  { %273 = vmax.xlane.f32.xlu0 %v272_v52  ;;  %v269_v54 = vsel %vm268_vm11, %v266_v53, -inf  ;;  %v116_v52 = vld [vmem:[%s581_s7 + $0x8] sm:$0xff] }
  0x9a   :  { %270 = vmax.xlane.f32.xlu1 %v269_v54 }
 0x126   :  { %v274_v55 = vpop.xlane.xlu0 %273 }
 0x127   :  { %vm276_vm13 = vcmp.ge.f32.partialorder %v267_v51, %v274_v55  ;;  %v271_v56 = vpop.xlane.xlu1 %270 }
 0x128   :  { %v278_v57 = vsel %vm276_vm13, %v455_v28, 20  ;;  %vm275_vm14 = vcmp.ge.f32.partialorder %v266_v53, %v271_v56 }
 0x129   :  { %v294_v58 = vsel %vm268_vm11, %v278_v57, 2147483647  ;;  %v277_v59 = vsel %vm275_vm14, %v455_v28, 20 }
 0x12a   :  { %v279_v60 = vsel %vm268_vm11, %v277_v59, 2147483647  ;;  %v296_v61 = vshra.s32 %v294_v58, 16  ;;  %v295_v1 = vand.u32 65535, %v294_v58 }
 0x12b   :  { %v281_v62 = vshra.s32 %v279_v60, 16  ;;  %v280_v2 = vand.u32 65535, %v279_v60 }
 0x12c   :  { %v298_v63 = vcvt.s32.f32 %v296_v61  ;;  %v297_v4 = vcvt.s32.f32 %v295_v1 }
 0x12d   :  { %v283_v0 = vcvt.s32.f32 %v281_v62  ;;  %v282_v6 = vcvt.s32.f32 %v280_v2 }
 0x12e   :  { %299 = vmin.xlane.f32.xlu1 %v298_v63 }
 0x12f   :  { %284 = vmin.xlane.f32.xlu0 %v283_v0 }
 0x1bb   :  { %v300_v3 = vpop.xlane.xlu1 %299 }
 0x1bc   :  { %v285_v5 = vpop.xlane.xlu0 %284  ;;  %vm301_vm15 = vcmp.eq.f32.partialorder %v298_v63, %v300_v3  ;;  %v306_v32 = vcvt.f32.s32 %v300_v3 }
 0x1bd   :  { %v302_v7 = vsel %vm301_vm15, %v297_v4, inf  ;;  %vm286_vm0 = vcmp.eq.f32.partialorder %v283_v0, %v285_v5  ;;  %v291_v33 = vcvt.f32.s32 %v285_v5 }
 0x1be   :  { %303 = vmin.xlane.f32.xlu1 %v302_v7  ;;  %v287_v8 = vsel %vm286_vm0, %v282_v6, inf  ;;  %v307_v35 = vshll.u32 %v306_v32, 16 }
 0x1bf   :  { %288 = vmin.xlane.f32.xlu0 %v287_v8  ;;  %v292_v40 = vshll.u32 %v291_v33, 16 }
 0x1c3   :  { %119 = vadd.xlane.f32.xlu0 %v118_v11 }
 0x1cf   :  { %106 = vbcast.lane.b32.xlu1 %v104_v16, 256 }
 0x1d3   :  { %317 = vrot.lane.b32.xlu1 %v215_v24, %s368_s3 }
 0x1d7   :  { %319 = vrot.lane.b32.xlu1 %v216_v26, %s368_s3 }
 0x1d9   :  { %113 = vbcast.lane.b32.xlu0 %v111_v25, 256 }
 0x24b   :  { %v304_v34 = vpop.xlane.xlu1 %303 }
 0x24c   :  { %v305_v37 = vcvt.f32.s32 %v304_v34  ;;  %v289_v39 = vpop.xlane.xlu0 %288 }
 0x24d   :  { %v290_v41 = vcvt.f32.s32 %v289_v39 }
 0x24e   :  { %v308_v42 = vadd.s32 %v307_v35, %v305_v37 }
 0x24f   :  { %v293_v44 = vadd.s32 %v292_v40, %v290_v41  ;;  %v107_v14 = vpop.permute.xlu1 %106 }
 0x250   :  { %v310_v45 = vsel %vm99_vm10, %v308_v42, %v457_v29  ;;  %v115_v29 = vld [vmem:[%s581_s7] sm:$0xff]  ;;  %v120_v54 = vpop.xlane.xlu0 %119 }
 0x251   :  { %v309_v47 = vsel %vm98_vm12, %v293_v44, %v453_v27  ;;  %vm312_vm2 = vcmp.eq.s32.totalorder %v455_v28, %v310_v45  ;;  %v133_v27 = vmul.f32 %v116_v52, %v486_v46  ;;  %v132_v53 = vmul.f32 %v115_v29, %v490_v50 }
 0x252   :  { %vm311_vm3 = vcmp.eq.s32.totalorder %v455_v28, %v309_v47  ;;  %v314_v48 = vsel %vm312_vm2, 1.0, %v367_v31  ;;  %v125_v57 = vrot.slane %v120_v54, %v431_v9  ;;  %v129_v58 = vrot.slane %v120_v54, %v433_v10 }
 0x253   :  { %v313_v49 = vsel %vm311_vm3, 1.0, %v367_v31  ;;  %v142_v28 = vsel %vm134_vm4, %v133_v27, 0.0  ;;  %v135_v31 = vsel %vm134_vm4, %v132_v53, 0.0  ;;  %v318_v24 = vpop.permute.xlu1 %317 }
 0x254   :  { %v356_v51 = vpack.i.bf16 %v314_v48, %v313_v49  ;;  %v143_v55 = vrot.slane %v142_v28, 4  ;;  %v136_v56 = vrot.slane %v135_v31, 4  ;;  %v149_v61 = vadd.f32 1e-08, %v125_v57  ;;  %v114_v13 = vpop.permute.xlu0 %113 }
 0x255   :  { %v150_v62 = vadd.f32 1e-08, %v129_v58 }
 0x256   :  { %357 = vrot.lane.b32.xlu0 %v356_v51, %s369_s6  ;;  %v144_v59 = vadd.f32 %v143_v55, %v142_v28  ;;  %v137_v60 = vadd.f32 %v136_v56, %v135_v31  ;;  %361 = vrcp.f32 %v149_v61 }
 0x257   :  { %363 = vrcp.f32 %v150_v62  ;;  %v320_v34 = vpop.permute.xlu1 %319 }
 0x258   :  { %v145_v63 = vrot.slane %v144_v59, 2  ;;  %v138_v0 = vrot.slane %v137_v60, 2 }
 0x25a   :  { %v146_v1 = vadd.f32 %v145_v63, %v144_v59  ;;  %v139_v2 = vadd.f32 %v138_v0, %v137_v60 }
 0x25c   :  { %v140_v3 = vrot.slane %v139_v2, 1  ;;  %v147_v4 = vrot.slane %v146_v1, 1 }
 0x25e   :  { %v141_v7 = vadd.f32 %v140_v3, %v139_v2  ;;  %v148_v8 = vadd.f32 %v147_v4, %v146_v1 }
 0x260   :  { %v362_v5 = vpop.eup %361 }
 0x261   :  { %v364_v6 = vpop.eup %363  ;;  %v152_v11 = vmul.f32 %v362_v5, %v141_v7 }
 0x262   :  { %v154_v9 = vmul.f32 %v364_v6, %v148_v8 }
 0x263   :  { %v155_v12 = vsub.f32 %v115_v29, %v152_v11 }
 0x264   :  { %v156_v10 = vsub.f32 %v116_v52, %v154_v9 }
 0x265   :  { %v157_v15 = vmul.f32 %v155_v12, %v107_v14 }
 0x266   :  { %v158_v16 = vmul.f32 %v156_v10, %v114_v13 }
 0x267   :  { %v195_v19 = vmul.f32 %v476_v38, %v157_v15 }
 0x268   :  { %v196_v20 = vmul.f32 %v482_v43, %v158_v16 }
 0x269   :  { %v197_v23 = vadd.f32 %v195_v19, %v177_v21 }
 0x26a   :  { %v198_v25 = vadd.f32 %v196_v20, %v178_v22 }
 0x26b   :  { %v203_v26 = vsel %vm98_vm12, %v197_v23, %v159_v17 }
 0x26c   :  { %v204_v32 = vsel %vm99_vm10, %v198_v25, %v160_v18  ;;  %v331_v43 = vsel %vm134_vm4, %v203_v26, %v318_v24 }
 0x26d   :  { %v332_v30 = vsel %vm134_vm4, %v204_v32, %v320_v34 }
 0x2c8   :  { %v358_v33 = vpop.permute.xlu0 %357 }
 0x2c9   :  { %v360_v38 = vunpack.i.h.bf16 %v358_v33  ;;  %v359_v35 = vunpack.i.l.bf16 %v358_v33 }
 0x2cb   :  { %v334_v36 = vsel %vm333_vm5, %v331_v43, %v359_v35  ;;  %v335_v37 = vsel %vm333_vm5, %v332_v30, %v360_v38 }
 0x2cc   :  { %v337_v39 = vsel %vm336_vm6, %v334_v36, 0.0  ;;  %v338_v40 = vsel %vm336_vm6, %v335_v37, 0.0 }
 0x2cd   :  { %339 = vst [vmem:[%s583_s10] sm:$0xff] %v337_v39  ;;  %340 = vst [vmem:[%s583_s10 + $0x8] sm:$0xff] %v338_v40 }

// kernel: flow_model_forward.6
= control target key start
LH: loop header
LB: loop body
LE: loop exit
PB: predicated region body
PF: predicated region fallthrough
CT: control target
= control target key end

     0   :  { %s554_s9 = smov 0   ;;  %s590_s0 = inlined_call_operand.vmem [shape: f32[2,8,3], index: 0, kind: input, shape index: {}]   ;;  %s591_s1 = inlined_call_operand.vmem [shape: f32[1,16], index: 1, kind: input, shape index: {}]   ;;  %s592_s2 = inlined_call_operand.vmem [shape: f32[2,8,128], index: 2, kind: output, shape index: {}]  }
   0x1 LB: > { %s482_s10 = sadd.s32 4294967295, %s535_s9   ;;  %p486_p0 = scmp.ge.s32.totalorder %s535_s9, 1  ;;  %s535_s9 = sphi %s554_s9, %s12_s9  }
   0x2   : > { %p111_p1 = scmp.lt.s32.totalorder %s535_s9, 3 }
   0x4   : > { %p112_p2 = pnand %p486_p0, %p111_p1 }
   0x5   : > { %p131_p3 = scmp.lt.s32.totalorder (!%p112_p2), %s482_s10, 1  ;;  %vm142_vm0 = vcmask (!%p112_p2), 23552   ;;  %v537_v3 = vmov (!%p112_p2), 0.0   ;;  %vm538_vm1 = vmmov (!%p112_p2), 0   ;;  %vm147_vm2 = vcmask (!%p112_p2), 31744  }
   0x6   : > { %115 = sbr.rel (%p112_p2) target bundleno = 573 (0x23d), region = 28  ;;  %496 = vmatprep.subr.mxu0 (!%p112_p2), %v537_v3  ;;  %498 = vmatprep.mubr.msk.f32.mxu0 (!%p112_p2), %vm538_vm1, %v537_v3  ;;  %vm152_vm3 = vcmask (!%p112_p2), 39936   ;;  %v237_v13 = vlaneseq (!%p112_p2)  ;;  %v491_v36 = vld [vmem:[%s591_s1] ss:$0 sm:$0xff] (!%p112_p2)  ;;  %vm339_vm6 = vcmask (!%p112_p2), 130048   ;;  %vm412_vm7 = vcmask (!%p112_p2), 1041409  }
   0x7   : > { %vm414_vm8 = vcmask (!%p112_p2), 1042434   ;;  %vm416_vm9 = vcmask (!%p112_p2), 1043459   ;;  %vm418_vm10 = vcmask (!%p112_p2), 1044484   ;;  %vm420_vm11 = vcmask (!%p112_p2), 1045509  }
   0x8   : > { %v238_v14 = vshrl.u32 (!%p112_p2), %v237_v13, 7  ;;  %vm422_vm12 = vcmask (!%p112_p2), 1046534   ;;  %vm424_vm13 = vcmask (!%p112_p2), 1047559  }
   0xa   : > { %v246_v17 = vsub.s32 (!%p112_p2), 1, %v238_v14  ;;  %v239_v18 = vsub.s32 (!%p112_p2), 0, %v238_v14  ;;  %v253_v24 = vsub.s32 (!%p112_p2), 2, %v238_v14  ;;  %v260_v26 = vsub.s32 (!%p112_p2), 3, %v238_v14 }
   0xb   : > { %v267_v28 = vsub.s32 (!%p112_p2), 4, %v238_v14  ;;  %v274_v30 = vsub.s32 (!%p112_p2), 5, %v238_v14  ;;  %v281_v32 = vsub.s32 (!%p112_p2), 6, %v238_v14  ;;  %v288_v34 = vsub.s32 (!%p112_p2), 7, %v238_v14 }
   0xd   : > { %s594_s10 = smov (!%p131_p3, %s482_s10), 1 }
   0xe   : > { %s487_s11 = sshll.u32 %s594_s10, 3 }
   0xf   : > { %s134_s14 = scalar_lea.vmem %s590_s0, %s487_s11  ;;  %s138_s19 = scalar_lea.vmem %s592_s2, %s487_s11 }
  0x10   : > { %v139_v0 = vld [vmem:[%s134_s14] sm:$0xff] }
  0x11   : > { %v141_v1 = vmul.f32 %v139_v0, %v139_v0  ;;  %v149_v4 = vmul.f32 -2.0, %v139_v0 }
  0x13   : > { %v143_v2 = vsel %vm142_vm0, %v141_v1, 0.0  ;;  %v150_v5 = vsel %vm142_vm0, %v149_v4, 1.0 }
  0x14   : > { %144 = vadd.xlane.f32.xlu0 %v143_v2 }
  0xa1   : > { %v145_v6 = vpop.xlane.xlu0 %144 }
  0xa2   : > { %v146_v7 = vsel %vm142_vm0, %v139_v0, %v145_v6  ;;  %v151_v8 = vsel %vm147_vm2, %v150_v5, %v145_v6 }
  0xa3   : > { %497 = vmatpush3.xpose.msk.msra.mxu0 %vm152_vm3, %v151_v8  ;;  %v148_v9 = vsel %vm147_vm2, %v146_v7, 1.0 }
  0xa6   : > { %499 = vmatmul.mubr.msk.f32.vlgmr.msra.gmra.mrb[0].mxu0 %vm152_vm3, %v148_v9 }
 0x179   : > { %v225_v10 = vpop.f32.mrb[0].mxu0 }
 0x17a   : > { %v229_v11 = vmax.f32 %v225_v10, 0.0  ;;  %v500_v12 = vpop.f32.mrb[1].mxu0 }
 0x17c   : > { %511 = vrsqrt.f32 %v229_v11  ;;  %vm232_vm4 = vcmp.eq.f32.partialorder %v229_v11, inf  ;;  %v235_v19 = vand.u32 2147483648, %v229_v11  ;;  %vm234_vm5 = vcmp.eq.f32.partialorder %v229_v11, 0.0 }
 0x186   : > { %v512_v15 = vpop.eup %511 }
 0x187   : > { %v231_v16 = vmul.f32 %v512_v15, %v229_v11 }
 0x189   : > { %v233_v20 = vsel %vm232_vm4, %v229_v11, %v231_v16 }
 0x18a   : > { %v236_v21 = vsel %vm234_vm5, %v235_v19, %v233_v20 }
 0x18b   : > { %v247_v22 = vrot.slane %v236_v21, %v246_v17  ;;  %v240_v23 = vrot.slane %v236_v21, %v239_v18  ;;  %v254_v25 = vrot.slane %v236_v21, %v253_v24  ;;  %v261_v27 = vrot.slane %v236_v21, %v260_v26 }
 0x18c   : > { %v268_v29 = vrot.slane %v236_v21, %v267_v28  ;;  %v275_v31 = vrot.slane %v236_v21, %v274_v30  ;;  %v282_v33 = vrot.slane %v236_v21, %v281_v32  ;;  %v289_v35 = vrot.slane %v236_v21, %v288_v34 }
 0x18d   : > { %249 = vbcast.lane.b32.xlu1 %v247_v22, 256  ;;  %242 = vbcast.lane.b32.xlu0 %v240_v23, 256 }
 0x191   : > { %256 = vbcast.lane.b32.xlu1 %v254_v25, 256 }
 0x195   : > { %263 = vbcast.lane.b32.xlu1 %v261_v27, 256 }
 0x199   : > { %270 = vbcast.lane.b32.xlu1 %v268_v29, 256 }
 0x19d   : > { %277 = vbcast.lane.b32.xlu1 %v275_v31, 256 }
 0x1a1   : > { %284 = vbcast.lane.b32.xlu1 %v282_v33, 256 }
 0x1a5   : > { %291 = vbcast.lane.b32.xlu1 %v289_v35, 256 }
 0x1ff   : > { %v250_v37 = vpop.permute.xlu1 %249  ;;  %v243_v38 = vpop.permute.xlu0 %242 }
 0x200   : > { %v300_v39 = vsub.f32 %v250_v37, %v491_v36  ;;  %v299_v40 = vsub.f32 %v243_v38, %v491_v36 }
 0x202   : > { %v308_v41 = vmul.f32 %v300_v39, %v300_v39  ;;  %v307_v42 = vmul.f32 %v299_v40, %v299_v40 }
 0x203   : > { %v257_v43 = vpop.permute.xlu1 %256 }
 0x204   : > { %v316_v44 = vmul.f32 -0.25, %v308_v41  ;;  %v315_v45 = vmul.f32 -0.25, %v307_v42  ;;  %v301_v46 = vsub.f32 %v257_v43, %v491_v36 }
 0x206   : > { %v325_v47 = vmul.f32 1.442695, %v316_v44  ;;  %v323_v48 = vmul.f32 1.442695, %v315_v45  ;;  %v309_v49 = vmul.f32 %v301_v46, %v301_v46 }
 0x207   : > { %v264_v50 = vpop.permute.xlu1 %263 }
 0x208   : > { %513 = vpow2.f32 %v325_v47  ;;  %v317_v51 = vmul.f32 -0.25, %v309_v49  ;;  %v302_v52 = vsub.f32 %v264_v50, %v491_v36 }
 0x209   : > { %515 = vpow2.f32 %v323_v48 }
 0x20a   : > { %v327_v53 = vmul.f32 1.442695, %v317_v51  ;;  %v310_v54 = vmul.f32 %v302_v52, %v302_v52 }
 0x20b   : > { %v271_v55 = vpop.permute.xlu1 %270 }
 0x20c   : > { %517 = vpow2.f32 %v327_v53  ;;  %v318_v56 = vmul.f32 -0.25, %v310_v54  ;;  %v303_v57 = vsub.f32 %v271_v55, %v491_v36 }
 0x20e   : > { %v329_v58 = vmul.f32 1.442695, %v318_v56  ;;  %v311_v59 = vmul.f32 %v303_v57, %v303_v57 }
 0x20f   : > { %v278_v60 = vpop.permute.xlu1 %277 }
 0x210   : > { %519 = vpow2.f32 %v329_v58  ;;  %v319_v61 = vmul.f32 -0.25, %v311_v59  ;;  %v304_v62 = vsub.f32 %v278_v60, %v491_v36 }
 0x212   : > { %v514_v63 = vpop.eup %513  ;;  %v331_v0 = vmul.f32 1.442695, %v319_v61  ;;  %v312_v1 = vmul.f32 %v304_v62, %v304_v62 }
 0x213   : > { %v516_v2 = vpop.eup %515  ;;  %v285_v3 = vpop.permute.xlu1 %284  ;;  %v347_v5 = vsel %vm339_vm6, %v514_v63, 0.0 }
 0x214   : > { %521 = vpow2.f32 %v331_v0  ;;  %v320_v4 = vmul.f32 -0.25, %v312_v1  ;;  %v305_v6 = vsub.f32 %v285_v3, %v491_v36  ;;  %v340_v8 = vsel %vm339_vm6, %v516_v2, 0.0 }
 0x215   : > { %v348_v13 = vrot.slane %v347_v5, 4  ;;  %v341_v15 = vrot.slane %v340_v8, 4 }
 0x216   : > { %v518_v7 = vpop.eup %517  ;;  %v333_v9 = vmul.f32 1.442695, %v320_v4  ;;  %v313_v11 = vmul.f32 %v305_v6, %v305_v6 }
 0x217   : > { %v354_v10 = vsel %vm339_vm6, %v518_v7, 0.0  ;;  %v292_v12 = vpop.permute.xlu1 %291  ;;  %v349_v22 = vadd.f32 %v348_v13, %v347_v5  ;;  %v342_v25 = vadd.f32 %v341_v15, %v340_v8 }
 0x218   : > { %523 = vpow2.f32 %v333_v9  ;;  %v306_v14 = vsub.f32 %v292_v12, %v491_v36  ;;  %v321_v16 = vmul.f32 -0.25, %v313_v11  ;;  %v355_v18 = vrot.slane %v354_v10, 4 }
 0x219   : > { %v350_v31 = vrot.slane %v349_v22, 2  ;;  %v343_v33 = vrot.slane %v342_v25, 2 }
 0x21a   : > { %v520_v17 = vpop.eup %519  ;;  %v314_v19 = vmul.f32 %v306_v14, %v306_v14  ;;  %v335_v21 = vmul.f32 1.442695, %v321_v16  ;;  %v356_v27 = vadd.f32 %v355_v18, %v354_v10 }
 0x21b   : > { %v361_v20 = vsel %vm339_vm6, %v520_v17, 0.0  ;;  %v351_v39 = vadd.f32 %v350_v31, %v349_v22  ;;  %v344_v42 = vadd.f32 %v343_v33, %v342_v25 }
 0x21c   : > { %v362_v23 = vrot.slane %v361_v20, 4  ;;  %v322_v24 = vmul.f32 -0.25, %v314_v19  ;;  %525 = vpow2.f32 %v335_v21  ;;  %v357_v35 = vrot.slane %v356_v27, 2 }
 0x21d   : > { %v352_v47 = vrot.slane %v351_v39, 1  ;;  %v345_v51 = vrot.slane %v344_v42, 1 }
 0x21e   : > { %v522_v26 = vpop.eup %521  ;;  %v337_v28 = vmul.f32 1.442695, %v322_v24  ;;  %v363_v29 = vadd.f32 %v362_v23, %v361_v20  ;;  %v358_v43 = vadd.f32 %v357_v35, %v356_v27 }
 0x21f   : > { %v368_v30 = vsel %vm339_vm6, %v522_v26, 0.0  ;;  %v353_v58 = vadd.f32 %v352_v47, %v351_v39  ;;  %v346_v61 = vadd.f32 %v345_v51, %v344_v42 }
 0x220   : > { %v369_v32 = vrot.slane %v368_v30, 4  ;;  %527 = vpow2.f32 %v337_v28  ;;  %v364_v37 = vrot.slane %v363_v29, 2  ;;  %v359_v53 = vrot.slane %v358_v43, 1 }
 0x221   : > { %v397_v5 = vmul.f32 0.125, %v353_v58  ;;  %v396_v7 = vmul.f32 0.125, %v346_v61 }
 0x222   : > { %v524_v34 = vpop.eup %523  ;;  %v370_v36 = vadd.f32 %v369_v32, %v368_v30  ;;  %v365_v46 = vadd.f32 %v364_v37, %v363_v29  ;;  %v360_v1 = vadd.f32 %v359_v53, %v358_v43 }
 0x223   : > { %v375_v38 = vsel %vm339_vm6, %v524_v34, 0.0  ;;  %v413_v16 = vsel %vm412_vm7, %v397_v5, %v396_v7 }
 0x224   : > { %v371_v40 = vrot.slane %v370_v36, 2  ;;  %v376_v41 = vrot.slane %v375_v38, 4  ;;  %v366_v56 = vrot.slane %v365_v46, 1  ;;  %v398_v11 = vmul.f32 0.125, %v360_v1 }
 0x226   : > { %v377_v44 = vadd.f32 %v376_v41, %v375_v38  ;;  %v526_v45 = vpop.eup %525  ;;  %v372_v48 = vadd.f32 %v371_v40, %v370_v36  ;;  %v367_v2 = vadd.f32 %v366_v56, %v365_v46  ;;  %v415_v19 = vsel %vm414_vm8, %v398_v11, %v413_v16 }
 0x227   : > { %v382_v50 = vsel %vm339_vm6, %v526_v45, 0.0 }
 0x228   : > { %v378_v49 = vrot.slane %v377_v44, 2  ;;  %v383_v52 = vrot.slane %v382_v50, 4  ;;  %v373_v59 = vrot.slane %v372_v48, 1  ;;  %v399_v12 = vmul.f32 0.125, %v367_v2 }
 0x22a   : > { %v379_v54 = vadd.f32 %v378_v49, %v377_v44  ;;  %v528_v55 = vpop.eup %527  ;;  %v384_v57 = vadd.f32 %v383_v52, %v382_v50  ;;  %v374_v6 = vadd.f32 %v373_v59, %v372_v48  ;;  %v417_v21 = vsel %vm416_vm9, %v399_v12, %v415_v19 }
 0x22b   : > { %v389_v60 = vsel %vm339_vm6, %v528_v55, 0.0 }
 0x22c   : > { %v380_v62 = vrot.slane %v379_v54, 1  ;;  %v385_v63 = vrot.slane %v384_v57, 2  ;;  %v390_v0 = vrot.slane %v389_v60, 4  ;;  %v400_v15 = vmul.f32 0.125, %v374_v6 }
 0x22e   : > { %v386_v3 = vadd.f32 %v385_v63, %v384_v57  ;;  %v391_v4 = vadd.f32 %v390_v0, %v389_v60  ;;  %v381_v8 = vadd.f32 %v380_v62, %v379_v54  ;;  %v419_v23 = vsel %vm418_vm10, %v400_v15, %v417_v21 }
 0x230   : > { %v387_v9 = vrot.slane %v386_v3, 1  ;;  %v392_v10 = vrot.slane %v391_v4, 2  ;;  %v401_v17 = vmul.f32 0.125, %v381_v8 }
 0x232   : > { %v388_v13 = vadd.f32 %v387_v9, %v386_v3  ;;  %v393_v14 = vadd.f32 %v392_v10, %v391_v4  ;;  %v421_v24 = vsel %vm420_vm11, %v401_v17, %v419_v23 }
 0x234   : > { %v394_v18 = vrot.slane %v393_v14, 1  ;;  %v402_v20 = vmul.f32 0.125, %v388_v13 }
 0x236   : > { %v395_v22 = vadd.f32 %v394_v18, %v393_v14  ;;  %v423_v26 = vsel %vm422_vm12, %v402_v20, %v421_v24 }
 0x238   : > { %v403_v25 = vmul.f32 0.125, %v395_v22 }
 0x23a   : > { %v425_v27 = vsel %vm424_vm13, %v403_v25, %v423_v26 }
 0x23b   : > { %v427_v28 = vsel %vm339_vm6, %v425_v27, 0.0 }
 0x23c   : > { %428 = vst [vmem:[%s138_s19] sm:$0xff] %v427_v28 }
 0x23d PF: > { %s12_s9 = sadd.s32 1, %s535_s9  }
 0x23e   : > { %p9_p4 = scmp.ge.s32.totalorder %s12_s9, 4  }
 0x240   :  { %11 = sbr.rel (!%p9_p4) target bundleno = 1 (0x1), region = 58 }

// kernel: flow_model_forward.8
= control target key start
LH: loop header
LB: loop body
LE: loop exit
PB: predicated region body
PF: predicated region fallthrough
CT: control target
= control target key end

     0   :  { %s2040_s18 = smov 0   ;;  %s2391_s0 = inlined_call_operand.vmem [shape: f32[16,128], index: 0, kind: input, shape index: {}]   ;;  %s2392_s1 = inlined_call_operand.vmem [shape: f32[16,128], index: 1, kind: input, shape index: {}]   ;;  %s2393_s2 = inlined_call_operand.vmem [shape: f32[16,128], index: 2, kind: input, shape index: {}]   ;;  %s2394_s3 = inlined_call_operand.vmem [shape: f32[16,1], index: 3, kind: input, shape index: {}]   ;;  %s2395_s4 = inlined_call_operand.vmem [shape: bf16[128,256], index: 4, kind: input, shape index: {}]   ;;  %s2396_s5 = inlined_call_operand.vmem [shape: f32[1,256], index: 5, kind: input, shape index: {}]   ;;  %s2397_s6 = inlined_call_operand.vmem [shape: bf16[256,128], index: 6, kind: input, shape index: {}]   ;;  %s2398_s7 = inlined_call_operand.vmem [shape: f32[1,128], index: 7, kind: input, shape index: {}]   ;;  %s2399_s8 = inlined_call_operand.vmem [shape: bf16[128,256], index: 8, kind: input, shape index: {}]   ;;  %s2400_s9 = inlined_call_operand.vmem [shape: bf16[128,256], index: 9, kind: input, shape index: {}]   ;;  %s2401_s10 = inlined_call_operand.vmem [shape: bf16[128,256], index: 10, kind: input, shape index: {}]   ;;  %s2402_s11 = inlined_call_operand.vmem [shape: f32[1,256], index: 11, kind: input, shape index: {}]   ;;  %s2403_s12 = inlined_call_operand.vmem [shape: f32[1,256], index: 12, kind: input, shape index: {}]   ;;  %s2404_s13 = inlined_call_operand.vmem [shape: bf16[256,128], index: 13, kind: input, shape index: {}]   ;;  %s2405_s14 = inlined_call_operand.vmem [shape: f32[1,128], index: 14, kind: input, shape index: {}]   ;;  %s2406_s15 = inlined_call_operand.vmem [shape: f32[16,128], index: 15, kind: output, shape index: {}]  }
   0x1 LB: > { %s1639_s19 = sadd.s32 4294967295, %s1957_s18   ;;  %p1643_p0 = scmp.ge.s32.totalorder %s1957_s18, 1  ;;  %s1957_s18 = sphi %s2040_s18, %s25_s18  }
   0x2   : > { %p463_p1 = scmp.lt.s32.totalorder %s1957_s18, 3 }
   0x4   : > { %p464_p2 = pnand %p1643_p0, %p463_p1 }
   0x5   : > { %v1807_v0 = vld [vmem:[%s2395_s4 + $0x4] ss:$8 sps:$4 sm:$0xff] (!%p464_p2)   ;;  %v1809_v1 = vld [vmem:[%s2395_s4] ss:$8 sps:$4 sm:$0xff] (!%p464_p2)   ;;  %v1959_v2 = vmov (!%p464_p2), 0   ;;  %p521_p3 = scmp.lt.s32.totalorder (!%p464_p2), %s1639_s19, 1 }
   0x6   : > { %467 = sbr.rel (%p464_p2) target bundleno = 992 (0x3e0), region = 80  ;;  %684 = vmatprep.mubr.bf16.mxu0 (!%p464_p2), %v1959_v2  ;;  %1806 = vset.pattern.permute.xlu0 (!%p464_p2), %v1959_v2  ;;  %v1810_v3 = vld [vmem:[%s2395_s4 + $0x14] ss:$8 sps:$4 sm:$0xff] (!%p464_p2)   ;;  %v1812_v4 = vld [vmem:[%s2395_s4 + $0x10] ss:$8 sps:$4 sm:$0xff] (!%p464_p2)   ;;  %v1831_v19 = vld [vmem:[%s2397_s6 + $0x40] sm:$0xff] (!%p464_p2)  }
   0x7   : > { %652 = vmatprep.subr.bf16.mxu0 (!%p464_p2), %v1807_v0  ;;  %v1813_v5 = vld [vmem:[%s2395_s4 + $0x24] ss:$8 sps:$4 sm:$0xff] (!%p464_p2)   ;;  %v1815_v6 = vld [vmem:[%s2395_s4 + $0x20] ss:$8 sps:$4 sm:$0xff] (!%p464_p2)   ;;  %v1816_v7 = vld [vmem:[%s2395_s4 + $0x34] ss:$8 sps:$4 sm:$0xff] (!%p464_p2)   ;;  %1753 = vmatprep.subr.bf16.mxu1 (!%p464_p2), %v1831_v19 }
   0x8   : > { %653 = vmatpush1.bf16.msra.mxu0 (!%p464_p2), %v1809_v1  ;;  %v1818_v8 = vld [vmem:[%s2395_s4 + $0x30] ss:$8 sps:$4 sm:$0xff] (!%p464_p2)   ;;  %v1819_v9 = vld [vmem:[%s2395_s4 + $0x44] ss:$8 sps:$4 sm:$0xff] (!%p464_p2)   ;;  %v1821_v10 = vld [vmem:[%s2395_s4 + $0x40] ss:$8 sps:$4 sm:$0xff] (!%p464_p2)  }
   0x9   : > { %654 = vmatprep.subr.bf16.mxu0 (!%p464_p2), %v1810_v3  ;;  %v1822_v11 = vld [vmem:[%s2395_s4 + $0x54] ss:$8 sps:$4 sm:$0xff] (!%p464_p2)   ;;  %v1824_v12 = vld [vmem:[%s2395_s4 + $0x50] ss:$8 sps:$4 sm:$0xff] (!%p464_p2)   ;;  %v1825_v13 = vld [vmem:[%s2395_s4 + $0x64] ss:$8 sps:$4 sm:$0xff] (!%p464_p2)  }
   0xa   : > { %v1827_v14 = vld [vmem:[%s2395_s4 + $0x60] ss:$8 sps:$4 sm:$0xff] (!%p464_p2)   ;;  %v1828_v15 = vld [vmem:[%s2395_s4 + $0x74] ss:$8 sps:$4 sm:$0xff] (!%p464_p2)   ;;  %v1830_v16 = vld [vmem:[%s2395_s4 + $0x70] ss:$8 sps:$4 sm:$0xff] (!%p464_p2)  }
   0xb   : > { %v1832_v20 = vld [vmem:[%s2397_s6] sm:$0xff] (!%p464_p2)   ;;  %v1833_v21 = vld [vmem:[%s2397_s6 + $0x48] sm:$0xff] (!%p464_p2)   ;;  %v1835_v23 = vld [vmem:[%s2397_s6 + $0x50] sm:$0xff] (!%p464_p2)  }
   0xc   : > { %655 = vmatpush1.bf16.msra.mxu0 (!%p464_p2), %v1812_v4  ;;  %1754 = vmatpush3.bf16.msra.mxu1 (!%p464_p2), %v1832_v20  ;;  %v1834_v22 = vld [vmem:[%s2397_s6 + $0x8] sm:$0xff] (!%p464_p2)   ;;  %v1836_v24 = vld [vmem:[%s2397_s6 + $0x10] sm:$0xff] (!%p464_p2)   ;;  %v1837_v25 = vld [vmem:[%s2397_s6 + $0x58] sm:$0xff] (!%p464_p2)  }
   0xd   : > { %s2408_s19 = smov (!%p521_p3, %s1639_s19), 1  ;;  %656 = vmatprep.subr.bf16.mxu0 %v1813_v5  ;;  %1755 = vmatprep.subr.bf16.mxu1 %v1833_v21  ;;  %v1838_v26 = vld [vmem:[%s2397_s6 + $0x18] sm:$0xff]   ;;  %v1839_v27 = vld [vmem:[%s2397_s6 + $0x60] sm:$0xff]   ;;  %v1841_v29 = vld [vmem:[%s2397_s6 + $0x68] sm:$0xff]   ;;  %v562_v5 = vlaneseq }
   0xe   : > { %s2074_s23 = sshll.u32 %s2408_s19, 3  ;;  %v1840_v28 = vld [vmem:[%s2397_s6 + $0x20] sm:$0xff]   ;;  %v1842_v30 = vld [vmem:[%s2397_s6 + $0x28] sm:$0xff]   ;;  %v1843_v31 = vld [vmem:[%s2397_s6 + $0x70] sm:$0xff]  }
   0xf   : > { %s524_s27 = scalar_lea.vmem %s2391_s0, %s2074_s23  ;;  %v1844_v32 = vld [vmem:[%s2397_s6 + $0x30] sm:$0xff]   ;;  %v1845_v33 = vld [vmem:[%s2397_s6 + $0x78] sm:$0xff]   ;;  %v1847_v35 = vld [vmem:[%s2400_s9] ss:$8 sps:$4 sm:$0xff]   ;;  %s528_s19 = scalar_lea.vmem %s2392_s1, %s2074_s23 }
  0x10   : > { %657 = vmatpush1.bf16.msra.mxu0 %v1815_v6  ;;  %v542_v17 = vld [vmem:[%s524_s27] sm:$0xff]  ;;  %1756 = vmatpush3.bf16.msra.mxu1 %v1834_v22  ;;  %v1846_v34 = vld [vmem:[%s2397_s6 + $0x38] sm:$0xff]   ;;  %v563_v6 = vshrl.u32 %v562_v5, 7  ;;  %s532_s21 = scalar_lea.vmem %s2393_s2, %s2074_s23  ;;  %s536_s25 = scalar_lea.vmem %s2394_s3, %s2074_s23 }
  0x11   : > { %658 = vmatprep.subr.bf16.mxu0 %v1816_v7  ;;  %v543_v18 = vpack.c.bf16 %v542_v17, %v542_v17  ;;  %1757 = vmatprep.subr.bf16.mxu1 %v1835_v23  ;;  %v1849_v36 = vld [vmem:[%s2400_s9 + $0x4] ss:$8 sps:$4 sm:$0xff]   ;;  %v1852_v37 = vld [vmem:[%s2400_s9 + $0x14] ss:$8 sps:$4 sm:$0xff]   ;;  %v1850_v38 = vld [vmem:[%s2400_s9 + $0x10] ss:$8 sps:$4 sm:$0xff]   ;;  %s540_s29 = scalar_lea.vmem %s2406_s15, %s2074_s23 }
  0x12   : > { %v1855_v39 = vld [vmem:[%s2400_s9 + $0x24] ss:$8 sps:$4 sm:$0xff]   ;;  %v1853_v41 = vld [vmem:[%s2400_s9 + $0x20] ss:$8 sps:$4 sm:$0xff]   ;;  %v1858_v42 = vld [vmem:[%s2400_s9 + $0x34] ss:$8 sps:$4 sm:$0xff]  }
  0x13   : > { %v1876_v40 = vld [vmem:[%s2399_s8 + $0x4] ss:$8 sps:$4 sm:$0xff]   ;;  %v1856_v43 = vld [vmem:[%s2400_s9 + $0x30] ss:$8 sps:$4 sm:$0xff]   ;;  %v1859_v45 = vld [vmem:[%s2400_s9 + $0x40] ss:$8 sps:$4 sm:$0xff]  }
  0x14   : > { %659 = vmatpush1.bf16.msra.mxu0 %v1818_v8  ;;  %1758 = vmatpush3.bf16.msra.mxu1 %v1836_v24  ;;  %v1861_v44 = vld [vmem:[%s2400_s9 + $0x44] ss:$8 sps:$4 sm:$0xff]   ;;  %v1864_v46 = vld [vmem:[%s2400_s9 + $0x54] ss:$8 sps:$4 sm:$0xff]   ;;  %v1862_v47 = vld [vmem:[%s2400_s9 + $0x50] ss:$8 sps:$4 sm:$0xff]  }
  0x15   : > { %660 = vmatprep.subr.bf16.mxu0 %v1819_v9  ;;  %1759 = vmatprep.subr.bf16.mxu1 %v1837_v25  ;;  %v1867_v48 = vld [vmem:[%s2400_s9 + $0x64] ss:$8 sps:$4 sm:$0xff]   ;;  %v1865_v49 = vld [vmem:[%s2400_s9 + $0x60] ss:$8 sps:$4 sm:$0xff]   ;;  %v1870_v50 = vld [vmem:[%s2400_s9 + $0x74] ss:$8 sps:$4 sm:$0xff]  }
  0x16   : > { %v1868_v51 = vld [vmem:[%s2400_s9 + $0x70] ss:$8 sps:$4 sm:$0xff]   ;;  %v911_v52 = vld [vmem:[%s528_s19] sm:$0xff]  ;;  %v1879_v56 = vld [vmem:[%s2401_s10 + $0x14] ss:$8 sps:$4 sm:$0xff]   ;;  %v2251_v7 = vsub.s32 0, %v563_v6 }
  0x17   : > { %v1873_v53 = vld [vmem:[%s2401_s10 + $0x4] ss:$8 sps:$4 sm:$0xff]   ;;  %v912_v54 = vpack.c.bf16 %v911_v52, %v911_v52  ;;  %v1871_v55 = vld [vmem:[%s2401_s10] ss:$8 sps:$4 sm:$0xff]   ;;  %v1877_v57 = vld [vmem:[%s2401_s10 + $0x10] ss:$8 sps:$4 sm:$0xff]  }
  0x18   : > { %661 = vmatpush1.bf16.msra.mxu0 %v1821_v10  ;;  %1760 = vmatpush3.bf16.msra.mxu1 %v1838_v26  ;;  %v1885_v58 = vld [vmem:[%s2401_s10 + $0x24] ss:$8 sps:$4 sm:$0xff]   ;;  %v1883_v59 = vld [vmem:[%s2401_s10 + $0x20] ss:$8 sps:$4 sm:$0xff]   ;;  %v1891_v60 = vld [vmem:[%s2401_s10 + $0x34] ss:$8 sps:$4 sm:$0xff]  }
  0x19   : > { %662 = vmatprep.subr.bf16.mxu0 %v1822_v11  ;;  %1761 = vmatprep.subr.bf16.mxu1 %v1839_v27  ;;  %v1889_v61 = vld [vmem:[%s2401_s10 + $0x30] ss:$8 sps:$4 sm:$0xff]   ;;  %v1897_v62 = vld [vmem:[%s2401_s10 + $0x44] ss:$8 sps:$4 sm:$0xff]   ;;  %v1895_v63 = vld [vmem:[%s2401_s10 + $0x40] ss:$8 sps:$4 sm:$0xff]  }
  0x1a   : > { %v1903_v0 = vld [vmem:[%s2401_s10 + $0x54] ss:$8 sps:$4 sm:$0xff]   ;;  %v1901_v1 = vld [vmem:[%s2401_s10 + $0x50] ss:$8 sps:$4 sm:$0xff]   ;;  %v1909_v3 = vld [vmem:[%s2401_s10 + $0x64] ss:$8 sps:$4 sm:$0xff]  }
  0x1b   : > { %v1907_v4 = vld [vmem:[%s2401_s10 + $0x60] ss:$8 sps:$4 sm:$0xff]   ;;  %v2256_v9 = vsub.s32 1, %v563_v6  ;;  %v1912_v52 = vld [vmem:[%s2399_s8 + $0x64] ss:$8 sps:$4 sm:$0xff]  }
  0x1c   : > { %663 = vmatpush1.bf16.msra.mxu0 %v1824_v12  ;;  %1762 = vmatpush3.bf16.msra.mxu1 %v1840_v28  ;;  %v560_v8 = vld [vmem:[%s2396_s5] sm:$0x3] }
  0x1d   : > { %664 = vmatprep.subr.bf16.mxu0 %v1825_v13  ;;  %1763 = vmatprep.subr.bf16.mxu1 %v1841_v29  ;;  %v565_v10 = vrot.slane %v560_v8, %v2251_v7  ;;  %v569_v11 = vrot.slane %v560_v8, %v2256_v9 }
  0x20   : > { %665 = vmatpush1.bf16.msra.mxu0 %v1827_v14  ;;  %1764 = vmatpush3.bf16.msra.mxu1 %v1842_v30 }
  0x21   : > { %666 = vmatprep.subr.bf16.mxu0 %v1828_v15  ;;  %1765 = vmatprep.subr.bf16.mxu1 %v1843_v31 }
  0x24   : > { %667 = vmatpush1.bf16.msra.mxu0 %v1830_v16  ;;  %1766 = vmatpush3.bf16.msra.mxu1 %v1844_v32 }
  0x25   : > { %1767 = vmatprep.subr.bf16.mxu1 %v1845_v33  ;;  %1009 = vmatprep.subr.bf16.mxu0 %v1849_v36 }
  0x27   : > { %685 = vmatmul.mubr.bf16.vlgmr.msra.gmra.mrb[0].mxu0 %v543_v18 }
  0x28   : > { %1041 = vmatprep.mubr.bf16.mxu0 %v1959_v2  ;;  %1768 = vmatpush3.bf16.msra.mxu1 %v1846_v34 }
  0x29   : > { %1010 = vmatpush1.bf16.msra.mxu0 %v1847_v35  ;;  %1130 = vmatprep.subr.bf16.mxu1 %v1876_v40 }
  0x2a   : > { %1011 = vmatprep.subr.bf16.mxu0 %v1852_v37 }
  0x2d   : > { %1012 = vmatpush1.bf16.msra.mxu0 %v1850_v38 }
  0x2e   : > { %1013 = vmatprep.subr.bf16.mxu0 %v1855_v39 }
  0x31   : > { %1014 = vmatpush1.bf16.msra.mxu0 %v1853_v41  ;;  %v1874_v41 = vld [vmem:[%s2399_s8] ss:$8 sps:$4 sm:$0xff]  }
  0x32   : > { %1015 = vmatprep.subr.bf16.mxu0 %v1858_v42 }
  0x35   : > { %1016 = vmatpush1.bf16.msra.mxu0 %v1856_v43  ;;  %v1882_v43 = vld [vmem:[%s2399_s8 + $0x14] ss:$8 sps:$4 sm:$0xff]  }
  0x36   : > { %1017 = vmatprep.subr.bf16.mxu0 %v1861_v44  ;;  %v1880_v44 = vld [vmem:[%s2399_s8 + $0x10] ss:$8 sps:$4 sm:$0xff]  }
  0x39   : > { %1018 = vmatpush1.bf16.msra.mxu0 %v1859_v45  ;;  %v1888_v45 = vld [vmem:[%s2399_s8 + $0x24] ss:$8 sps:$4 sm:$0xff]  }
  0x3a   : > { %1019 = vmatprep.subr.bf16.mxu0 %v1864_v46  ;;  %v1886_v46 = vld [vmem:[%s2399_s8 + $0x20] ss:$8 sps:$4 sm:$0xff]  }
  0x3d   : > { %1020 = vmatpush1.bf16.msra.mxu0 %v1862_v47  ;;  %v1894_v47 = vld [vmem:[%s2399_s8 + $0x34] ss:$8 sps:$4 sm:$0xff]  }
  0x3e   : > { %1021 = vmatprep.subr.bf16.mxu0 %v1867_v48  ;;  %v1900_v48 = vld [vmem:[%s2399_s8 + $0x44] ss:$8 sps:$4 sm:$0xff]  }
  0x41   : > { %1022 = vmatpush1.bf16.msra.mxu0 %v1865_v49  ;;  %v1898_v49 = vld [vmem:[%s2399_s8 + $0x40] ss:$8 sps:$4 sm:$0xff]  }
  0x42   : > { %1023 = vmatprep.subr.bf16.mxu0 %v1870_v50  ;;  %v1906_v50 = vld [vmem:[%s2399_s8 + $0x54] ss:$8 sps:$4 sm:$0xff]  }
  0x45   : > { %1024 = vmatpush1.bf16.msra.mxu0 %v1868_v51  ;;  %v1904_v51 = vld [vmem:[%s2399_s8 + $0x50] ss:$8 sps:$4 sm:$0xff]  }
  0x46   : > { %1269 = vmatprep.subr.bf16.mxu0 %v1873_v53  ;;  %v1910_v53 = vld [vmem:[%s2399_s8 + $0x60] ss:$8 sps:$4 sm:$0xff]  }
  0x48   : > { %1042 = vmatmul.mubr.bf16.vlgmr.msra.gmra.mrb[4].mxu0 %v912_v54  ;;  %v1915_v54 = vld [vmem:[%s2401_s10 + $0x74] ss:$8 sps:$4 sm:$0xff]  }
  0x49   : > { %1270 = vmatpush1.bf16.msra.mxu0 %v1871_v55  ;;  %1301 = vmatprep.mubr.bf16.mxu0 %v1959_v2  ;;  %v1913_v55 = vld [vmem:[%s2401_s10 + $0x70] ss:$8 sps:$4 sm:$0xff]  }
  0x4a   : > { %1271 = vmatprep.subr.bf16.mxu0 %v1879_v56  ;;  %v1918_v56 = vld [vmem:[%s2399_s8 + $0x74] ss:$8 sps:$4 sm:$0xff]  }
  0x4d   : > { %1272 = vmatpush1.bf16.msra.mxu0 %v1877_v57  ;;  %v1916_v57 = vld [vmem:[%s2399_s8 + $0x70] ss:$8 sps:$4 sm:$0xff]  }
  0x4e   : > { %1273 = vmatprep.subr.bf16.mxu0 %v1885_v58  ;;  %v1171_v58 = vld [vmem:[%s532_s21] sm:$0xff] }
  0x51   : > { %1274 = vmatpush1.bf16.msra.mxu0 %v1883_v59  ;;  %v1172_v59 = vpack.c.bf16 %v1171_v58, %v1171_v58 }
  0x52   : > { %1275 = vmatprep.subr.bf16.mxu0 %v1891_v60  ;;  %v1312_v60 = vld [vmem:[%s536_s25] sm:$0xff] }
  0x53   : > { %1316 = vperm.xlu0 %1806, %v1312_v60  }
  0x55   : > { %1276 = vmatpush1.bf16.msra.mxu0 %v1889_v61 }
  0x56   : > { %1277 = vmatprep.subr.bf16.mxu0 %v1897_v62 }
  0x59   : > { %1278 = vmatpush1.bf16.msra.mxu0 %v1895_v63 }
  0x5a   : > { %1279 = vmatprep.subr.bf16.mxu0 %v1903_v0 }
  0x5d   : > { %1280 = vmatpush1.bf16.msra.mxu0 %v1901_v1 }
  0x5e   : > { %1281 = vmatprep.subr.bf16.mxu0 %v1909_v3  ;;  %v1667_v3 = vld [vmem:[%s2398_s7] ss:$0 sm:$0xff] }
  0x61   : > { %1282 = vmatpush1.bf16.msra.mxu0 %v1907_v4 }
  0x62   : > { %1283 = vmatprep.subr.bf16.mxu0 %v1915_v54 }
  0x65   : > { %1284 = vmatpush1.bf16.msra.mxu0 %v1913_v55 }
  0x68   : > { %1302 = vmatmul.mubr.bf16.vlgmr.msra.gmra.mrb[8].mxu0 %v1172_v59 }
  0xfa   : > { %v686_v12 = vpop.f32.mrb[0].mxu0 }
  0xfb   : > { %v687_v13 = vadd.f32 %v686_v12, %v565_v10  ;;  %v688_v14 = vpop.f32.mrb[1].mxu0 }
  0xfc   : > { %v689_v15 = vadd.f32 %v688_v14, %v569_v11  ;;  %v690_v16 = vpop.f32.mrb[2].mxu0 }
  0xfd   : > { %v693_v17 = vmin.f32 %v687_v13, 20.0  ;;  %v691_v18 = vpop.f32.mrb[3].mxu0  ;;  %vm711_vm0 = vcmp.gt.f32.partialorder %v687_v13, 20.0  ;;  %v1919_v16 = vld [vmem:[%s2404_s13 + $0x40] sm:$0xff]  }
  0xfe   : > { %v694_v19 = vmin.f32 %v689_v15, 20.0  ;;  %vm712_vm1 = vcmp.gt.f32.partialorder %v689_v15, 20.0  ;;  %v1921_v18 = vld [vmem:[%s2404_s13 + $0x48] sm:$0xff]  }
  0xff   : > { %v695_v20 = vmul.f32 1.442695, %v693_v17  ;;  %v1920_v17 = vld [vmem:[%s2404_s13] sm:$0xff]  }
 0x100   : > { %v697_v21 = vmul.f32 1.442695, %v694_v19  ;;  %v1922_v19 = vld [vmem:[%s2404_s13 + $0x8] sm:$0xff]  }
 0x101   : > { %1935 = vpow2.f32 %v695_v20  ;;  %v1923_v20 = vld [vmem:[%s2404_s13 + $0x50] sm:$0xff]  }
 0x102   : > { %1937 = vpow2.f32 %v697_v21  ;;  %v1924_v21 = vld [vmem:[%s2404_s13 + $0x10] sm:$0xff]  }
 0x10b   : > { %v1936_v22 = vpop.eup %1935 }
 0x10c   : > { %v1938_v23 = vpop.eup %1937  ;;  %v699_v24 = vadd.f32 1.0, %v1936_v22  ;;  %v1925_v22 = vld [vmem:[%s2404_s13 + $0x58] sm:$0xff]  }
 0x10d   : > { %v700_v25 = vadd.f32 1.0, %v1938_v23  ;;  %v1926_v23 = vld [vmem:[%s2404_s13 + $0x18] sm:$0xff]  }
 0x10e   : > { %v701_v26 = vmul.f32 %v699_v24, %v699_v24  ;;  %v1927_v24 = vld [vmem:[%s2404_s13 + $0x60] sm:$0xff]  }
 0x10f   : > { %v702_v27 = vmul.f32 %v700_v25, %v700_v25  ;;  %v1928_v25 = vld [vmem:[%s2404_s13 + $0x20] sm:$0xff]  }
 0x110   : > { %v705_v28 = vadd.f32 1.0, %v701_v26  ;;  %v1665_v30 = vadd.f32 -1.0, %v701_v26  ;;  %v1929_v26 = vld [vmem:[%s2404_s13 + $0x68] sm:$0xff]  }
 0x111   : > { %v706_v29 = vadd.f32 1.0, %v702_v27  ;;  %v1666_v32 = vadd.f32 -1.0, %v702_v27  ;;  %v1930_v27 = vld [vmem:[%s2404_s13 + $0x28] sm:$0xff]  }
 0x112   : > { %1939 = vrcp.f32 %v705_v28  ;;  %v1931_v28 = vld [vmem:[%s2404_s13 + $0x70] sm:$0xff]  }
 0x113   : > { %1941 = vrcp.f32 %v706_v29  ;;  %v1932_v29 = vld [vmem:[%s2404_s13 + $0x30] sm:$0xff]  }
 0x11b   : > { %v1043_v61 = vpop.f32.mrb[4].mxu0 }
 0x11c   : > { %v1940_v31 = vpop.eup %1939  ;;  %v1045_v62 = vpop.f32.mrb[5].mxu0 }
 0x11d   : > { %v1942_v33 = vpop.eup %1941  ;;  %v709_v34 = vmul.f32 %v1940_v31, %v1665_v30  ;;  %v1047_v63 = vpop.f32.mrb[6].mxu0  ;;  %v1933_v30 = vld [vmem:[%s2404_s13 + $0x78] sm:$0xff]  }
 0x11e   : > { %v710_v35 = vmul.f32 %v1942_v33, %v1666_v32  ;;  %v1048_v0 = vpop.f32.mrb[7].mxu0  ;;  %v1934_v31 = vld [vmem:[%s2404_s13 + $0x38] sm:$0xff]   ;;  %v1313_v32 = vld [vmem:[%s2402_s11] sm:$0x3] }
 0x11f   : > { %v713_v36 = vmul.f32 %v709_v34, %v687_v13  ;;  %v1323_v33 = vrot.slane %v1313_v32, %v2251_v7  ;;  %v1327_v34 = vrot.slane %v1313_v32, %v2256_v9 }
 0x120   : > { %v714_v37 = vmul.f32 %v710_v35, %v689_v15  ;;  %v1317_v35 = vpop.permute.xlu0 %1316 }
 0x121   : > { %v715_v38 = vsel %vm711_vm0, %v687_v13, %v713_v36 }
 0x122   : > { %v716_v39 = vsel %vm712_vm1, %v689_v15, %v714_v37  ;;  %v717_v42 = vpack.c.bf16 %v715_v38, %v715_v38  ;;  %v1334_v37 = vld [vmem:[%s2403_s12] sm:$0x3] }
 0x123   : > { %v718_v40 = vpack.c.bf16 %v716_v39, %v716_v39 }
 0x125   : > { %886 = vmatprep.mubr.bf16.mxu1 %v718_v40  ;;  %v1330_v40 = vmul.f32 %v1323_v33, %v1317_v35 }
 0x126   : > { %887 = vmatmul.mubr.bf16.vlgmr.msra.gmra.mrb[0].mxu1 %v717_v42  ;;  %v1331_v42 = vmul.f32 %v1327_v34, %v1317_v35 }
 0x127   : > { %1131 = vmatpush1.bf16.msra.mxu1 %v1874_v41  ;;  %1162 = vmatprep.mubr.bf16.mxu1 %v1959_v2  ;;  %v1892_v2 = vld [vmem:[%s2399_s8 + $0x30] ss:$8 sps:$4 sm:$0xff]  }
 0x128   : > { %1132 = vmatprep.subr.bf16.mxu1 %v1882_v43 }
 0x12b   : > { %1133 = vmatpush1.bf16.msra.mxu1 %v1880_v44 }
 0x12c   : > { %1134 = vmatprep.subr.bf16.mxu1 %v1888_v45  ;;  %v1339_v45 = vrot.slane %v1334_v37, %v2251_v7 }
 0x12f   : > { %1135 = vmatpush1.bf16.msra.mxu1 %v1886_v46 }
 0x130   : > { %1136 = vmatprep.subr.bf16.mxu1 %v1894_v47 }
 0x133   : > { %1137 = vmatpush1.bf16.msra.mxu1 %v1892_v2  ;;  %v1343_v2 = vrot.slane %v1334_v37, %v2256_v9 }
 0x134   : > { %1138 = vmatprep.subr.bf16.mxu1 %v1900_v48 }
 0x137   : > { %1139 = vmatpush1.bf16.msra.mxu1 %v1898_v49 }
 0x138   : > { %1140 = vmatprep.subr.bf16.mxu1 %v1906_v50 }
 0x13b   : > { %1141 = vmatpush1.bf16.msra.mxu1 %v1904_v51  ;;  %v1303_v12 = vpop.f32.mrb[8].mxu0 }
 0x13c   : > { %1142 = vmatprep.subr.bf16.mxu1 %v1912_v52  ;;  %v1305_v13 = vpop.f32.mrb[9].mxu0 }
 0x13d   : > { %v1307_v14 = vpop.f32.mrb[10].mxu0 }
 0x13e   : > { %v1308_v15 = vpop.f32.mrb[11].mxu0  ;;  %v1734_v14 = vld [vmem:[%s2405_s14] ss:$0 sm:$0xff] }
 0x13f   : > { %1143 = vmatpush1.bf16.msra.mxu1 %v1910_v53 }
 0x140   : > { %1144 = vmatprep.subr.bf16.mxu1 %v1918_v56 }
 0x143   : > { %1145 = vmatpush1.bf16.msra.mxu1 %v1916_v57 }
 0x144   : > { %1775 = vmatprep.subr.bf16.mxu1 %v1919_v16 }
 0x1f9   : > { %v1769_v1 = vpop.f32.mrb[0].mxu1 }
 0x1fa   : > { %v1770_v4 = vpop.f32.mrb[1].mxu1 }
 0x1fb   : > { %v1771_v5 = vadd.f32 %v1770_v4, %v1769_v1  ;;  %v1772_v6 = vpop.f32.mrb[2].mxu1 }
 0x1fc   : > { %v1773_v8 = vpop.f32.mrb[3].mxu1 }
 0x1fd   : > { %v889_v10 = vadd.f32 %v1771_v5, %v1667_v3 }
 0x1ff   : > { %v894_v11 = vpack.c.bf16 %v889_v10, %v889_v10 }
 0x201   : > { %1163 = vmatmul.mubr.bf16.vlgmr.msra.gmra.mrb[4].mxu1 %v894_v11 }
 0x202   : > { %1776 = vmatpush3.bf16.msra.mxu1 %v1920_v17 }
 0x203   : > { %1777 = vmatprep.subr.bf16.mxu1 %v1921_v18 }
 0x206   : > { %1778 = vmatpush3.bf16.msra.mxu1 %v1922_v19 }
 0x207   : > { %1779 = vmatprep.subr.bf16.mxu1 %v1923_v20 }
 0x20a   : > { %1780 = vmatpush3.bf16.msra.mxu1 %v1924_v21 }
 0x20b   : > { %1781 = vmatprep.subr.bf16.mxu1 %v1925_v22 }
 0x20e   : > { %1782 = vmatpush3.bf16.msra.mxu1 %v1926_v23 }
 0x20f   : > { %1783 = vmatprep.subr.bf16.mxu1 %v1927_v24 }
 0x212   : > { %1784 = vmatpush3.bf16.msra.mxu1 %v1928_v25 }
 0x213   : > { %1785 = vmatprep.subr.bf16.mxu1 %v1929_v26 }
 0x216   : > { %1786 = vmatpush3.bf16.msra.mxu1 %v1930_v27 }
 0x217   : > { %1787 = vmatprep.subr.bf16.mxu1 %v1931_v28 }
 0x21a   : > { %1788 = vmatpush3.bf16.msra.mxu1 %v1932_v29 }
 0x21b   : > { %1789 = vmatprep.subr.bf16.mxu1 %v1933_v30 }
 0x21e   : > { %1790 = vmatpush3.bf16.msra.mxu1 %v1934_v31 }
 0x2d4   : > { %v1164_v36 = vpop.f32.mrb[4].mxu1 }
 0x2d5   : > { %v1165_v38 = vadd.f32 %v1164_v36, %v1043_v61  ;;  %v1166_v39 = vpop.f32.mrb[5].mxu1 }
 0x2d6   : > { %v1167_v41 = vadd.f32 %v1166_v39, %v1045_v62  ;;  %v1168_v43 = vpop.f32.mrb[6].mxu1 }
 0x2d7   : > { %v1310_v44 = vadd.f32 %v1303_v12, %v1165_v38  ;;  %v1169_v46 = vpop.f32.mrb[7].mxu1 }
 0x2d8   : > { %v1311_v47 = vadd.f32 %v1305_v13, %v1167_v41 }
 0x2d9   : > { %v1332_v48 = vadd.f32 %v1330_v40, %v1310_v44 }
 0x2da   : > { %v1333_v49 = vadd.f32 %v1331_v42, %v1311_v47 }
 0x2db   : > { %v1346_v50 = vadd.f32 %v1339_v45, %v1332_v48 }
 0x2dc   : > { %v1347_v51 = vadd.f32 %v1343_v2, %v1333_v49 }
 0x2dd   : > { %v1348_v52 = vmin.f32 %v1346_v50, 20.0  ;;  %vm1366_vm2 = vcmp.gt.f32.partialorder %v1346_v50, 20.0 }
 0x2de   : > { %v1349_v53 = vmin.f32 %v1347_v51, 20.0  ;;  %vm1367_vm3 = vcmp.gt.f32.partialorder %v1347_v51, 20.0 }
 0x2df   : > { %v1350_v54 = vmul.f32 1.442695, %v1348_v52 }
 0x2e0   : > { %v1352_v55 = vmul.f32 1.442695, %v1349_v53 }
 0x2e1   : > { %1943 = vpow2.f32 %v1350_v54 }
 0x2e2   : > { %1945 = vpow2.f32 %v1352_v55 }
 0x2eb   : > { %v1944_v56 = vpop.eup %1943 }
 0x2ec   : > { %v1946_v57 = vpop.eup %1945  ;;  %v1354_v58 = vadd.f32 1.0, %v1944_v56 }
 0x2ed   : > { %v1355_v59 = vadd.f32 1.0, %v1946_v57 }
 0x2ee   : > { %v1356_v60 = vmul.f32 %v1354_v58, %v1354_v58 }
 0x2ef   : > { %v1357_v7 = vmul.f32 %v1355_v59, %v1355_v59 }
 0x2f0   : > { %v1360_v61 = vadd.f32 1.0, %v1356_v60  ;;  %v1732_v9 = vadd.f32 -1.0, %v1356_v60 }
 0x2f1   : > { %v1361_v62 = vadd.f32 1.0, %v1357_v7  ;;  %v1733_v0 = vadd.f32 -1.0, %v1357_v7 }
 0x2f2   : > { %1947 = vrcp.f32 %v1360_v61 }
 0x2f3   : > { %1949 = vrcp.f32 %v1361_v62 }
 0x2fc   : > { %v1948_v63 = vpop.eup %1947 }
 0x2fd   : > { %v1950_v1 = vpop.eup %1949  ;;  %v1364_v3 = vmul.f32 %v1948_v63, %v1732_v9 }
 0x2fe   : > { %v1365_v4 = vmul.f32 %v1950_v1, %v1733_v0 }
 0x2ff   : > { %v1368_v5 = vmul.f32 %v1364_v3, %v1346_v50 }
 0x300   : > { %v1369_v6 = vmul.f32 %v1365_v4, %v1347_v51 }
 0x301   : > { %v1370_v8 = vsel %vm1366_vm2, %v1346_v50, %v1368_v5 }
 0x302   : > { %v1371_v10 = vsel %vm1367_vm3, %v1347_v51, %v1369_v6  ;;  %v1372_v12 = vpack.c.bf16 %v1370_v8, %v1370_v8 }
 0x303   : > { %v1373_v11 = vpack.c.bf16 %v1371_v10, %v1371_v10 }
 0x305   : > { %1541 = vmatprep.mubr.bf16.mxu1 %v1373_v11 }
 0x306   : > { %1542 = vmatmul.mubr.bf16.vlgmr.msra.gmra.mrb[8].mxu1 %v1372_v12 }
 0x3d9   : > { %v1791_v13 = vpop.f32.mrb[8].mxu1 }
 0x3da   : > { %v1792_v15 = vpop.f32.mrb[9].mxu1 }
 0x3db   : > { %v1793_v16 = vadd.f32 %v1792_v15, %v1791_v13  ;;  %v1794_v17 = vpop.f32.mrb[10].mxu1 }
 0x3dc   : > { %v1795_v18 = vpop.f32.mrb[11].mxu1 }
 0x3dd   : > { %v1544_v19 = vadd.f32 %v1793_v16, %v1734_v14 }
 0x3df   : > { %1549 = vst [vmem:[%s540_s29] sm:$0xff] %v1544_v19 }
 0x3e0 PF: > { %s25_s18 = sadd.s32 1, %s1957_s18  }
 0x3e1   : > { %p22_p4 = scmp.ge.s32.totalorder %s25_s18, 4  }
 0x3e3   :  { %24 = sbr.rel (!%p22_p4) target bundleno = 1 (0x1), region = 119 }

// kernel: flow_model_forward.9
= control target key start
LH: loop header
LB: loop body
LE: loop exit
PB: predicated region body
PF: predicated region fallthrough
CT: control target
= control target key end

     0   :  { %vm3419_vm0 = vcmask 162816   ;;  %v48_v0 = vlaneseq  ;;  %v2254_v3 = vmov 0   ;;  %v2255_v4 = vmov 1966171168   ;;  %s3404_s4 = inlined_call_operand.vmem [shape: f32[2,8,20], index: 4, kind: input, shape index: {}]   ;;  %s3405_s12 = inlined_call_operand.vmem [shape: f32[2,8], index: 12, kind: input, shape index: {}]   ;;  %s3406_s13 = inlined_call_operand.vmem [shape: f32[2,1], index: 13, kind: input, shape index: {}]   ;;  %s3407_s3 = inlined_call_operand.vmem [shape: f32[2,8,5], index: 3, kind: input, shape index: {}]   ;;  %s3408_s8 = inlined_call_operand.vmem [shape: f32[2,8,5], index: 8, kind: input, shape index: {}]   ;;  %s3409_s9 = inlined_call_operand.vmem [shape: f32[2,8,5], index: 9, kind: input, shape index: {}]   ;;  %s3410_s10 = inlined_call_operand.vmem [shape: s32[2,8], index: 10, kind: input, shape index: {}]   ;;  %s3411_s1 = inlined_call_operand.vmem [shape: f32[2,8,3], index: 1, kind: input, shape index: {}]   ;;  %s3412_s6 = inlined_call_operand.vmem [shape: f32[2,8,3], index: 6, kind: input, shape index: {}]   ;;  %s3413_s2 = inlined_call_operand.vmem [shape: f32[2,8,9], index: 2, kind: input, shape index: {}]   ;;  %s3414_s7 = inlined_call_operand.vmem [shape: f32[2,8,9], index: 7, kind: input, shape index: {}]   ;;  %s3415_s11 = inlined_call_operand.vmem [shape: f32[2,8,5], index: 11, kind: input, shape index: {}]   ;;  %s3416_s0 = inlined_call_operand.vmem [shape: f32[2,8,3], index: 0, kind: input, shape index: {}]   ;;  %s3417_s5 = inlined_call_operand.vmem [shape: f32[2,8,3], index: 5, kind: input, shape index: {}]   ;;  %s3418_s14 = inlined_call_operand.vmem [shape: f32[2,8], index: 14, kind: output, shape index: {}]  }
   0x1   :  { %v211_v1 = vld [vmem:[%s3404_s4] sm:$0xff]  ;;  %v212_v2 = vld [vmem:[%s3404_s4 + $0x8] sm:$0xff]  ;;  %2202 = vset.pattern.permute.xlu1 %v2254_v3  ;;  %v78_v5 = vunpack.c.l.s4 %v2255_v4  ;;  %2201 = vset.pattern.permute.xlu0 %v2254_v3 }
   0x2   :  { %v214_v6 = vsel %vm3419_vm0, %v211_v1, -inf  ;;  %v2345_v7 = vshrl.u32 %v48_v0, 7  ;;  %v47_v8 = vld [vmem:[%s3405_s12] sm:$0x3]  ;;  %v217_v11 = vsel %vm3419_vm0, %v212_v2, -inf  ;;  %v2359_v15 = vld [vmem:[%s3408_s8 + $0x8] sm:$0xff] }
   0x3   :  { %215 = vmax.xlane.f32.xlu0 %v214_v6  ;;  %v2092_v9 = vld.sshfl [vmem:[%s3406_s13] sm:$0x11 pattern:$0x75316420]  ;;  %v79_v10 = vunpack.c.0.s8 %v78_v5  ;;  %v288_v16 = vld [vmem:[%s3409_s9 + $0x8] sm:$0xff] }
   0x4   :  { %v50_v12 = vsub.s32 0, %v2345_v7  ;;  %v57_v13 = vsub.s32 1, %v2345_v7  ;;  %v76_v14 = vcombine.high %v2092_v9, %v2092_v9  ;;  %v2367_v17 = vld [vmem:[%s3407_s3 + $0x8] sm:$0xff]  ;;  %v285_v20 = vld [vmem:[%s3408_s8] sm:$0xff]  ;;  %v320_v22 = vsub.f32 %v2359_v15, %v288_v16 }
   0x5   :  { %v82_v18 = vsub.s32 %v79_v10, %v2345_v7  ;;  %v287_v21 = vld [vmem:[%s3409_s9] sm:$0xff]  ;;  %v335_v23 = vsub.f32 %v2367_v17, %v288_v16  ;;  %v1322_v10 = vand.u32 2139095040, %v2367_v17 }
   0x6   :  { %v51_v19 = vrot.slane %v47_v8, %v50_v12  ;;  %v58_v24 = vrot.slane %v47_v8, %v57_v13  ;;  %v319_v26 = vsub.f32 %v285_v20, %v287_v21  ;;  %v322_v27 = vadd.f32 3.1415927, %v320_v22  ;;  %v289_v32 = vld [vmem:[%s3407_s3] sm:$0xff] }
   0x7   :  { %218 = vmax.xlane.f32.xlu0 %v217_v11  ;;  %v90_v25 = vrot.slane %v76_v14, %v82_v18  ;;  %v337_v28 = vadd.f32 3.1415927, %v335_v23  ;;  %v238_v35 = vld [vmem:[%s3410_s10] sm:$0x3]  ;;  %v334_v39 = vsub.f32 %v289_v32, %v287_v21  ;;  %v83_v51 = vrot.slane %v2092_v9, %v82_v18 }
   0x8   :  { %53 = vbcast.lane.b32.xlu1 %v51_v19, 256  ;;  %v321_v29 = vadd.f32 3.1415927, %v319_v26  ;;  %v325_v30 = vmul.f32 0.15915494, %v322_v27  ;;  %v242_v42 = vrot.slane %v238_v35, %v50_v12  ;;  %v249_v50 = vrot.slane %v238_v35, %v57_v13 }
   0x9   :  { %v339_v31 = vmul.f32 0.15915494, %v337_v28  ;;  %v141_v33 = vrot.slane %v90_v25, %v50_v12  ;;  %v2384_v47 = vadd.f32 3.1415927, %v334_v39  ;;  %v137_v62 = vrot.slane %v83_v51, %v50_v12 }
   0xa   :  { %v324_v34 = vmul.f32 0.15915494, %v321_v29  ;;  %v327_v36 = vfloor.f32 %v325_v30  ;;  %v1530_v14 = vand.u32 2139095040, %v2359_v15  ;;  %v2256_v26 = vmov 683565275  }
   0xb   :  { %v341_v37 = vfloor.f32 %v339_v31  ;;  %v338_v57 = vmul.f32 0.15915494, %v2384_v47  ;;  %v2258_v30 = vmov 2131351028   ;;  %v2259_v32 = vmov 2102212464  }
   0xc   :  { %60 = vbcast.lane.b32.xlu1 %v58_v24, 256  ;;  %v326_v38 = vfloor.f32 %v324_v34  ;;  %v329_v40 = vmul.f32 6.2831855, %v327_v36  ;;  %v2260_v34 = vmov 920167782  }
   0xd   :  { %v343_v41 = vmul.f32 6.2831855, %v341_v37  ;;  %v340_v3 = vfloor.f32 %v338_v57 }
   0xe   :  { %v328_v43 = vmul.f32 6.2831855, %v326_v38  ;;  %v331_v44 = vsub.f32 %v322_v27, %v329_v40 }
   0xf   :  { %v345_v45 = vsub.f32 %v337_v28, %v343_v41  ;;  %v2404_v12 = vmul.f32 6.2831855, %v340_v3  ;;  %v2257_v28 = vmov 2475754826  }
  0x10   :  { %147 = vperm.xlu1 %2202, %v141_v33   ;;  %v330_v46 = vsub.f32 %v321_v29, %v328_v43  ;;  %v2386_v48 = vadd.f32 -3.1415927, %v331_v44 }
  0x11   :  { %v2388_v49 = vadd.f32 -3.1415927, %v345_v45 }
  0x12   :  { %v452_v52 = vand.u32 2147483647, %v2386_v48  ;;  %v455_v53 = vand.u32 2139095040, %v2386_v48  ;;  %v2392_v54 = vadd.f32 -3.1415927, %v330_v46 }
  0x13   :  { %v660_v55 = vand.u32 2147483647, %v2388_v49  ;;  %v663_v56 = vand.u32 2139095040, %v2388_v49 }
  0x14   :  { %244 = vbcast.lane.b32.xlu1 %v242_v42, 256  ;;  %v456_v58 = vshrl.u32 %v455_v53, 23  ;;  %v459_v59 = vand.u32 8388607, %v452_v52  ;;  %v351_v1 = vand.u32 2139095040, %v2392_v54 }
  0x15   :  { %v664_v60 = vshrl.u32 %v663_v56, 23  ;;  %v667_v61 = vand.u32 8388607, %v660_v55  ;;  %v348_v20 = vand.u32 2147483647, %v2392_v54 }
  0x16   :  { %v2101_v63 = vadd.s32 4294967169, %v456_v58  ;;  %v352_v5 = vshrl.u32 %v351_v1, 23  ;;  %v460_v6 = vor.u32 8388608, %v459_v59  ;;  %v2261_v42 = vmov 1326507024  }
  0x17   :  { %v2109_v2 = vadd.s32 4294967169, %v664_v60  ;;  %v668_v8 = vor.u32 8388608, %v667_v61 }
  0x18   :  { %251 = vbcast.lane.b32.xlu1 %v249_v50, 256  ;;  %v462_v4 = vadd.s32 1, %v2101_v63  ;;  %v2097_v11 = vadd.s32 4294967169, %v352_v5  ;;  %v2407_v21 = vshll.u32 %v460_v6, 8 }
  0x19   :  { %v670_v9 = vadd.s32 1, %v2109_v2  ;;  %v2409_v23 = vshll.u32 %v668_v8, 8 }
  0x1a   :  { %vm463_vm1 = vcmp.gt.s32.totalorder %v462_v4, 0  ;;  %v2411_v24 = vadd.s32 1, %v2097_v11 }
  0x1b   :  { %v464_v13 = vsel %vm463_vm1, %v462_v4, 0  ;;  %vm671_vm2 = vcmp.gt.s32.totalorder %v670_v9, 0 }
  0x1c   :  { %v465_v16 = vshrl.u32 %v464_v13, 5  ;;  %v466_v18 = vand.u32 31, %v464_v13  ;;  %v672_v19 = vsel %vm671_vm2, %v670_v9, 0  ;;  %vm359_vm12 = vcmp.gt.s32.totalorder %v2411_v24, 0 }
  0x1d   :  { %143 = vperm.xlu0 %2201, %v137_v62   ;;  %v674_v22 = vand.u32 31, %v672_v19  ;;  %v2418_v36 = vshrl.u32 %v672_v19, 5 }
  0x1e   :  { %v467_v25 = vsub.s32 32, %v466_v18  ;;  %v469_v27 = vshll.u32 %v2256_v26, %v466_v18  ;;  %v472_v29 = vshll.u32 %v2257_v28, %v466_v18  ;;  %v475_v31 = vshll.u32 %v2258_v30, %v466_v18 }
  0x1f   :  { %v478_v33 = vshll.u32 %v2259_v32, %v466_v18  ;;  %v481_v35 = vshll.u32 %v2260_v34, %v466_v18  ;;  %vm484_vm3 = vcmp.lt.s32.totalorder %v465_v16, 1  ;;  %vm485_vm4 = vcmp.lt.s32.totalorder %v465_v16, 2 }
  0x20   :  { %v468_v37 = vshrl.u32 %v2256_v26, %v467_v25  ;;  %v470_v38 = vshrl.u32 %v2257_v28, %v467_v25  ;;  %v473_v39 = vshrl.u32 %v2258_v30, %v467_v25  ;;  %v476_v40 = vshrl.u32 %v2259_v32, %v467_v25 }
  0x21   :  { %v479_v41 = vshrl.u32 %v2260_v34, %v467_v25  ;;  %v482_v43 = vshrl.u32 %v2261_v42, %v467_v25  ;;  %vm487_vm5 = vcmp.lt.s32.totalorder %v465_v16, 4  ;;  %v675_v50 = vsub.s32 32, %v674_v22 }
  0x22   :  { %v471_v44 = vor.u32 %v470_v38, %v469_v27  ;;  %v474_v45 = vor.u32 %v473_v39, %v472_v29  ;;  %v477_v46 = vor.u32 %v476_v40, %v475_v31  ;;  %vm486_vm6 = vcmp.lt.s32.totalorder %v465_v16, 3 }
  0x23   :  { %v480_v51 = vor.u32 %v479_v41, %v478_v33  ;;  %v483_v53 = vor.u32 %v482_v43, %v481_v35  ;;  %v677_v56 = vshll.u32 %v2256_v26, %v674_v22  ;;  %v680_v1 = vshll.u32 %v2257_v28, %v674_v22 }
  0x24   :  { %v488_v57 = vsel %vm484_vm3, %v468_v37, %v471_v44  ;;  %v489_v58 = vsel %vm487_vm5, %v477_v46, 2102212464  ;;  %v492_v59 = vsel %vm484_vm3, %v471_v44, %v474_v45  ;;  %v496_v60 = vsel %vm484_vm3, %v474_v45, %v477_v46 }
  0x25   :  { %v490_v61 = vsel %vm486_vm6, %v474_v45, %v489_v58  ;;  %v493_v62 = vsel %vm487_vm5, %v480_v51, 920167782  ;;  %v497_v63 = vsel %vm487_vm5, %v483_v53, 1326507024  ;;  %v676_v4 = vshrl.u32 %v2256_v26, %v675_v50 }
  0x26   :  { %v494_v2 = vsel %vm486_vm6, %v477_v46, %v493_v62  ;;  %v498_v3 = vsel %vm486_vm6, %v480_v51, %v497_v63  ;;  %v678_v5 = vshrl.u32 %v2257_v28, %v675_v50  ;;  %v491_v6 = vsel %vm485_vm4, %v488_v57, %v490_v61 }
  0x27   :  { %v495_v8 = vsel %vm485_vm4, %v492_v59, %v494_v2  ;;  %v499_v9 = vsel %vm485_vm4, %v496_v60, %v498_v3  ;;  %v681_v11 = vshrl.u32 %v2258_v30, %v675_v50  ;;  %v683_v31 = vshll.u32 %v2258_v30, %v674_v22 }
  0x28   :  { %v2438_v13 = vmul.u32.u64.low %v2407_v21, %v499_v9  ;;  %v2439_v18 = vmul.u32.u64.high %v2407_v21, %v499_v9, %v2438_v13  ;;  %v2442_v19 = vmul.u32.u64.low %v2407_v21, %v495_v8  ;;  %v2443_v25 = vmul.u32.u64.high %v2407_v21, %v495_v8, %v2442_v19 }
  0x29   :  { %v679_v27 = vor.u32 %v678_v5, %v677_v56  ;;  %v682_v29 = vor.u32 %v681_v11, %v680_v1  ;;  %v684_v33 = vshrl.u32 %v2259_v32, %v675_v50  ;;  %v686_v16 = vshll.u32 %v2259_v32, %v674_v22 }
  0x2a   :  { %v687_v35 = vshrl.u32 %v2260_v34, %v675_v50  ;;  %v689_v37 = vshll.u32 %v2260_v34, %v674_v22  ;;  %v690_v38 = vshrl.u32 %v2261_v42, %v675_v50  ;;  %v507_v39 = vmul.u32 %v2407_v21, %v491_v6 }
  0x2b   :  { %v685_v40 = vor.u32 %v684_v33, %v683_v31  ;;  %vm692_vm7 = vcmp.lt.s32.totalorder %v2418_v36, 1  ;;  %vm693_vm8 = vcmp.lt.s32.totalorder %v2418_v36, 2  ;;  %vm509_vm9 = vc.u32 %v2439_v18, %v2442_v19 }
  0x2c   :  { %v510_v41 = vadd.s32 1, %v2443_v25  ;;  %v688_v43 = vor.u32 %v687_v35, %v686_v16  ;;  %vm694_vm10 = vcmp.lt.s32.totalorder %v2418_v36, 3  ;;  %v691_v44 = vor.u32 %v690_v38, %v689_v37 }
  0x2d   :  { %vm695_vm11 = vcmp.lt.s32.totalorder %v2418_v36, 4  ;;  %v696_v22 = vsel %vm692_vm7, %v676_v4, %v679_v27  ;;  %v700_v45 = vsel %vm692_vm7, %v679_v27, %v682_v29  ;;  %v704_v51 = vsel %vm692_vm7, %v682_v29, %v685_v40 }
  0x2e   :  { %v511_v21 = vsel %vm509_vm9, %v510_v41, %v2443_v25  ;;  %v697_v46 = vsel %vm695_vm11, %v685_v40, 2102212464  ;;  %v701_v50 = vsel %vm695_vm11, %v688_v43, 920167782  ;;  %v705_v58 = vsel %vm695_vm11, %v691_v44, 1326507024 }
  0x2f   :  { %v512_v53 = vadd.s32 %v511_v21, %v507_v39  ;;  %v698_v56 = vsel %vm694_vm10, %v682_v29, %v697_v46  ;;  %v702_v57 = vsel %vm694_vm10, %v685_v40, %v701_v50  ;;  %v706_v61 = vsel %vm694_vm10, %v688_v43, %v705_v58  ;;  %v2502_v29 = vld [vmem:[%s3411_s1 + $0x8] sm:$0xff] }
  0x30   :  { %v699_v59 = vsel %vm693_vm8, %v696_v22, %v698_v56  ;;  %v703_v60 = vsel %vm693_vm8, %v700_v45, %v702_v57  ;;  %v707_v63 = vsel %vm693_vm8, %v704_v51, %v706_v61  ;;  %v360_v6 = vsel %vm359_vm12, %v2411_v24, 0 }
  0x31   :  { %v513_v62 = vadd.s32 536870912, %v512_v53  ;;  %v2469_v1 = vmul.u32.u64.low %v2409_v23, %v703_v60  ;;  %v2470_v2 = vmul.u32.u64.high %v2409_v23, %v703_v60, %v2469_v1  ;;  %v715_v8 = vmul.u32 %v2409_v23, %v699_v59 }
  0x32   :  { %v2474_v3 = vmul.u32.u64.low %v2409_v23, %v707_v63  ;;  %v2475_v4 = vmul.u32.u64.high %v2409_v23, %v707_v63, %v2474_v3  ;;  %v1323_v9 = vshrl.u32 %v1322_v10, 23  ;;  %v1531_v36 = vshrl.u32 %v1530_v14, 23  ;;  %v2497_v14 = vld [vmem:[%s3412_s6 + $0x8] sm:$0xff] }
  0x33   :  { %v2477_v5 = vshrl.u32 %v513_v62, 30  ;;  %v718_v13 = vadd.s32 1, %v2470_v2  ;;  %v355_v25 = vand.u32 8388607, %v348_v20  ;;  %v344_v27 = vsub.f32 %v2384_v47, %v2404_v12 }
  0x34   :  { %vm717_vm13 = vc.u32 %v2475_v4, %v2469_v1  ;;  %v362_v23 = vand.u32 31, %v360_v6  ;;  %v1319_v47 = vand.u32 2147483647, %v2367_v17  ;;  %v2133_v12 = vadd.s32 4294967169, %v1323_v9 }
  0x35   :  { %v515_v11 = vshll.u32 %v2477_v5, 30  ;;  %v719_v10 = vsel %vm717_vm13, %v718_v13, %v2470_v2  ;;  %v2141_v33 = vadd.s32 4294967169, %v1531_v36  ;;  %v356_v35 = vor.u32 8388608, %v355_v25 }
  0x36   :  { %v720_v31 = vadd.s32 %v719_v10, %v715_v8  ;;  %v2505_v37 = vadd.f32 -3.1415927, %v344_v27  ;;  %v363_v39 = vsub.s32 32, %v362_v23  ;;  %v133_v40 = vsub.f32 %v2497_v14, %v2502_v29 }
  0x37   :  { %v516_v24 = vsub.s32 %v512_v53, %v515_v11  ;;  %v2513_v44 = vand.u32 8388607, %v1319_v47  ;;  %v2515_v22 = vadd.s32 1, %v2133_v12  ;;  %v2517_v45 = vadd.s32 1, %v2141_v33 }
  0x38   :  { %v721_v38 = vadd.s32 536870912, %v720_v31  ;;  %v365_v46 = vshll.u32 %v2256_v26, %v362_v23  ;;  %v2520_v50 = vshll.u32 %v356_v35, 8  ;;  %v559_v51 = vand.u32 2139095040, %v2505_v37 }
  0x39   :  { %v518_v16 = vsub.s32 0, %v516_v24  ;;  %v366_v56 = vshrl.u32 %v2257_v28, %v363_v39  ;;  %v368_v57 = vshll.u32 %v2257_v28, %v362_v23  ;;  %v369_v58 = vshrl.u32 %v2258_v30, %v363_v39 }
  0x3a   :  { %v2509_v43 = vshrl.u32 %v721_v38, 30  ;;  %v508_v59 = vadd.s32 %v2442_v19, %v2439_v18  ;;  %v371_v61 = vshll.u32 %v2258_v30, %v362_v23  ;;  %v372_v62 = vshrl.u32 %v2259_v32, %v363_v39 }
  0x3b   :  { %v2102_v41 = vmin.u32 %v518_v16, %v516_v24  ;;  %v361_v2 = vshrl.u32 %v360_v6, 5  ;;  %v374_v3 = vshll.u32 %v2259_v32, %v362_v23  ;;  %v375_v8 = vshrl.u32 %v2260_v34, %v363_v39 }
  0x3c   :  { %v723_v53 = vshll.u32 %v2509_v43, 30  ;;  %v364_v9 = vshrl.u32 %v2256_v26, %v363_v39  ;;  %v377_v36 = vshll.u32 %v2260_v34, %v362_v23  ;;  %v378_v11 = vshrl.u32 %v2261_v42, %v363_v39 }
  0x3d   :  { %v520_v21 = vclz %v2102_v41  ;;  %v367_v13 = vor.u32 %v366_v56, %v365_v46  ;;  %v370_v25 = vor.u32 %v369_v58, %v368_v57  ;;  %v373_v6 = vor.u32 %v372_v62, %v371_v61 }
  0x3e   :  { %v2531_v63 = vsub.s32 %v720_v31, %v723_v53  ;;  %v376_v33 = vor.u32 %v375_v8, %v374_v3  ;;  %vm380_vm15 = vcmp.lt.s32.totalorder %v361_v2, 1  ;;  %vm383_vm1 = vcmp.lt.s32.totalorder %v361_v2, 4 }
  0x3f   :  { %v2103_v60 = vadd.s32 4294967294, %v520_v21  ;;  %v379_v38 = vor.u32 %v378_v11, %v377_v36  ;;  %v385_v23 = vsel %vm383_vm1, %v373_v6, 2102212464  ;;  %vm381_vm2 = vcmp.lt.s32.totalorder %v361_v2, 2 }
  0x40   :  { %v726_v19 = vsub.s32 0, %v2531_v63  ;;  %vm382_vm3 = vcmp.lt.s32.totalorder %v361_v2, 3  ;;  %v560_v41 = vshrl.u32 %v559_v51, 23  ;;  %v388_v53 = vsel %vm380_vm15, %v367_v13, %v370_v25 }
  0x41   :  { %vm2104_vm14 = vcmp.lt.s32.totalorder %v2103_v60, 0  ;;  %v386_v57 = vsel %vm382_vm3, %v370_v25, %v385_v23  ;;  %v389_v58 = vsel %vm383_vm1, %v376_v33, 920167782  ;;  %v393_v3 = vsel %vm383_vm1, %v379_v38, 1326507024 }
  0x42   :  { %v523_v18 = vsel %vm2104_vm14, 0, %v2103_v60  ;;  %v2110_v12 = vmin.u32 %v726_v19, %v2531_v63  ;;  %v390_v62 = vsel %vm382_vm3, %v373_v6, %v389_v58  ;;  %v716_v51 = vadd.s32 %v2469_v1, %v2475_v4 }
  0x43   :  { %v524_v27 = vsub.s32 32, %v523_v18  ;;  %v525_v10 = vshll.u32 %v516_v24, %v523_v18  ;;  %v528_v31 = vsub.s32 4294967266, %v523_v18  ;;  %v384_v24 = vsel %vm380_vm15, %v364_v9, %v367_v13 }
  0x44   :  { %v728_v39 = vclz %v2110_v12  ;;  %v391_v8 = vsel %vm381_vm2, %v388_v53, %v390_v62  ;;  %v394_v9 = vsel %vm382_vm3, %v376_v33, %v393_v3  ;;  %v2105_v19 = vadd.s32 4294967169, %v560_v41 }
  0x45   :  { %v526_v16 = vshrl.u32 %v508_v59, %v524_v27  ;;  %v529_v35 = vadd.s32 127, %v528_v31  ;;  %v392_v59 = vsel %vm380_vm15, %v370_v25, %v373_v6  ;;  %vm1330_vm6 = vcmp.gt.s32.totalorder %v2515_v22, 0 }
  0x46   :  { %v2111_v56 = vadd.s32 4294967294, %v728_v39  ;;  %v395_v18 = vsel %vm381_vm2, %v392_v59, %v394_v9  ;;  %v566_v4 = vadd.s32 1, %v2105_v19  ;;  %vm454_vm7 = vcmp.lt.s32.totalorder %v2386_v48, 0 }
  0x47   :  { %v527_v21 = vor.u32 %v526_v16, %v525_v10  ;;  %v530_v46 = vshll.u32 %v529_v35, 23  ;;  %v387_v10 = vsel %vm381_vm2, %v384_v24, %v386_v57  ;;  %v538_v41 = vsub.s32 4, %v2477_v5 }
  0x48   :  { %vm2112_vm4 = vcmp.lt.s32.totalorder %v2111_v56, 0  ;;  %v2556_v6 = vmul.u32.u64.low %v2520_v50, %v395_v18  ;;  %v2557_v1 = vmul.u32.u64.high %v2520_v50, %v395_v18, %v2556_v6  ;;  %vm567_vm5 = vcmp.gt.s32.totalorder %v566_v4, 0 }
  0x49   :  { %v531_v60 = vor.u32 4788187, %v530_v46  ;;  %v534_v61 = vcvt.s32.f32 %v527_v21  ;;  %v731_v11 = vsel %vm2112_vm4, 0, %v2111_v56  ;;  %v568_v39 = vsel %vm567_vm5, %v566_v4, 0 }
  0x4a   :  { %v732_v13 = vsub.s32 32, %v731_v11  ;;  %v733_v25 = vshll.u32 %v2531_v63, %v731_v11  ;;  %v736_v27 = vsub.s32 4294967266, %v731_v11  ;;  %v1327_v63 = vor.u32 8388608, %v2513_v44 }
  0x4b   :  { %v532_v36 = vand.u32 2147483647, %v531_v60  ;;  %v2560_v33 = vmul.u32.u64.low %v2520_v50, %v391_v8  ;;  %v2561_v35 = vmul.u32.u64.high %v2520_v50, %v391_v8, %v2560_v33  ;;  %v403_v21 = vmul.u32 %v2520_v50, %v387_v10 }
  0x4c   :  { %v734_v12 = vshrl.u32 %v716_v51, %v732_v13  ;;  %v737_v16 = vadd.s32 127, %v736_v27  ;;  %v1527_v46 = vand.u32 2147483647, %v2359_v15  ;;  %v2574_v44 = vsel %vm1330_vm6, %v2515_v22, 0 }
  0x4d   :  { %v535_v31 = vmul.f32 %v534_v61, %v532_v36  ;;  %vm405_vm8 = vc.u32 %v2557_v1, %v2560_v33  ;;  %v406_v53 = vadd.s32 1, %v2561_v35  ;;  %vm1538_vm9 = vcmp.gt.s32.totalorder %v2517_v45, 0 }
  0x4e   :  { %v735_v2 = vor.u32 %v734_v12, %v733_v25  ;;  %v738_v23 = vshll.u32 %v737_v16, 23  ;;  %vm2579_vm10 = vcmp.le.f32.partialorder %v452_v52, 0.7853982  ;;  %v570_v57 = vand.u32 31, %v568_v39 }
  0x4f   :  { %v536_v38 = vxor.u32 2147483648, %v535_v31  ;;  %v2585_v58 = vshll.u32 %v1327_v63, 8  ;;  %v407_v61 = vsel %vm405_vm8, %v406_v53, %v2561_v35  ;;  %v556_v22 = vand.u32 2147483647, %v2505_v37 }
  0x50   :  { %v739_v24 = vor.u32 4788187, %v738_v23  ;;  %v742_v60 = vcvt.s32.f32 %v735_v2  ;;  %v539_v62 = vsel %vm454_vm7, %v538_v41, %v2477_v5  ;;  %v408_v52 = vadd.s32 %v407_v61, %v403_v21 }
  0x51   :  { %v537_v50 = vsel %vm454_vm7, %v536_v38, %v535_v31  ;;  %v2592_v3 = vshrl.u32 %v568_v39, 5  ;;  %v571_v51 = vsub.s32 32, %v570_v57  ;;  %v573_v9 = vshll.u32 %v2256_v26, %v570_v57 }
  0x52   :  { %v740_v59 = vand.u32 2147483647, %v739_v24  ;;  %v540_v8 = vsel %vm2579_vm10, %v2386_v48, %v537_v50  ;;  %v576_v36 = vshll.u32 %v2257_v28, %v570_v57  ;;  %v582_v11 = vshll.u32 %v2259_v32, %v570_v57 }
  0x53   :  { %v409_v18 = vadd.s32 536870912, %v408_v52  ;;  %v574_v19 = vshrl.u32 %v2257_v28, %v571_v51  ;;  %v577_v13 = vshrl.u32 %v2258_v30, %v571_v51  ;;  %v579_v5 = vshll.u32 %v2258_v30, %v570_v57 }
  0x54   :  { %v743_v25 = vmul.f32 %v742_v60, %v740_v59  ;;  %v580_v27 = vshrl.u32 %v2259_v32, %v571_v51  ;;  %v583_v10 = vshrl.u32 %v2260_v34, %v571_v51  ;;  %v2608_v31 = vsel %vm1538_vm9, %v2517_v45, 0 }
  0x55   :  { %v541_v6 = vsel %vm2579_vm10, 0, %v539_v62  ;;  %v410_v4 = vshrl.u32 %v409_v18, 30  ;;  %v563_v12 = vand.u32 8388607, %v556_v22  ;;  %vm591_vm11 = vcmp.lt.s32.totalorder %v2592_v3, 4  ;;  %v179_v18 = vld [vmem:[%s3414_s7 + $0x8] sm:$0xff] }
  0x56   :  { %2203 = vcosq.f32 %v540_v8  ;;  %v584_v16 = vor.u32 %v583_v10, %v582_v11  ;;  %vm588_vm12 = vcmp.lt.s32.totalorder %v2592_v3, 1  ;;  %vm590_vm13 = vcmp.lt.s32.totalorder %v2592_v3, 3 }
  0x57   :  { %v411_v35 = vshll.u32 %v410_v4, 30  ;;  %v575_v38 = vor.u32 %v574_v19, %v573_v9  ;;  %v578_v63 = vor.u32 %v577_v13, %v576_v36  ;;  %v581_v45 = vor.u32 %v580_v27, %v579_v5 }
  0x58   :  { %v744_v2 = vxor.u32 2147483648, %v743_v25  ;;  %v585_v23 = vshll.u32 %v2260_v34, %v570_v57  ;;  %v586_v39 = vshrl.u32 %v2261_v42, %v571_v51  ;;  %v597_v41 = vsel %vm591_vm11, %v584_v16, 920167782 }
  0x59   :  { %vm662_vm14 = vcmp.lt.s32.totalorder %v2388_v49, 0  ;;  %v746_v21 = vsub.s32 4, %v2509_v43  ;;  %v2623_v24 = vsub.s32 %v408_v52, %v411_v35  ;;  %v564_v53 = vor.u32 8388608, %v563_v12 }
  0x5a   :  { %2205 = vsinq.f32 %v540_v8  ;;  %v545_v56 = vadd.s32 3, %v541_v6  ;;  %vm2627_vm15 = vcmp.le.f32.partialorder %v660_v55, 0.7853982  ;;  %vm350_vm1 = vcmp.lt.s32.totalorder %v2392_v54, 0 }
  0x5b   :  { %v414_v57 = vsub.s32 0, %v2623_v24  ;;  %vm589_vm2 = vcmp.lt.s32.totalorder %v2592_v3, 2  ;;  %v596_v59 = vsel %vm588_vm12, %v575_v38, %v578_v63  ;;  %v598_v60 = vsel %vm590_vm13, %v581_v45, %v597_v41 }
  0x5c   :  { %v745_v61 = vsel %vm662_vm14, %v744_v2, %v743_v25  ;;  %v2640_v62 = vand.u32 3, %v541_v6  ;;  %v572_v55 = vshrl.u32 %v2256_v26, %v571_v51  ;;  %v587_v52 = vor.u32 %v586_v39, %v585_v23 }
  0x5d   :  { %v747_v8 = vsel %vm662_vm14, %v746_v21, %v2509_v43  ;;  %v2098_v9 = vmin.u32 %v414_v57, %v2623_v24  ;;  %v593_v36 = vsel %vm591_vm11, %v581_v45, 2102212464  ;;  %v604_v11 = vshll.u32 %v564_v53, 8 }
  0x5e   :  { %vm2651_vm3 = vcmp.le.f32.partialorder %v348_v20, 0.7853982  ;;  %v434_v19 = vsub.s32 4, %v410_v4  ;;  %v599_v51 = vsel %vm589_vm2, %v596_v59, %v598_v60  ;;  %v2658_v13 = vand.u32 127, %v48_v0 }
  0x5f   :  { %v2660_v43 = vand.u32 3, %v545_v56  ;;  %v748_v5 = vsel %vm2627_vm15, %v2388_v49, %v745_v61  ;;  %v416_v25 = vclz %v2098_v9  ;;  %v600_v20 = vsel %vm588_vm12, %v578_v63, %v581_v45 }
  0x60   :  { %v2204_v27 = vpop.eup %2203  ;;  %v749_v10 = vsel %vm2627_vm15, 0, %v747_v8  ;;  %vm966_vm4 = vcmp.eq.s32.totalorder %v2640_v62, 0  ;;  %v592_v0 = vsel %vm588_vm12, %v572_v55, %v575_v38  ;;  %v594_v6 = vsel %vm590_vm13, %v578_v63, %v593_v36 }
  0x61   :  { %v601_v12 = vsel %vm591_vm11, %v587_v52, 1326507024  ;;  %v2099_v35 = vadd.s32 4294967294, %v416_v25  ;;  %v2678_v45 = vmul.u32.u64.low %v604_v11, %v599_v51  ;;  %v2679_v23 = vmul.u32.u64.high %v604_v11, %v599_v51, %v2678_v45 }
  0x62   :  { %v602_v2 = vsel %vm590_vm13, %v584_v16, %v601_v12  ;;  %2207 = vcosq.f32 %v748_v5  ;;  %v404_v39 = vadd.s32 %v2560_v33, %v2557_v1  ;;  %v435_v38 = vsel %vm350_vm1, %v434_v19, %v410_v4 }
  0x63   :  { %v603_v63 = vsel %vm589_vm2, %v600_v20, %v602_v2  ;;  %vm2100_vm5 = vcmp.lt.s32.totalorder %v2099_v35, 0  ;;  %v595_v41 = vsel %vm589_vm2, %v592_v0, %v594_v6  ;;  %vm547_vm6 = vcmp.lt.s32.totalorder %v2660_v43, 2 }
  0x64   :  { %v2690_v21 = vmul.u32.u64.low %v604_v11, %v603_v63  ;;  %v2691_v16 = vmul.u32.u64.high %v604_v11, %v603_v63, %v2690_v21  ;;  %v2206_v53 = vpop.eup %2205  ;;  %v753_v56 = vadd.s32 3, %v749_v10  ;;  %vm969_vm7 = vcmp.eq.s32.totalorder %v2640_v62, 2 }
  0x65   :  { %v419_v1 = vsel %vm2100_vm5, 0, %v2099_v35  ;;  %v552_v33 = vxor.u32 2147483648, %v2204_v27  ;;  %2209 = vsinq.f32 %v748_v5  ;;  %v437_v3 = vsel %vm2651_vm3, 0, %v435_v38 }
  0x66   :  { %v420_v4 = vsub.s32 32, %v419_v1  ;;  %v421_v50 = vshll.u32 %v2623_v24, %v419_v1  ;;  %v424_v57 = vsub.s32 4294967266, %v419_v1  ;;  %v611_v59 = vmul.u32 %v604_v11, %v595_v41 }
  0x67   :  { %v614_v60 = vadd.s32 1, %v2679_v23  ;;  %vm548_vm8 = vcmp.eq.s32.totalorder %v2660_v43, 0  ;;  %v549_v61 = vxor.u32 2147483648, %v2206_v53  ;;  %vm551_vm9 = vcmp.eq.s32.totalorder %v2660_v43, 2 }
  0x68   :  { %v422_v55 = vshrl.u32 %v404_v39, %v420_v4  ;;  %v2701_v52 = vand.u32 3, %v753_v56  ;;  %v2703_v8 = vand.u32 3, %v749_v10  ;;  %v425_v9 = vadd.s32 127, %v424_v57 }
  0x69   :  { %vm613_vm10 = vc.u32 %v2691_v16, %v2678_v45  ;;  %vm965_vm11 = vcmp.lt.s32.totalorder %v2640_v62, 2  ;;  %v441_v36 = vadd.s32 3, %v437_v3  ;;  %v2708_v11 = vand.u32 3, %v437_v3 }
  0x6a   :  { %v423_v24 = vor.u32 %v422_v55, %v421_v50  ;;  %v615_v19 = vsel %vm613_vm10, %v614_v60, %v2679_v23  ;;  %v553_v51 = vsel %vm551_vm9, %v552_v33, %v2206_v53  ;;  %v426_v5 = vshll.u32 %v425_v9, 23 }
  0x6b   :  { %v616_v25 = vadd.s32 %v615_v19, %v611_v59  ;;  %v1333_v20 = vand.u32 31, %v2574_v44  ;;  %v550_v10 = vsel %vm548_vm8, %v2204_v27, %v549_v61  ;;  %v968_v0 = vsel %vm966_vm4, %v2204_v27, %v549_v61 }
  0x6c   :  { %v971_v6 = vsel %vm969_vm7, %v552_v33, %v2206_v53  ;;  %v2719_v12 = vshrl.u32 %v2574_v44, 5  ;;  %v2721_v35 = vpop.eup %2207  ;;  %vm756_vm12 = vcmp.eq.s32.totalorder %v2701_v52, 0  ;;  %vm759_vm13 = vcmp.eq.s32.totalorder %v2701_v52, 2 }
  0x6d   :  { %v427_v2 = vor.u32 4788187, %v426_v5  ;;  %v430_v23 = vcvt.s32.f32 %v423_v24  ;;  %v617_v39 = vadd.s32 536870912, %v616_v25  ;;  %v1334_v38 = vsub.s32 32, %v1333_v20 }
  0x6e   :  { %vm544_vm14 = vweird.f32 %v2386_v48  ;;  %v2726_v63 = vand.u32 3, %v441_v36  ;;  %v1336_v27 = vshll.u32 %v2256_v26, %v1333_v20  ;;  %v1339_v41 = vshll.u32 %v2257_v28, %v1333_v20 }
  0x6f   :  { %v1345_v44 = vshll.u32 %v2259_v32, %v1333_v20  ;;  %vm1172_vm15 = vcmp.eq.s32.totalorder %v2703_v8, 0  ;;  %vm1175_vm2 = vcmp.eq.s32.totalorder %v2703_v8, 2  ;;  %v428_v21 = vand.u32 2147483647, %v427_v2  ;;  %v2210_v33 = vpop.eup %2209 }
  0x70   :  { %v2733_v53 = vshrl.u32 %v617_v39, 30  ;;  %v1337_v56 = vshrl.u32 %v2257_v28, %v1334_v38  ;;  %v1342_v1 = vshll.u32 %v2258_v30, %v1333_v20  ;;  %v554_v4 = vsel %vm547_vm6, %v550_v10, %v553_v51 }
  0x71   :  { %vm755_vm4 = vcmp.lt.s32.totalorder %v2701_v52, 2  ;;  %v1340_v50 = vshrl.u32 %v2258_v30, %v1334_v38  ;;  %v1343_v57 = vshrl.u32 %v2259_v32, %v1334_v38  ;;  %v1346_v3 = vshrl.u32 %v2260_v34, %v1334_v38 }
  0x72   :  { %v760_v59 = vxor.u32 2147483648, %v2721_v35  ;;  %v431_v60 = vmul.f32 %v430_v23, %v428_v21  ;;  %v619_v61 = vshll.u32 %v2733_v53, 30  ;;  %vm1354_vm5 = vcmp.lt.s32.totalorder %v2719_v12, 4 }
  0x73   :  { %v1338_v55 = vor.u32 %v1337_v56, %v1336_v27  ;;  %v1347_v9 = vor.u32 %v1346_v3, %v1345_v44  ;;  %v1348_v43 = vshll.u32 %v2260_v34, %v1333_v20  ;;  %v1349_v24 = vshrl.u32 %v2261_v42, %v1334_v38 }
  0x74   :  { %vm1171_vm6 = vcmp.lt.s32.totalorder %v2703_v8, 2  ;;  %v432_v36 = vxor.u32 2147483648, %v431_v60  ;;  %vm558_vm7 = vcmp.lt.s32.totalorder %v2505_v37, 0  ;;  %v2750_v19 = vsub.s32 %v616_v25, %v619_v61  ;;  %v291_v8 = vld [vmem:[%s3415_s11] sm:$0xff] }
  0x75   :  { %v1341_v51 = vor.u32 %v1340_v50, %v1339_v41  ;;  %v1344_v5 = vor.u32 %v1343_v57, %v1342_v1  ;;  %v757_v10 = vxor.u32 2147483648, %v2210_v33  ;;  %vm1351_vm8 = vcmp.lt.s32.totalorder %v2719_v12, 1 }
  0x76   :  { %vm1353_vm9 = vcmp.lt.s32.totalorder %v2719_v12, 3  ;;  %v1360_v2 = vsel %vm1354_vm5, %v1347_v9, 920167782  ;;  %v972_v20 = vsel %vm965_vm11, %v968_v0, %v971_v6  ;;  %v433_v23 = vsel %vm350_vm1, %v432_v36, %v431_v60 }
  0x77   :  { %v622_v39 = vsub.s32 0, %v2750_v19  ;;  %v1335_v25 = vshrl.u32 %v2256_v26, %v1334_v38  ;;  %vm752_vm10 = vweird.f32 %v2388_v49  ;;  %v436_v27 = vsel %vm2651_vm3, %v2392_v54, %v433_v23 }
  0x78   :  { %vm2768_vm0 = vcmp.le.f32.partialorder %v556_v22, 0.7853982  ;;  %v1350_v62 = vor.u32 %v1349_v24, %v1348_v43  ;;  %vm1352_vm11 = vcmp.lt.s32.totalorder %v2719_v12, 2  ;;  %v1356_v0 = vsel %vm1354_vm5, %v1344_v5, 2102212464  ;;  %v181_v22 = vld [vmem:[%s3413_s2 + $0x8] sm:$0xff] }
  0x79   :  { %2211 = vcosq.f32 %v436_v27  ;;  %v2106_v6 = vmin.u32 %v622_v39, %v2750_v19  ;;  %v1359_v38 = vsel %vm1351_vm8, %v1338_v55, %v1341_v51  ;;  %v1361_v44 = vsel %vm1353_vm9, %v1344_v5, %v1360_v2 }
  0x7a   :  { %v758_v21 = vsel %vm756_vm12, %v2721_v35, %v757_v10  ;;  %v761_v56 = vsel %vm759_vm13, %v760_v59, %v2210_v33  ;;  %2213 = vsinq.f32 %v436_v27  ;;  %v642_v1 = vsub.s32 4, %v2733_v53 }
  0x7b   :  { %v2794_v50 = vsel %vm544_vm14, nan, %v554_v4  ;;  %v624_v57 = vclz %v2106_v6  ;;  %v1355_v3 = vsel %vm1351_vm8, %v1335_v25, %v1338_v55  ;;  %v1357_v60 = vsel %vm1353_vm9, %v1341_v51, %v1356_v0 }
  0x7c   :  { %v1174_v61 = vsel %vm1172_vm15, %v2721_v35, %v757_v10  ;;  %v1177_v43 = vsel %vm1175_vm2, %v760_v59, %v2210_v33  ;;  %v183_v24 = vsub.f32 %v179_v18, %v181_v22  ;;  %v1362_v36 = vsel %vm1352_vm11, %v1359_v38, %v1361_v44  ;;  %v2822_v10 = vpop.permute.xlu1 %53 }
  0x7d   :  { %v762_v4 = vsel %vm755_vm4, %v758_v21, %v761_v56  ;;  %v2107_v2 = vadd.s32 4294967294, %v624_v57  ;;  %v1363_v55 = vsel %vm1351_vm8, %v1341_v51, %v1344_v5  ;;  %v1364_v23 = vsel %vm1354_vm5, %v1350_v62, 1326507024 }
  0x7e   :  { %v612_v35 = vadd.s32 %v2678_v45, %v2691_v16  ;;  %v643_v33 = vsel %vm558_vm7, %v642_v1, %v2733_v53  ;;  %vm295_vm1 = vcmask 39936   ;;  %v1358_v59 = vsel %vm1352_vm11, %v1355_v3, %v1357_v60 }
  0x7f   :  { %v1365_v52 = vsel %vm1353_vm9, %v1347_v9, %v1364_v23  ;;  %vm2108_vm3 = vcmp.lt.s32.totalorder %v2107_v2, 0  ;;  %v2827_v5 = vmul.u32.u64.low %v2585_v58, %v1362_v36  ;;  %v2828_v45 = vmul.u32.u64.high %v2585_v58, %v1362_v36, %v2827_v5 }
  0x80   :  { %v1366_v51 = vsel %vm1352_vm11, %v1363_v55, %v1365_v52  ;;  %v1178_v16 = vsel %vm1171_vm6, %v1174_v61, %v1177_v43  ;;  %v627_v53 = vsel %vm2108_vm3, 0, %v2107_v2  ;;  %vm863_vm12 = vcmp.eq.s32.totalorder %v2708_v11, 0  ;;  %v2863_v1 = vpop.permute.xlu1 %60  ;;  %v93_v52 = vld [vmem:[%s3417_s5] sm:$0xff] }
  0x81   :  { %v2834_v39 = vmul.u32.u64.low %v2585_v58, %v1366_v51  ;;  %v2835_v25 = vmul.u32.u64.high %v2585_v58, %v1366_v51, %v2834_v39  ;;  %v628_v9 = vsub.s32 32, %v627_v53  ;;  %v629_v27 = vshll.u32 %v2750_v19, %v627_v53 }
  0x82   :  { %v632_v12 = vsub.s32 4294967266, %v627_v53  ;;  %v645_v62 = vsel %vm2768_vm0, 0, %v643_v33  ;;  %v2843_v0 = vsel %vm544_vm14, nan, %v972_v20  ;;  %vm444_vm13 = vcmp.eq.s32.totalorder %v2726_v63, 0  ;;  %v292_v20 = vld [vmem:[%s3415_s11 + $0x8] sm:$0xff] }
  0x83   :  { %vm447_vm15 = vcmp.eq.s32.totalorder %v2726_v63, 2  ;;  %v1374_v6 = vmul.u32 %v2585_v58, %v1358_v59  ;;  %v2212_v18 = vpop.eup %2211  ;;  %v763_v19 = vsel %vm752_vm10, nan, %v762_v4  ;;  %vm443_vm2 = vcmp.lt.s32.totalorder %v2726_v63, 2 }
  0x84   :  { %v630_v22 = vshrl.u32 %v612_v35, %v628_v9  ;;  %v633_v48 = vadd.s32 127, %v632_v12  ;;  %v1377_v38 = vadd.s32 1, %v2828_v45  ;;  %v2214_v44 = vpop.eup %2213  ;;  %v1179_v21 = vsel %vm752_vm10, nan, %v1178_v16 }
  0x85   :  { %vm862_vm14 = vcmp.lt.s32.totalorder %v2708_v11, 2  ;;  %v649_v58 = vadd.s32 3, %v645_v62  ;;  %v185_v56 = vmul.f32 %v183_v24, %v183_v24  ;;  %vm1376_vm4 = vc.u32 %v2835_v25, %v2827_v5 }
  0x86   :  { %v631_v57 = vor.u32 %v630_v22, %v629_v27  ;;  %v634_v3 = vshll.u32 %v633_v48, 23  ;;  %v2866_v60 = vmul.f32 %v291_v8, %v2822_v10  ;;  %v1378_v61 = vsel %vm1376_vm4, %v1377_v38, %v2828_v45 }
  0x87   :  { %v765_v43 = vsub.f32 %v2794_v50, %v763_v19  ;;  %vm866_vm5 = vcmp.eq.s32.totalorder %v2708_v11, 2  ;;  %v2872_v49 = vmul.f32 %v292_v20, %v2863_v1  ;;  %v1379_v24 = vadd.s32 %v1378_v61, %v1374_v6  ;;  %v91_v50 = vld [vmem:[%s3416_s0] sm:$0xff]  ;;  %v2954_v11 = vld [vmem:[%s3404_s4 + $0x8] sm:$0xff] }
  0x88   :  { %v445_v36 = vxor.u32 2147483648, %v2214_v44  ;;  %v448_v4 = vxor.u32 2147483648, %v2212_v18  ;;  %v635_v2 = vor.u32 4788187, %v634_v3  ;;  %v638_v55 = vcvt.s32.f32 %v631_v57 }
  0x89   :  { %v1181_v23 = vsub.f32 %v2843_v0, %v1179_v21  ;;  %v2875_v35 = vand.u32 3, %v649_v58  ;;  %v2877_v33 = vand.u32 3, %v645_v62  ;;  %v1380_v59 = vadd.s32 536870912, %v1379_v24  ;;  %v2247_v21 = vld [vmem:[%s3404_s4] sm:$0xff] }
  0x8a   :  { %v636_v51 = vand.u32 2147483647, %v635_v2  ;;  %v2887_v45 = vsel %vm295_vm1, %v2866_v60, 0.0  ;;  %v2890_v16 = vmul.f32 %v185_v56, %v2863_v1  ;;  %v2893_v53 = vand.u32 31, %v2608_v31 }
  0x8b   :  { %v2897_v39 = vsel %vm295_vm1, %v2872_v49, 0.0  ;;  %v2899_v9 = vshrl.u32 %v1380_v59, 30  ;;  %v2903_v27 = vand.u32 8388607, %v1527_v46  ;;  %v2906_v12 = vshrl.u32 %v2608_v31, 5 }
  0x8c   :  { %vm440_vm6 = vweird.f32 %v2392_v54  ;;  %v446_v0 = vsel %vm444_vm13, %v2212_v18, %v445_v36  ;;  %v449_v8 = vsel %vm447_vm15, %v448_v4, %v2214_v44  ;;  %v639_v6 = vmul.f32 %v638_v55, %v636_v51 }
  0x8d   :  { %v2913_v19 = vsub.f32 %v91_v50, %v93_v52  ;;  %v865_v31 = vsel %vm863_vm12, %v2212_v18, %v445_v36  ;;  %v868_v20 = vsel %vm866_vm5, %v448_v4, %v2214_v44  ;;  %v1382_v38 = vshll.u32 %v2899_v9, 30 }
  0x8e   :  { %v640_v56 = vxor.u32 2147483648, %v639_v6  ;;  %v2931_v14 = vadd.s32 %v2827_v5, %v2835_v25  ;;  %v1542_v29 = vsub.s32 32, %v2893_v53  ;;  %v450_v18 = vsel %vm443_vm2, %v446_v0, %v449_v8 }
  0x8f   :  { %v148_v62 = vpop.permute.xlu1 %147  ;;  %v2936_v44 = vsub.s32 %v1379_v24, %v1382_v38  ;;  %v1535_v57 = vor.u32 8388608, %v2903_v27  ;;  %v869_v36 = vsel %vm862_vm14, %v865_v31, %v868_v20  ;;  %vm101_vm8 = vcmask 23552   ;;  %v130_v27 = vld [vmem:[%s3411_s1] sm:$0xff] }
  0x90   :  { %v151_v22 = vmul.f32 %v148_v62, %v133_v40  ;;  %v2918_v48 = vpop.xlane.xlu0 %215  ;;  %v767_v40 = vmul.f32 %v765_v43, %v148_v62  ;;  %v1183_v3 = vmul.f32 %v1181_v23, %v148_v62  ;;  %v641_v4 = vsel %vm558_vm7, %v640_v56, %v639_v6 }
  0x91   :  { %v220_v58 = vsub.f32 %v2247_v21, %v2918_v48  ;;  %v644_v63 = vsel %vm2768_vm0, %v2505_v37, %v641_v4  ;;  %v1543_v43 = vshrl.u32 %v2256_v26, %v1542_v29  ;;  %v1544_v24 = vshll.u32 %v2256_v26, %v2893_v53 }
  0x92   :  { %v153_v5 = vmul.f32 %v151_v22, %v151_v22  ;;  %v1385_v55 = vsub.s32 0, %v2936_v44  ;;  %v1545_v23 = vshrl.u32 %v2257_v28, %v1542_v29  ;;  %v1185_v41 = vmul.f32 %v767_v40, %v767_v40 }
  0x93   :  { %v222_v61 = vmul.f32 1.442695, %v220_v58  ;;  %v245_v59 = vpop.permute.xlu1 %244  ;;  %v1547_v50 = vshll.u32 %v2257_v28, %v2893_v53  ;;  %v1548_v52 = vshrl.u32 %v2258_v30, %v1542_v29  ;;  %v1187_v51 = vmul.f32 %v1183_v3, %v1183_v3 }
  0x94   :  { %v2943_v25 = vpop.xlane.xlu0 %218  ;;  %v2134_v0 = vmin.u32 %v1385_v55, %v2936_v44  ;;  %vm655_vm0 = vcmp.eq.s32.totalorder %v2875_v35, 2  ;;  %vm1072_vm7 = vcmp.eq.s32.totalorder %v2877_v33, 2  ;;  %v155_v8 = vmul.f32 %v153_v5, %v2863_v1 }
  0x95   :  { %2215 = vpow2.f32 %v222_v61  ;;  %v221_v2 = vsub.f32 %v2954_v11, %v2943_v25  ;;  %v1550_v6 = vshll.u32 %v2258_v30, %v2893_v53  ;;  %v1551_v22 = vshrl.u32 %v2259_v32, %v1542_v29 }
  0x96   :  { %2217 = vcosq.f32 %v644_v63  ;;  %v1553_v31 = vshll.u32 %v2259_v32, %v2893_v53  ;;  %vm652_vm9 = vcmp.eq.s32.totalorder %v2875_v35, 0  ;;  %vm1069_vm10 = vcmp.eq.s32.totalorder %v2877_v33, 0 }
  0x97   :  { %v224_v62 = vmul.f32 1.442695, %v221_v2  ;;  %2219 = vsinq.f32 %v644_v63  ;;  %vm253_vm11 = vcmp.eq.s32.totalorder %v2658_v13, %v245_v59  ;;  %v1387_v20 = vclz %v2134_v0 }
  0x98   :  { %v1554_v38 = vshrl.u32 %v2260_v34, %v1542_v29  ;;  %v2978_v58 = vsel %vm440_vm6, nan, %v450_v18  ;;  %v2982_v56 = vsel %vm440_vm6, nan, %v869_v36  ;;  %vm651_vm3 = vcmp.lt.s32.totalorder %v2875_v35, 2  ;;  %v2995_v36 = vpop.permute.xlu1 %251 }
  0x99   :  { %2221 = vpow2.f32 %v224_v62  ;;  %vm1068_vm12 = vcmp.lt.s32.totalorder %v2877_v33, 2  ;;  %v1556_v40 = vshll.u32 %v2260_v34, %v2893_v53  ;;  %v1557_v3 = vshrl.u32 %v2261_v42, %v1542_v29 }
  0x9a   :  { %vm648_vm13 = vweird.f32 %v2505_v37  ;;  %v2990_v61 = vadd.f32 %v1187_v51, %v1185_v41  ;;  %v2135_v4 = vadd.s32 4294967294, %v1387_v20  ;;  %v1546_v18 = vor.u32 %v1545_v23, %v1544_v24 }
  0x9b   :  { %v1549_v5 = vor.u32 %v1548_v52, %v1547_v50  ;;  %v2993_v54 = vsel %vm101_vm8, %v155_v8, 0.0  ;;  %v2999_v63 = vsel %vm253_vm11, %v2247_v21, 0.0  ;;  %v1552_v2 = vor.u32 %v1551_v22, %v1550_v6 }
  0x9c   :  { %v1555_v53 = vor.u32 %v1554_v38, %v1553_v31  ;;  %vm2136_vm15 = vcmp.lt.s32.totalorder %v2135_v4, 0  ;;  %vm1559_vm2 = vcmp.lt.s32.totalorder %v2906_v12, 1  ;;  %vm1560_vm14 = vcmp.lt.s32.totalorder %v2906_v12, 2 }
  0x9d   :  { %vm1562_vm4 = vcmp.lt.s32.totalorder %v2906_v12, 4  ;;  %v1390_v29 = vsel %vm2136_vm15, 0, %v2135_v4  ;;  %v1558_v24 = vor.u32 %v1557_v3, %v1556_v40  ;;  %vm1561_vm5 = vcmp.lt.s32.totalorder %v2906_v12, 3 }
  0x9e   :  { %v1564_v55 = vsel %vm1562_vm4, %v1552_v2, 2102212464  ;;  %vm254_vm6 = vcmp.eq.s32.totalorder %v2658_v13, %v2995_v36  ;;  %v1391_v21 = vsub.s32 32, %v1390_v29  ;;  %v1392_v41 = vshll.u32 %v2936_v44, %v1390_v29 }
  0x9f   :  { %v2216_v23 = vpop.eup %2215  ;;  %v1395_v59 = vsub.s32 4294967266, %v1390_v29  ;;  %v1563_v50 = vsel %vm1559_vm2, %v1543_v43, %v1546_v18  ;;  %vm3428_vm11 = vcmask 162816   ;;  %vm188_vm15 = vcmask 72704  }
  0xa0   :  { %v2218_v52 = vpop.eup %2217  ;;  %v226_v51 = vsel %vm3428_vm11, %v2216_v23, 0.0  ;;  %v1565_v62 = vsel %vm1561_vm5, %v1549_v5, %v1564_v55  ;;  %v1567_v0 = vsel %vm1559_vm2, %v1546_v18, %v1549_v5  ;;  %v1568_v8 = vsel %vm1562_vm4, %v1555_v53, 920167782 }
  0xa1   :  { %v2220_v6 = vpop.eup %2219  ;;  %v656_v22 = vxor.u32 2147483648, %v2218_v52  ;;  %227 = vadd.xlane.f32.xlu1 %v226_v51  ;;  %v1393_v44 = vshrl.u32 %v2931_v14, %v1391_v21  ;;  %v1396_v31 = vadd.s32 127, %v1395_v59  ;;  %v1571_v43 = vsel %vm1559_vm2, %v1549_v5, %v1552_v2  ;;  %vm3429_vm2 = vmmov %vm3428_vm11 }
  0xa2   :  { %v653_v20 = vxor.u32 2147483648, %v2220_v6  ;;  %v3024_v38 = vsel %vm1560_vm14, %v1563_v50, %v1565_v62  ;;  %v1569_v40 = vsel %vm1561_vm5, %v1552_v2, %v1568_v8  ;;  %v1572_v3 = vsel %vm1562_vm4, %v1558_v24, 1326507024 }
  0xa3   :  { %v2222_v4 = vpop.eup %2221  ;;  %v657_v18 = vsel %vm655_vm0, %v656_v22, %v2220_v6  ;;  %v1074_v14 = vsel %vm1072_vm7, %v656_v22, %v2220_v6  ;;  %v1394_v29 = vor.u32 %v1393_v44, %v1392_v41  ;;  %v1397_v5 = vshll.u32 %v1396_v31, 23  ;;  %v144_v6 = vpop.permute.xlu0 %143  ;;  %vm3430_vm0 = vmmov %vm3429_vm2 }
  0xa4   :  { %v654_v55 = vsel %vm652_vm9, %v2218_v52, %v653_v20  ;;  %v1071_v23 = vsel %vm1069_vm10, %v2218_v52, %v653_v20  ;;  %v229_v2 = vsel %vm3429_vm2, %v2222_v4, 0.0  ;;  %v1575_v24 = vshll.u32 %v1535_v57, 8  ;;  %v128_v52 = vld [vmem:[%s3412_s6] sm:$0xff]  ;;  %vm3431_vm10 = vmmov %vm3430_vm0 }
  0xa5   :  { %v658_v21 = vsel %vm651_vm3, %v654_v55, %v657_v18  ;;  %v1075_v59 = vsel %vm1068_vm12, %v1071_v23, %v1074_v14  ;;  %297 = vadd.xlane.f32.xlu1 %v2887_v45  ;;  %230 = vadd.xlane.f32.xlu0 %v229_v2  ;;  %v1398_v41 = vor.u32 4788187, %v1397_v5  ;;  %v1570_v50 = vsel %vm1560_vm14, %v1567_v0, %v1569_v40 }
  0xa6   :  { %v659_v35 = vsel %vm648_vm13, nan, %v658_v21  ;;  %v1076_v33 = vsel %vm648_vm13, nan, %v1075_v59  ;;  %v1401_v45 = vcvt.s32.f32 %v1394_v29  ;;  %v1573_v57 = vsel %vm1561_vm5, %v1555_v53, %v1572_v3  ;;  %v3074_v53 = vld [vmem:[%s3407_s3] sm:$0xff] }
  0xa7   :  { %v764_v51 = vsub.f32 %v2978_v58, %v659_v35  ;;  %v1180_v62 = vsub.f32 %v2982_v56, %v1076_v33  ;;  %v1399_v0 = vand.u32 2147483647, %v1398_v41  ;;  %v1574_v8 = vsel %vm1560_vm14, %v1571_v43, %v1573_v57  ;;  %v92_v56 = vld [vmem:[%s3416_s0 + $0x8] sm:$0xff] }
  0xa8   :  { %v3064_v22 = vmul.u32.u64.low %v1575_v24, %v1574_v8  ;;  %v3065_v44 = vmul.u32.u64.high %v1575_v24, %v1574_v8, %v3064_v22  ;;  %v3067_v31 = vmul.u32.u64.low %v1575_v24, %v1570_v50  ;;  %v3068_v20 = vmul.u32.u64.high %v1575_v24, %v1570_v50, %v3067_v31  ;;  %v94_v43 = vld [vmem:[%s3417_s5 + $0x8] sm:$0xff] }
  0xa9   :  { %v132_v37 = vsub.f32 %v128_v52, %v130_v27  ;;  %v1218_v58 = vand.u32 2139095040, %v3074_v53  ;;  %300 = vadd.xlane.f32.xlu1 %v2897_v39  ;;  %160 = vadd.xlane.f32.xlu0 %v2993_v54  ;;  %v192_v12 = vsel %vm188_vm15, %v2890_v16, 0.0  ;;  %v257_v40 = vsel %vm3430_vm0, %v2999_v63, 0.0 }
  0xaa   :  { %v256_v39 = vsel %vm254_vm6, %v2954_v11, 0.0  ;;  %v1191_v54 = vmul.f32 %v2990_v61, %v2872_v49  ;;  %v1405_v16 = vsub.s32 4, %v2899_v9  ;;  %v766_v3 = vmul.f32 %v764_v51, %v144_v6  ;;  %v178_v11 = vld [vmem:[%s3414_s7] sm:$0xff] }
  0xab   :  { %v1182_v4 = vmul.f32 %v1180_v62, %v144_v6  ;;  %v1402_v18 = vmul.f32 %v1401_v45, %v1399_v0  ;;  %v1582_v14 = vmul.u32 %v1575_v24, %v3024_v38  ;;  %vm1584_vm7 = vc.u32 %v3065_v44, %v3067_v31  ;;  %v180_v61 = vld [vmem:[%s3413_s2] sm:$0xff] }
  0xac   :  { %v1585_v63 = vadd.s32 1, %v3068_v20  ;;  %v97_v29 = vmul.f32 %v2913_v19, %v2913_v19  ;;  %v96_v36 = vsub.f32 %v92_v56, %v94_v43  ;;  %v3111_v38 = vld [vmem:[%s3408_s8] sm:$0xff]  ;;  %v1219_v55 = vshrl.u32 %v1218_v58, 23  ;;  %v3117_v19 = vld [vmem:[%s3407_s3 + $0x8] sm:$0xff] }
  0xad   :  { %v1426_v5 = vand.u32 2139095040, %v3111_v38  ;;  %258 = vadd.xlane.f32.xlu1 %v257_v40  ;;  %193 = vadd.xlane.f32.xlu0 %v192_v12  ;;  %vm1321_vm9 = vcmp.lt.s32.totalorder %v3117_v19, 0  ;;  %v260_v23 = vsel %vm3431_vm10, %v256_v39, 0.0  ;;  %v1195_v2 = vsel %vm295_vm1, %v1191_v54, 0.0 }
  0xae   :  { %v1406_v24 = vsel %vm1321_vm9, %v1405_v16, %v2899_v9  ;;  %v1586_v21 = vsel %vm1584_vm7, %v1585_v63, %v3068_v20  ;;  %v150_v59 = vmul.f32 %v144_v6, %v132_v37  ;;  %v1403_v41 = vxor.u32 2147483648, %v1402_v18 }
  0xaf   :  { %v1587_v50 = vadd.s32 %v1586_v21, %v1582_v14  ;;  %v182_v52 = vsub.f32 %v178_v11, %v180_v61  ;;  %v1184_v27 = vmul.f32 %v766_v3, %v766_v3  ;;  %v1186_v35 = vmul.f32 %v1182_v4, %v1182_v4  ;;  %v3155_v4 = vld [vmem:[%s3408_s8 + $0x8] sm:$0xff] }
  0xb0   :  { %v99_v33 = vmul.f32 %v97_v29, %v2822_v10  ;;  %v98_v45 = vmul.f32 %v96_v36, %v96_v36  ;;  %vm3132_vm3 = vcmp.le.f32.partialorder %v1319_v47, 0.7853982  ;;  %v1215_v51 = vand.u32 2147483647, %v3074_v53 }
  0xb1   :  { %261 = vadd.xlane.f32.xlu1 %v260_v23  ;;  %1196 = vadd.xlane.f32.xlu0 %v1195_v2  ;;  %v1588_v57 = vadd.s32 536870912, %v1587_v50  ;;  %v2129_v62 = vadd.s32 4294967169, %v1219_v55  ;;  %v1427_v0 = vshrl.u32 %v1426_v5, 23  ;;  %v1408_v8 = vsel %vm3132_vm3, 0, %v1406_v24 }
  0xb2   :  { %v152_v6 = vmul.f32 %v150_v59, %v150_v59  ;;  %v1404_v22 = vsel %vm1321_vm9, %v1403_v41, %v1402_v18  ;;  %v102_v17 = vsel %vm101_vm8, %v99_v33, 0.0  ;;  %v100_v47 = vmul.f32 %v98_v45, %v2863_v1 }
  0xb3   :  { %v1589_v20 = vshrl.u32 %v1588_v57, 30  ;;  %v1225_v37 = vadd.s32 1, %v2129_v62  ;;  %v184_v58 = vmul.f32 %v182_v52, %v182_v52  ;;  %v1188_v12 = vadd.f32 %v1186_v35, %v1184_v27 }
  0xb4   :  { %v1222_v40 = vand.u32 8388607, %v1215_v51  ;;  %v1412_v39 = vadd.s32 3, %v1408_v8  ;;  %vm3147_vm13 = vcmp.le.f32.partialorder %v1527_v46, 0.7853982  ;;  %vm1529_vm14 = vcmp.lt.s32.totalorder %v3155_v4, 0 }
  0xb5   :  { %v1590_v56 = vshll.u32 %v1589_v20, 30  ;;  %v1613_v43 = vsub.s32 4, %v1589_v20  ;;  %103 = vadd.xlane.f32.xlu1 %v102_v17  ;;  %vm1226_vm12 = vcmp.gt.s32.totalorder %v1225_v37, 0  ;;  %v1423_v3 = vand.u32 2147483647, %v3111_v38 }
  0xb6   :  { %v1227_v16 = vsel %vm1226_vm12, %v1225_v37, 0  ;;  %v2137_v63 = vadd.s32 4294967169, %v1427_v0  ;;  %v1407_v15 = vsel %vm3132_vm3, %v3117_v19, %v1404_v22  ;;  %v105_v46 = vsel %vm101_vm8, %v100_v47, 0.0 }
  0xb7   :  { %v3158_v18 = vsub.s32 %v1587_v50, %v1590_v56  ;;  %v1229_v14 = vand.u32 31, %v1227_v16  ;;  %v154_v29 = vmul.f32 %v152_v6, %v2822_v10  ;;  %v186_v36 = vmul.f32 %v184_v58, %v2822_v10 }
  0xb8   :  { %v1614_v61 = vsel %vm1529_vm14, %v1613_v43, %v1589_v20  ;;  %v1190_v5 = vmul.f32 %v1188_v12, %v2866_v60  ;;  %v1223_v55 = vor.u32 8388608, %v1222_v40  ;;  %v3170_v23 = vand.u32 3, %v1412_v39 }
  0xb9   :  { %v1593_v11 = vsub.s32 0, %v3158_v18  ;;  %106 = vadd.xlane.f32.xlu1 %v105_v46  ;;  %v1583_v2 = vadd.s32 %v3067_v31, %v3065_v44  ;;  %v3174_v24 = vand.u32 3, %v1408_v8  ;;  %v3178_v21 = vand.u32 8388607, %v1423_v3 }
  0xba   :  { %2223 = vcosq.f32 %v1407_v15  ;;  %v1230_v41 = vsub.s32 32, %v1229_v14  ;;  %v1433_v50 = vadd.s32 1, %v2137_v63  ;;  %v3183_v52 = vsel %vm3147_vm13, 0, %v1614_v61 }
  0xbb   :  { %v2142_v59 = vmin.u32 %v1593_v11, %v3158_v18  ;;  %2225 = vsinq.f32 %v1407_v15  ;;  %v156_v27 = vsel %vm101_vm8, %v154_v29, 0.0  ;;  %v189_v44 = vsel %vm188_vm15, %v186_v36, 0.0 }
  0xbc   :  { %v1192_v35 = vsel %vm295_vm1, %v1190_v5, 0.0  ;;  %v1232_v33 = vshll.u32 %v2256_v26, %v1229_v14  ;;  %v3189_v45 = vshll.u32 %v1223_v55, 8  ;;  %v1228_v9 = vshrl.u32 %v1227_v16, 5 }
  0xbd   :  { %v1595_v31 = vclz %v2142_v59  ;;  %157 = vadd.xlane.f32.xlu1 %v156_v27  ;;  %v1235_v57 = vshll.u32 %v2257_v28, %v1229_v14  ;;  %v1238_v62 = vshll.u32 %v2258_v30, %v1229_v14  ;;  %v1431_v0 = vor.u32 8388608, %v3178_v21 }
  0xbe   :  { %v3195_v6 = vadd.s32 3, %v3183_v52  ;;  %v1233_v22 = vshrl.u32 %v2257_v28, %v1230_v41  ;;  %vm1434_vm4 = vcmp.gt.s32.totalorder %v1433_v50, 0  ;;  %v1231_v20 = vshrl.u32 %v2256_v26, %v1230_v41 }
  0xbf   :  { %v2143_v8 = vadd.s32 4294967294, %v1595_v31  ;;  %v1236_v37 = vshrl.u32 %v2258_v30, %v1230_v41  ;;  %v1239_v17 = vshrl.u32 %v2259_v32, %v1230_v41  ;;  %v1241_v47 = vshll.u32 %v2259_v32, %v1229_v14 }
  0xc0   :  { %v1234_v58 = vor.u32 %v1233_v22, %v1232_v33  ;;  %v1242_v12 = vshrl.u32 %v2260_v34, %v1230_v41  ;;  %v1244_v56 = vshll.u32 %v2260_v34, %v1229_v14  ;;  %v1245_v16 = vshrl.u32 %v2261_v42, %v1230_v41 }
  0xc1   :  { %vm2144_vm5 = vcmp.lt.s32.totalorder %v2143_v8, 0  ;;  %190 = vadd.xlane.f32.xlu1 %v189_v44  ;;  %v1237_v40 = vor.u32 %v1236_v37, %v1235_v57  ;;  %v1240_v39 = vor.u32 %v1239_v17, %v1238_v62  ;;  %vm1247_vm6 = vcmp.lt.s32.totalorder %v1228_v9, 1 }
  0xc2   :  { %v1598_v43 = vsel %vm2144_vm5, 0, %v2143_v8  ;;  %v1243_v29 = vor.u32 %v1242_v12, %v1241_v47  ;;  %v1246_v36 = vor.u32 %v1245_v16, %v1244_v56  ;;  %vm1248_vm11 = vcmp.lt.s32.totalorder %v1228_v9, 2 }
  0xc3   :  { %v1599_v63 = vsub.s32 32, %v1598_v43  ;;  %v1600_v15 = vshll.u32 %v3158_v18, %v1598_v43  ;;  %v1603_v46 = vsub.s32 4294967266, %v1598_v43  ;;  %vm1249_vm15 = vcmp.lt.s32.totalorder %v1228_v9, 3 }
  0xc4   :  { %v3206_v11 = vpop.eup %2223  ;;  %vm1250_vm2 = vcmp.lt.s32.totalorder %v1228_v9, 4  ;;  %v1251_v14 = vsel %vm1247_vm6, %v1231_v20, %v1234_v58  ;;  %v1255_v41 = vsel %vm1247_vm6, %v1234_v58, %v1237_v40  ;;  %v1259_v44 = vsel %vm1247_vm6, %v1237_v40, %v1240_v39 }
  0xc5   :  { %v1601_v61 = vshrl.u32 %v1583_v2, %v1599_v63  ;;  %v1604_v5 = vadd.s32 127, %v1603_v46  ;;  %1193 = vadd.xlane.f32.xlu1 %v1192_v35  ;;  %v3208_v55 = vpop.eup %2225  ;;  %v1252_v59 = vsel %vm1250_vm2, %v1240_v39, 2102212464  ;;  %v1256_v27 = vsel %vm1250_vm2, %v1243_v29, 920167782 }
  0xc6   :  { %v1253_v33 = vsel %vm1249_vm15, %v1237_v40, %v1252_v59  ;;  %v1257_v57 = vsel %vm1249_vm15, %v1240_v39, %v1256_v27  ;;  %v1419_v62 = vxor.u32 2147483648, %v3206_v11  ;;  %v1260_v8 = vsel %vm1250_vm2, %v1246_v36, 1326507024 }
  0xc7   :  { %v1602_v18 = vor.u32 %v1601_v61, %v1600_v15  ;;  %v1605_v31 = vshll.u32 %v1604_v5, 23  ;;  %v1258_v2 = vsel %vm1248_vm11, %v1255_v41, %v1257_v57  ;;  %v1435_v35 = vsel %vm1434_vm4, %v1433_v50, 0 }
  0xc8   :  { %v1254_v37 = vsel %vm1248_vm11, %v1251_v14, %v1253_v33  ;;  %v1261_v17 = vsel %vm1249_vm15, %v1243_v29, %v1260_v8  ;;  %v3219_v58 = vmul.u32.u64.low %v3189_v45, %v1258_v2  ;;  %v3220_v12 = vmul.u32.u64.high %v3189_v45, %v1258_v2, %v3219_v58 }
  0xc9   :  { %v1606_v22 = vor.u32 4788187, %v1605_v31  ;;  %v1609_v20 = vcvt.s32.f32 %v1602_v18  ;;  %v1262_v47 = vsel %vm1248_vm11, %v1259_v44, %v1261_v17  ;;  %v3223_v56 = vshrl.u32 %v1435_v35, 5 }
  0xca   :  { %v3226_v40 = vmul.u32.u64.low %v3189_v45, %v1262_v47  ;;  %v3227_v39 = vmul.u32.u64.high %v3189_v45, %v1262_v47, %v3226_v40  ;;  %v1437_v50 = vand.u32 31, %v1435_v35  ;;  %v1416_v16 = vxor.u32 2147483648, %v3208_v55 }
  0xcb   :  { %v1607_v43 = vand.u32 2147483647, %v1606_v22  ;;  %v1270_v63 = vmul.u32 %v3189_v45, %v1254_v37  ;;  %vm1455_vm0 = vcmp.lt.s32.totalorder %v3223_v56, 1  ;;  %vm1457_vm7 = vcmp.lt.s32.totalorder %v3223_v56, 3 }
  0xcc   :  { %v1438_v15 = vsub.s32 32, %v1437_v50  ;;  %v1440_v46 = vshll.u32 %v2256_v26, %v1437_v50  ;;  %vm1458_vm9 = vcmp.lt.s32.totalorder %v3223_v56, 4  ;;  %v1273_v29 = vadd.s32 1, %v3220_v12 }
  0xcd   :  { %v1610_v9 = vmul.f32 %v1609_v20, %v1607_v43  ;;  %v1443_v36 = vshll.u32 %v2257_v28, %v1437_v50  ;;  %v1446_v61 = vshll.u32 %v2258_v30, %v1437_v50  ;;  %v1449_v5 = vshll.u32 %v2259_v32, %v1437_v50 }
  0xce   :  { %vm1415_vm10 = vcmp.eq.s32.totalorder %v3170_v23, 0  ;;  %vm1418_vm3 = vcmp.eq.s32.totalorder %v3170_v23, 2  ;;  %vm1272_vm12 = vc.u32 %v3227_v39, %v3219_v58  ;;  %v1439_v14 = vshrl.u32 %v2256_v26, %v1438_v15 }
  0xcf   :  { %v1611_v45 = vxor.u32 2147483648, %v1610_v9  ;;  %v1452_v59 = vshll.u32 %v2260_v34, %v1437_v50  ;;  %vm1831_vm4 = vcmp.eq.s32.totalorder %v3174_v24, 0  ;;  %vm1834_vm5 = vcmp.eq.s32.totalorder %v3174_v24, 2 }
  0xd0   :  { %v1274_v41 = vsel %vm1272_vm12, %v1273_v29, %v3220_v12  ;;  %v1441_v27 = vshrl.u32 %v2257_v28, %v1438_v15  ;;  %v1444_v44 = vshrl.u32 %v2258_v30, %v1438_v15  ;;  %v1447_v18 = vshrl.u32 %v2259_v32, %v1438_v15 }
  0xd1   :  { %v1612_v31 = vsel %vm1529_vm14, %v1611_v45, %v1610_v9  ;;  %v1275_v33 = vadd.s32 %v1274_v41, %v1270_v63  ;;  %v1450_v26 = vshrl.u32 %v2260_v34, %v1438_v15  ;;  %v1453_v57 = vshrl.u32 %v2261_v42, %v1438_v15 }
  0xd2   :  { %v1615_v2 = vsel %vm3147_vm13, %v3155_v4, %v1612_v31  ;;  %v1442_v8 = vor.u32 %v1441_v27, %v1440_v46  ;;  %v1445_v35 = vor.u32 %v1444_v44, %v1443_v36  ;;  %v1448_v22 = vor.u32 %v1447_v18, %v1446_v61 }
  0xd3   :  { %2227 = vcosq.f32 %v1615_v2  ;;  %v1276_v28 = vadd.s32 536870912, %v1275_v33  ;;  %v1451_v30 = vor.u32 %v1450_v26, %v1449_v5  ;;  %v1454_v20 = vor.u32 %v1453_v57, %v1452_v59 }
  0xd4   :  { %2229 = vsinq.f32 %v1615_v2  ;;  %vm1456_vm6 = vcmp.lt.s32.totalorder %v3223_v56, 2  ;;  %v1460_v32 = vsel %vm1458_vm9, %v1448_v22, 2102212464  ;;  %v1463_v34 = vsel %vm1455_vm0, %v1442_v8, %v1445_v35 }
  0xd5   :  { %vm1411_vm14 = vweird.f32 %v3117_v19  ;;  %v3264_v42 = vshrl.u32 %v1276_v28, 30  ;;  %v1459_v54 = vsel %vm1455_vm0, %v1439_v14, %v1442_v8  ;;  %v1464_v37 = vsel %vm1458_vm9, %v1451_v30, 920167782 }
  0xd6   :  { %v1467_v17 = vsel %vm1455_vm0, %v1445_v35, %v1448_v22  ;;  %v1461_v47 = vsel %vm1457_vm7, %v1445_v35, %v1460_v32  ;;  %v1465_v12 = vsel %vm1457_vm7, %v1448_v22, %v1464_v37  ;;  %v1468_v43 = vsel %vm1458_vm9, %v1454_v20, 1326507024 }
  0xd7   :  { %v1471_v40 = vshll.u32 %v1431_v0, 8  ;;  %v2035_v50 = vand.u32 3, %v3183_v52  ;;  %v1278_v63 = vshll.u32 %v3264_v42, 30  ;;  %v1466_v9 = vsel %vm1456_vm6, %v1463_v34, %v1465_v12 }
  0xd8   :  { %v1469_v15 = vsel %vm1457_vm7, %v1451_v30, %v1468_v43  ;;  %v1621_v46 = vand.u32 3, %v3195_v6  ;;  %v1462_v52 = vsel %vm1456_vm6, %v1459_v54, %v1461_v47  ;;  %vm1414_vm13 = vcmp.lt.s32.totalorder %v3170_v23, 2 }
  0xd9   :  { %v1470_v29 = vsel %vm1456_vm6, %v1467_v17, %v1469_v15  ;;  %v3289_v36 = vmul.u32.u64.low %v1471_v40, %v1466_v9  ;;  %v3290_v61 = vmul.u32.u64.high %v1471_v40, %v1466_v9, %v3289_v36  ;;  %v1279_v21 = vsub.s32 %v1275_v33, %v1278_v63 }
  0xda   :  { %v3295_v0 = vmul.u32.u64.low %v1471_v40, %v1470_v29  ;;  %v3296_v5 = vmul.u32.u64.high %v1471_v40, %v1470_v29, %v3295_v0  ;;  %v1417_v6 = vsel %vm1415_vm10, %v3206_v11, %v1416_v16  ;;  %v1420_v45 = vsel %vm1418_vm3, %v1419_v62, %v3208_v55 }
  0xdb   :  { %vm1619_vm11 = vweird.f32 %v3155_v4  ;;  %vm1830_vm15 = vcmp.lt.s32.totalorder %v3174_v24, 2  ;;  %v1833_v56 = vsel %vm1831_vm4, %v3206_v11, %v1416_v16  ;;  %v1836_v14 = vsel %vm1834_vm5, %v1419_v62, %v3208_v55 }
  0xdc   :  { %v1281_v59 = vsub.s32 0, %v1279_v21  ;;  %vm2037_vm2 = vcmp.eq.s32.totalorder %v2035_v50, 0  ;;  %vm2040_vm0 = vcmp.eq.s32.totalorder %v2035_v50, 2  ;;  %v1478_v23 = vmul.u32 %v1471_v40, %v1462_v52 }
  0xdd   :  { %v1481_v41 = vadd.s32 1, %v3290_v61  ;;  %v2228_v27 = vpop.eup %2227  ;;  %v1421_v44 = vsel %vm1414_vm13, %v1417_v6, %v1420_v45  ;;  %vm1626_vm7 = vcmp.eq.s32.totalorder %v1621_v46, 2  ;;  %vm1480_vm9 = vc.u32 %v3296_v5, %v3289_v36 }
  0xde   :  { %v2130_v18 = vmin.u32 %v1281_v59, %v1279_v21  ;;  %v2230_v16 = vpop.eup %2229  ;;  %vm1623_vm10 = vcmp.eq.s32.totalorder %v1621_v46, 0  ;;  %v1627_v31 = vxor.u32 2147483648, %v2228_v27  ;;  %v1837_v11 = vsel %vm1830_vm15, %v1833_v56, %v1836_v14 }
  0xdf   :  { %v1482_v55 = vsel %vm1480_vm9, %v1481_v41, %v3290_v61  ;;  %vm1622_vm3 = vcmp.lt.s32.totalorder %v1621_v46, 2  ;;  %v1624_v62 = vxor.u32 2147483648, %v2230_v16  ;;  %vm2036_vm12 = vcmp.lt.s32.totalorder %v2035_v50, 2 }
  0xe0   :  { %v1283_v33 = vclz %v2130_v18  ;;  %v1422_v26 = vsel %vm1411_vm14, nan, %v1421_v44  ;;  %v1628_v57 = vsel %vm1626_vm7, %v1627_v31, %v2230_v16  ;;  %v2042_v2 = vsel %vm2040_vm0, %v1627_v31, %v2230_v16 }
  0xe1   :  { %v1483_v8 = vadd.s32 %v1482_v55, %v1478_v23  ;;  %v1625_v35 = vsel %vm1623_vm10, %v2228_v27, %v1624_v62  ;;  %v1838_v22 = vsel %vm1411_vm14, nan, %v1837_v11  ;;  %v2039_v24 = vsel %vm2037_vm2, %v2228_v27, %v1624_v62 }
  0xe2   :  { %v2131_v28 = vadd.s32 4294967294, %v1283_v33  ;;  %v1629_v30 = vsel %vm1622_vm3, %v1625_v35, %v1628_v57  ;;  %v2043_v20 = vsel %vm2036_vm12, %v2039_v24, %v2042_v2  ;;  %v1271_v37 = vadd.s32 %v3219_v58, %v3227_v39 }
  0xe3   :  { %v1484_v32 = vadd.s32 536870912, %v1483_v8  ;;  %v1630_v34 = vsel %vm1619_vm11, nan, %v1629_v30  ;;  %v2044_v54 = vsel %vm1619_vm11, nan, %v2043_v20  ;;  %vm1217_vm5 = vcmp.lt.s32.totalorder %v3074_v53, 0 }
  0xe4   :  { %vm2132_vm4 = vcmp.lt.s32.totalorder %v2131_v28, 0  ;;  %v1632_v17 = vsub.f32 %v1422_v26, %v1630_v34  ;;  %v2046_v47 = vsub.f32 %v1838_v22, %v2044_v54  ;;  %v1479_v44 = vadd.s32 %v3289_v36, %v3296_v5 }
  0xe5   :  { %v1286_v19 = vsel %vm2132_vm4, 0, %v2131_v28  ;;  %v1485_v12 = vshrl.u32 %v1484_v32, 30  ;;  %vm3346_vm14 = vcmp.le.f32.partialorder %v1215_v51, 0.7853982  ;;  %v1301_v26 = vsub.s32 4, %v3264_v42 }
  0xe6   :  { %v1287_v43 = vsub.s32 32, %v1286_v19  ;;  %v1288_v40 = vshll.u32 %v1279_v21, %v1286_v19  ;;  %v1291_v50 = vsub.s32 4294967266, %v1286_v19  ;;  %v2048_v63 = vmul.f32 %v1632_v17, %v1632_v17 }
  0xe7   :  { %v2050_v9 = vmul.f32 %v2046_v47, %v2046_v47  ;;  %v1486_v15 = vshll.u32 %v1485_v12, 30  ;;  %v1509_v22 = vsub.s32 4, %v1485_v12  ;;  %vm1425_vm13 = vcmp.lt.s32.totalorder %v3111_v38, 0 }
  0xe8   :  { %v1289_v46 = vshrl.u32 %v1271_v37, %v1287_v43  ;;  %v1292_v29 = vadd.s32 127, %v1291_v50  ;;  %vm1424_vm11 = vcmp.le.f32.partialorder %v1423_v3, 0.7853982  ;;  %vm1307_vm3 = vweird.f32 %v3074_v53 }
  0xe9   :  { %v2052_v61 = vadd.f32 %v2050_v9, %v2048_v63  ;;  %v1487_v52 = vsub.s32 %v1483_v8, %v1486_v15  ;;  %v1302_v8 = vsel %vm1217_vm5, %v1301_v26, %v3264_v42  ;;  %v1510_v20 = vsel %vm1425_vm13, %v1509_v22, %v1485_v12 }
  0xea   :  { %v1290_v4 = vor.u32 %v1289_v46, %v1288_v40  ;;  %v1293_v0 = vshll.u32 %v1292_v29, 23  ;;  %v1304_v24 = vsel %vm3346_vm14, 0, %v1302_v8  ;;  %v1512_v37 = vsel %vm1424_vm11, 0, %v1510_v20 }
  0xeb   :  { %v2054_v6 = vmul.f32 %v2052_v61, %v2872_v49  ;;  %v1489_v58 = vsub.s32 0, %v1487_v52  ;;  %v1308_v32 = vadd.s32 3, %v1304_v24  ;;  %v1726_v19 = vand.u32 3, %v1304_v24 }
  0xec   :  { %v1294_v39 = vor.u32 4788187, %v1293_v0  ;;  %v1297_v45 = vcvt.s32.f32 %v1290_v4  ;;  %v1516_v43 = vadd.s32 3, %v1512_v37  ;;  %v1932_v12 = vand.u32 3, %v1512_v37 }
  0xed   :  { %v2058_v56 = vsel %vm295_vm1, %v2054_v6, 0.0  ;;  %v2138_v14 = vmin.u32 %v1489_v58, %v1487_v52  ;;  %v1309_v47 = vand.u32 3, %v1308_v32  ;;  %vm1728_vm0 = vcmp.eq.s32.totalorder %v1726_v19, 0 }
  0xee   :  { %2059 = vadd.xlane.f32.xlu0 %v2058_v56  ;;  %v1295_v21 = vand.u32 2147483647, %v1294_v39  ;;  %vm1731_vm7 = vcmp.eq.s32.totalorder %v1726_v19, 2  ;;  %v1517_v3 = vand.u32 3, %v1516_v43  ;;  %vm1727_vm10 = vcmp.lt.s32.totalorder %v1726_v19, 2 }
  0xef   :  { %v1491_v59 = vclz %v2138_v14  ;;  %vm1311_vm15 = vcmp.eq.s32.totalorder %v1309_v47, 0  ;;  %vm1314_vm2 = vcmp.eq.s32.totalorder %v1309_v47, 2  ;;  %vm1310_vm9 = vcmp.lt.s32.totalorder %v1309_v47, 2 }
  0xf0   :  { %v1298_v23 = vmul.f32 %v1297_v45, %v1295_v21  ;;  %vm1522_vm12 = vcmp.eq.s32.totalorder %v1517_v3, 2  ;;  %vm1934_vm4 = vcmp.eq.s32.totalorder %v1932_v12, 0 }
  0xf1   :  { %v2139_v41 = vadd.s32 4294967294, %v1491_v59 }
  0xf2   :  { %v1299_v27 = vxor.u32 2147483648, %v1298_v23 }
  0xf3   :  { %vm2140_vm6 = vcmp.lt.s32.totalorder %v2139_v41, 0 }
  0xf4   :  { %v1494_v18 = vsel %vm2140_vm6, 0, %v2139_v41  ;;  %v1300_v16 = vsel %vm1217_vm5, %v1299_v27, %v1298_v23  ;;  %vm1937_vm5 = vcmp.eq.s32.totalorder %v1932_v12, 2  ;;  %vm1519_vm6 = vcmp.eq.s32.totalorder %v1517_v3, 0 }
  0xf5   :  { %v1495_v31 = vsub.s32 32, %v1494_v18  ;;  %v1496_v11 = vshll.u32 %v1487_v52, %v1494_v18  ;;  %v1499_v55 = vsub.s32 4294967266, %v1494_v18  ;;  %v1303_v36 = vsel %vm3346_vm14, %v3074_v53, %v1300_v16  ;;  %v2253_v53 = vld [vmem:[%s3405_s12] sm:$0x3] }
  0xf6   :  { %2231 = vcosq.f32 %v1303_v36  ;;  %vm1518_vm14 = vcmp.lt.s32.totalorder %v1517_v3, 2 }
  0xf7   :  { %v1497_v62 = vshrl.u32 %v1479_v44, %v1495_v31  ;;  %v1500_v33 = vadd.s32 127, %v1499_v55  ;;  %2233 = vsinq.f32 %v1303_v36  ;;  %v114_v36 = vsub.s32 %v2658_v13, %v2345_v7 }
  0xf9   :  { %v1498_v5 = vor.u32 %v1497_v62, %v1496_v11  ;;  %v1501_v51 = vshll.u32 %v1500_v33, 23 }
  0xfb   :  { %v1502_v57 = vor.u32 4788187, %v1501_v51  ;;  %v1505_v2 = vcvt.s32.f32 %v1498_v5 }
  0xfd   :  { %v1503_v35 = vand.u32 2147483647, %v1502_v57 }
  0xff   :  { %v1506_v28 = vmul.f32 %v1505_v2, %v1503_v35 }
 0x100   :  { %v2232_v42 = vpop.eup %2231 }
 0x101   :  { %v1507_v30 = vxor.u32 2147483648, %v1506_v28  ;;  %v2234_v17 = vpop.eup %2233  ;;  %v1315_v50 = vxor.u32 2147483648, %v2232_v42 }
 0x102   :  { %v1312_v40 = vxor.u32 2147483648, %v2234_v17 }
 0x103   :  { %v1508_v34 = vsel %vm1425_vm13, %v1507_v30, %v1506_v28  ;;  %v1316_v9 = vsel %vm1314_vm2, %v1315_v50, %v2234_v17  ;;  %v1733_v46 = vsel %vm1731_vm7, %v1315_v50, %v2234_v17  ;;  %vm1933_vm13 = vcmp.lt.s32.totalorder %v1932_v12, 2 }
 0x104   :  { %v1511_v54 = vsel %vm1424_vm11, %v3111_v38, %v1508_v34  ;;  %v1313_v63 = vsel %vm1311_vm15, %v2232_v42, %v1312_v40  ;;  %v1730_v15 = vsel %vm1728_vm0, %v2232_v42, %v1312_v40  ;;  %vm1515_vm11 = vweird.f32 %v3111_v38 }
 0x105   :  { %2235 = vcosq.f32 %v1511_v54  ;;  %v1317_v52 = vsel %vm1310_vm9, %v1313_v63, %v1316_v9  ;;  %v1734_v0 = vsel %vm1727_vm10, %v1730_v15, %v1733_v46  ;;  %vm62_vm15 = vcmask 58368  }
 0x106   :  { %2237 = vsinq.f32 %v1511_v54  ;;  %v1318_v45 = vsel %vm1307_vm3, nan, %v1317_v52  ;;  %v1735_v14 = vsel %vm1307_vm3, nan, %v1734_v0  ;;  %v63_v55 = vsel %vm62_vm15, %v2253_v53, 0.0 }
 0x107   :  { %vm120_vm2 = vcmask 1041409   ;;  %vm2077_vm0 = vcmask 7168   ;;  %vm2079_vm7 = vcmask 15360   ;;  %vm2082_vm9 = vcmask 31744  }
 0x108   :  { %vm2085_vm10 = vcmask 48128  }
 0x10f   :  { %v2236_v29 = vpop.eup %2235 }
 0x110   :  { %v2238_v61 = vpop.eup %2237  ;;  %v1523_v4 = vxor.u32 2147483648, %v2236_v29 }
 0x111   :  { %v1520_v6 = vxor.u32 2147483648, %v2238_v61 }
 0x112   :  { %v1524_v58 = vsel %vm1522_vm12, %v1523_v4, %v2238_v61  ;;  %v1939_v39 = vsel %vm1937_vm5, %v1523_v4, %v2238_v61 }
 0x113   :  { %v1521_v56 = vsel %vm1519_vm6, %v2236_v29, %v1520_v6  ;;  %v1936_v21 = vsel %vm1934_vm4, %v2236_v29, %v1520_v6 }
 0x114   :  { %v1525_v59 = vsel %vm1518_vm14, %v1521_v56, %v1524_v58  ;;  %v1940_v23 = vsel %vm1933_vm13, %v1936_v21, %v1939_v39 }
 0x115   :  { %v1526_v41 = vsel %vm1515_vm11, nan, %v1525_v59  ;;  %v1941_v27 = vsel %vm1515_vm11, nan, %v1940_v23 }
 0x116   :  { %v1631_v44 = vsub.f32 %v1318_v45, %v1526_v41  ;;  %v2045_v49 = vsub.f32 %v1735_v14, %v1941_v27 }
 0x118   :  { %v2047_v18 = vmul.f32 %v1631_v44, %v1631_v44  ;;  %v2049_v16 = vmul.f32 %v2045_v49, %v2045_v49 }
 0x11a   :  { %v2051_v38 = vadd.f32 %v2049_v16, %v2047_v18 }
 0x11c   :  { %v2053_v31 = vmul.f32 %v2051_v38, %v2866_v60 }
 0x11e   :  { %v2055_v11 = vsel %vm295_vm1, %v2053_v31, 0.0 }
 0x11f   :  { %2056 = vadd.xlane.f32.xlu1 %v2055_v11 }
 0x123   :  { %64 = vadd.xlane.f32.xlu1 %v63_v55 }
 0x12e   :  { %v228_v62 = vpop.xlane.xlu1 %227 }
 0x12f   :  { %2239 = vlog2.f32 %v228_v62 }
 0x132   :  { %v298_v33 = vpop.xlane.xlu1 %297  ;;  %v231_v26 = vpop.xlane.xlu0 %230 }
 0x133   :  { %2241 = vlog2.f32 %v231_v26  ;;  %v307_v5 = vrot.slane %v298_v33, %v114_v36 }
 0x136   :  { %v301_v60 = vpop.xlane.xlu1 %300  ;;  %v161_v34 = vpop.xlane.xlu0 %160 }
 0x137   :  { %v311_v51 = vrot.slane %v301_v60, %v114_v36 }
 0x139   :  { %v312_v57 = vsel %vm120_vm2, %v311_v51, %v307_v5  ;;  %v2240_v2 = vpop.eup %2239 }
 0x13a   :  { %v259_v8 = vpop.xlane.xlu1 %258  ;;  %v314_v35 = vsel %vm62_vm15, %v312_v57, 0.0  ;;  %v233_v24 = vmul.f32 0.6931472, %v2240_v2  ;;  %v194_v40 = vpop.xlane.xlu0 %193 }
 0x13b   :  { %315 = vadd.xlane.f32.xlu0 %v314_v35  ;;  %v204_v46 = vrot.slane %v194_v40, %v114_v36 }
 0x13c   :  { %v236_v7 = vadd.f32 %v233_v24, %v2918_v48 }
 0x13d   :  { %v2242_v22 = vpop.eup %2241 }
 0x13e   :  { %v235_v28 = vmul.f32 0.6931472, %v2242_v22  ;;  %v262_v30 = vpop.xlane.xlu1 %261  ;;  %v263_v54 = vsub.f32 %v236_v7, %v259_v8  ;;  %v1197_v61 = vpop.xlane.xlu0 %1196 }
 0x13f   :  { %v1207_v58 = vrot.slane %v1197_v61, %v114_v36 }
 0x140   :  { %v237_v20 = vadd.f32 %v235_v28, %v2943_v25  ;;  %v265_v19 = vmul.f32 %v263_v54, %v2822_v10  ;;  %v171_v25 = vrot.slane %v161_v34, %v114_v36 }
 0x142   :  { %v104_v13 = vpop.xlane.xlu1 %103  ;;  %v264_v32 = vsub.f32 %v237_v20, %v262_v30  ;;  %v274_v63 = vrot.slane %v265_v19, %v114_v36 }
 0x143   :  { %v115_v17 = vrot.slane %v104_v13, %v114_v36 }
 0x144   :  { %v266_v42 = vmul.f32 %v264_v32, %v2863_v1 }
 0x146   :  { %v107_v37 = vpop.xlane.xlu1 %106  ;;  %v278_v12 = vrot.slane %v266_v42, %v114_v36 }
 0x147   :  { %v119_v47 = vrot.slane %v107_v37, %v114_v36 }
 0x148   :  { %v279_v10 = vsel %vm120_vm2, %v278_v12, %v274_v63 }
 0x149   :  { %v121_v43 = vsel %vm120_vm2, %v119_v47, %v115_v17  ;;  %v281_v0 = vsel %vm62_vm15, %v279_v10, 0.0 }
 0x14a   :  { %v158_v50 = vpop.xlane.xlu1 %157  ;;  %v123_v3 = vsel %vm62_vm15, %v121_v43, 0.0 }
 0x14b   :  { %v167_v48 = vrot.slane %v158_v50, %v114_v36  ;;  %124 = vadd.xlane.f32.xlu1 %v123_v3 }
 0x14d   :  { %v172_v9 = vsel %vm120_vm2, %v171_v25, %v167_v48 }
 0x14e   :  { %v191_v15 = vpop.xlane.xlu1 %190  ;;  %v174_v1 = vsel %vm62_vm15, %v172_v9, 0.0 }
 0x14f   :  { %v200_v29 = vrot.slane %v191_v15, %v114_v36  ;;  %175 = vadd.xlane.f32.xlu0 %v174_v1 }
 0x151   :  { %v205_v52 = vsel %vm120_vm2, %v204_v46, %v200_v29 }
 0x152   :  { %v1194_v4 = vpop.xlane.xlu1 %1193  ;;  %v207_v6 = vsel %vm62_vm15, %v205_v52, 0.0 }
 0x153   :  { %v1203_v39 = vrot.slane %v1194_v4, %v114_v36  ;;  %282 = vadd.xlane.f32.xlu0 %v281_v0  ;;  %208 = vadd.xlane.f32.xlu1 %v207_v6 }
 0x155   :  { %v1208_v45 = vsel %vm120_vm2, %v1207_v58, %v1203_v39 }
 0x156   :  { %v1210_v56 = vsel %vm62_vm15, %v1208_v45, 0.0 }
 0x157   :  { %1211 = vadd.xlane.f32.xlu1 %v1210_v56 }
 0x17b   :  { %v2060_v14 = vpop.xlane.xlu0 %2059 }
 0x17c   :  { %v2070_v59 = vrot.slane %v2060_v14, %v114_v36 }
 0x1ac   :  { %v2057_v21 = vpop.xlane.xlu1 %2056 }
 0x1ad   :  { %v2066_v23 = vrot.slane %v2057_v21, %v114_v36 }
 0x1af   :  { %v2071_v41 = vsel %vm120_vm2, %v2070_v59, %v2066_v23 }
 0x1b0   :  { %v2073_v27 = vsel %vm62_vm15, %v2071_v41, 0.0  ;;  %v65_v44 = vpop.xlane.xlu1 %64 }
 0x1b1   :  { %2074 = vadd.xlane.f32.xlu0 %v2073_v27  ;;  %v66_v18 = vadd.f32 1e-08, %v65_v44 }
 0x1b3   :  { %2243 = vrcp.f32 %v66_v18 }
 0x1bd   :  { %v2244_v55 = vpop.eup %2243 }
 0x1c8   :  { %v316_v49 = vpop.xlane.xlu0 %315 }
 0x1c9   :  { %v317_v16 = vmul.f32 2.0, %v316_v49 }
 0x1cb   :  { %v318_v38 = vadd.f32 1e-08, %v317_v16 }
 0x1cd   :  { %2245 = vrcp.f32 %v318_v38 }
 0x1d7   :  { %v2246_v5 = vpop.eup %2245 }
 0x1d8   :  { %v125_v31 = vpop.xlane.xlu1 %124 }
 0x1d9   :  { %v127_v36 = vmul.f32 %v2244_v55, %v125_v31 }
 0x1dc   :  { %v176_v11 = vpop.xlane.xlu0 %175 }
 0x1dd   :  { %v177_v62 = vmul.f32 %v2244_v55, %v176_v11 }
 0x1df   :  { %v2078_v51 = vsel %vm2077_vm0, %v127_v36, %v177_v62 }
 0x1e0   :  { %v209_v53 = vpop.xlane.xlu1 %208  ;;  %v283_v33 = vpop.xlane.xlu0 %282 }
 0x1e1   :  { %v210_v26 = vmul.f32 %v2244_v55, %v209_v53  ;;  %v284_v57 = vmul.f32 %v2244_v55, %v283_v33 }
 0x1e3   :  { %v2080_v2 = vsel %vm2079_vm7, %v2078_v51, %v210_v26 }
 0x1e4   :  { %v1212_v60 = vpop.xlane.xlu1 %1211  ;;  %v2081_v22 = vsel %vm101_vm8, %v2080_v2, %v284_v57 }
 0x1e5   :  { %v1214_v8 = vmul.f32 %v2246_v5, %v1212_v60 }
 0x1e7   :  { %v2083_v28 = vsel %vm2082_vm9, %v2081_v22, %v1214_v8 }
 0x23e   :  { %v2075_v35 = vpop.xlane.xlu0 %2074 }
 0x23f   :  { %v2076_v24 = vmul.f32 %v2246_v5, %v2075_v35 }
 0x241   :  { %v2084_v30 = vsel %vm295_vm1, %v2083_v28, %v2076_v24 }
 0x242   :  { %v2086_v20 = vsel %vm2085_vm10, %v2084_v30, 0.0 }
 0x243   :  { %2087 = vst.msk [vmem:[%s3418_s14] sm:$0x3] %vm62_vm15, %v2086_v20 }

</bundles_post_ra>
